<compile_context>
chip_gen: v6e
topology: v6e:2x2x1
jax: 0.10.0
libtpu: 0.0.40
codegen_flags: <defaults>
</compile_context>

<pallas_src>
import functools

import jax
import jax.numpy as jnp
from jax.experimental import pallas as pl
from jax.experimental.pallas import tpu as pltpu


def _ensemble_kernel(x_ref, wconv_ref, whead_ref, feat_ref, logit_ref,
                     *, Wp, Nout, H, W, inv_P):
    """One (batch, task-group) grid step: 3x3 conv (nine shifted matmuls) -> ReLU ->
    masked global average pool -> block-diagonal classifier head."""
    # ---- all-task 3x3 conv via nine flat-shifted matmuls (bf16 in, f32 MXU accumulation) ----
    conv = None
    for dh in range(3):
        for dw in range(3):
            src = x_ref[0, pl.ds(dh * Wp + dw, Nout), :]              # (Nout, C) bf16
            part = jnp.dot(src, wconv_ref[dh * 3 + dw],
                           preferred_element_type=jnp.float32)        # (Nout, tgD) f32
            conv = part if conv is None else conv + part
    conv = jnp.maximum(conv, 0.0)                                     # ReLU (VPU)

    # ---- masked global average pool; mask synthesized in-kernel (no HBM traffic) -----------
    q = jax.lax.broadcasted_iota(jnp.int32, (Nout, 1), 0)             # flat padded position
    col = q % Wp
    interior = (q >= Wp) & (q < (H + 1) * Wp) & (col >= 1) & (col <= W)
    pooled = jnp.sum(jnp.where(interior, conv, 0.0),
                     axis=0, keepdims=True) * inv_P                   # (1, tgD) f32
    feat_ref[0] = pooled.astype(feat_ref.dtype)

    # ---- block-diagonal classifier head, kept fully in f32 (tiny matmul) -------------------
    logit = jnp.dot(pooled, whead_ref[0], preferred_element_type=jnp.float32)
    logit_ref[0] = logit.astype(logit_ref.dtype)


def _round_up(n, m):
    return ((n + m - 1) // m) * m


def _vmem_bytes(Npad_in, Nout, C, tgD, tgC):
    """Rough per-grid-step VMEM footprint (double-buffered inputs + f32 intermediates)."""
    lane = lambda n: _round_up(max(n, 1), 128)
    sub = lambda n, s=8: _round_up(max(n, 1), s)
    x_b = 2 * sub(Npad_in, 16) * lane(C) * 2          # bf16 activation, double buffered
    wc_b = 2 * 9 * sub(C, 16) * lane(tgD) * 2         # bf16 conv weights
    wh_b = 2 * sub(tgD) * lane(tgC) * 4               # f32 head block
    out_b = 2 * 8 * (lane(tgD) + lane(tgC)) * 4       # tiny (1, 1, N) outputs
    inter = 4 * sub(Nout) * lane(tgD) * 4             # conv / relu / mask intermediates
    return x_b + wc_b + wh_b + out_b + inter


def _pick_task_group(T, D, n_cls, Npad_in, Nout, C, budget=24 << 20):
    """Largest #tasks per grid step whose VMEM footprint fits the budget."""
    if _vmem_bytes(Npad_in, Nout, C, T * D, T * n_cls) <= budget:
        return T
    for tg in range(T - 1, 0, -1):
        if T % tg:
            continue
        if (tg * D) % 128 or (tg * n_cls) % 128:      # lane alignment for partial blocks
            continue
        if _vmem_bytes(Npad_in, Nout, C, tg * D, tg * n_cls) <= budget:
            return tg
    return T  # TODO(synk): spatial (halo) tiling for cases where even one task overflows VMEM


def ensemble_forward(x, conv_weights, cls_weights, *, tasks_per_step=None):
    """
    x            : [B, C, H, W]        (NCHW, like PyTorch)
    conv_weights : [T, D, C, 3, 3]     (per-task Conv2d weight, PyTorch OIHW layout)
    cls_weights  : [T, n_cls, D]       (per-task nn.Linear weight, no bias)
    returns dict(logit=[B, T*n_cls], feature=[B, T*D], aux_logit=None)
    """
    B, C, H, W = x.shape
    T, D, _, KH, KW = conv_weights.shape
    assert (KH, KW) == (3, 3)
    n_cls = cls_weights.shape[1]
    Hp, Wp = H + 2, W + 2
    P = H * W
    Nout = Hp * Wp                 # conv evaluated at every padded position, masked before pool
    halo = Wp + 1                  # max |flat shift| among the nine 3x3 offsets
    Npad_in = Nout + 2 * halo
    TD, TC = T * D, T * n_cls

    tg = tasks_per_step if tasks_per_step is not None else _pick_task_group(
        T, D, n_cls, Npad_in, Nout, C)
    assert T % tg == 0
    G = T // tg
    tgD, tgC = tg * D, tg * n_cls

    # ---- compact kernel inputs (no im2col patches, no pooling matrix) -----------------------
    # channels-last zero-padded activation, spatial flattened, plus a flat-shift halo of zeros
    xp = jnp.pad(x, ((0, 0), (0, 0), (1, 1), (1, 1)))                       # (B, C, Hp, Wp)
    x_flat = jnp.transpose(xp, (0, 2, 3, 1)).reshape(B, Nout, C)            # (B, Hp*Wp, C)
    x_flat = jnp.pad(x_flat, ((0, 0), (halo, halo), (0, 0))).astype(jnp.bfloat16)
    # per-offset conv weights, all tasks concatenated along the output dim: (9, C, T*D)
    w_conv = jnp.transpose(conv_weights, (3, 4, 2, 0, 1)).reshape(9, C, TD).astype(jnp.bfloat16)
    # block-diagonal classifier head per task group, kept in f32 (the head matmul is tiny)
    w_head = jnp.zeros((G, tgD, tgC), jnp.float32)
    for g in range(G):
        for j in range(tg):
            t = g * tg + j
            w_head = w_head.at[g, j * D:(j + 1) * D, j * n_cls:(j + 1) * n_cls].set(
                cls_weights[t].astype(jnp.float32).T)

    kernel = functools.partial(_ensemble_kernel, Wp=Wp, Nout=Nout, H=H, W=W,
                               inv_P=1.0 / float(P))

    flops = B * G * (2 * 9 * Nout * C * tgD + 2 * tgD * tgC)
    bytes_accessed = (B * x_flat.shape[1] * C * 2 + w_conv.size * 2 + w_head.size * 4
                      + B * (TD + TC) * 4)
    vmem_limit = min(64 << 20, max(32 << 20, 2 * _vmem_bytes(Npad_in, Nout, C, tgD, tgC)))

    feat, logit = pl.pallas_call(
        kernel,
        out_shape=(
            jax.ShapeDtypeStruct((B, 1, TD), jnp.float32),   # torch.cat(fl, 1)
            jax.ShapeDtypeStruct((B, 1, TC), jnp.float32),   # torch.cat(l, 1)
        ),
        grid_spec=pltpu.PrefetchScalarGridSpec(
            num_scalar_prefetch=0,
            grid=(B, G),                                      # both axes independent
            in_specs=[
                pl.BlockSpec((1, Npad_in, C), lambda b, t: (b, 0, 0)),   # raw activation
                pl.BlockSpec((9, C, tgD), lambda b, t: (0, 0, t)),       # conv weights (group)
                pl.BlockSpec((1, tgD, tgC), lambda b, t: (t, 0, 0)),     # head block (group)
            ],
            out_specs=[
                pl.BlockSpec((1, 1, tgD), lambda b, t: (b, 0, t)),
                pl.BlockSpec((1, 1, tgC), lambda b, t: (b, 0, t)),
            ],
        ),
        compiler_params=pltpu.CompilerParams(
            dimension_semantics=("parallel", "parallel"),     # v7x megacore-friendly
            vmem_limit_bytes=vmem_limit),
        cost_estimate=pl.CostEstimate(flops=flops, transcendentals=0,
                                      bytes_accessed=bytes_accessed),
    )(x_flat, w_conv, w_head)

    return {"logit": logit.reshape(B, TC),
            "feature": feat.reshape(B, TD),
            "aux_logit": None}


def _reference_forward(x, conv_weights, cls_weights):
    """Plain-JAX f32 reference with identical semantics (for verification)."""
    T = conv_weights.shape[0]
    feats, logits = [], []
    for t in range(T):
        y = jax.lax.conv_general_dilated(
            x.astype(jnp.float32), conv_weights[t].astype(jnp.float32),
            window_strides=(1, 1), padding="SAME",
            dimension_numbers=("NCHW", "OIHW", "NCHW"))
        y = jnp.maximum(y, 0.0)
        f = jnp.mean(y, axis=(2, 3))
        feats.append(f)
        logits.append(f @ cls_weights[t].astype(jnp.float32).T)
    return {"logit": jnp.concatenate(logits, axis=1),
            "feature": jnp.concatenate(feats, axis=1),
            "aux_logit": None}


if __name__ == "__main__":
    # 3 incremental tasks, 8 classes per task, small spatial size.
    B, C, H, W = 2, 4, 16, 16
    T, D, N_CLS = 3, 32, 8

    key = jax.random.PRNGKey(0)
    kx, kw, kc = jax.random.split(key, 3)
    x = jax.random.normal(kx, (B, C, H, W), dtype=jnp.float32)
    conv_w = jax.random.normal(kw, (T, D, C, 3, 3), dtype=jnp.float32) * 0.1
    cls_w = jax.random.normal(kc, (T, N_CLS, D), dtype=jnp.float32) * 0.1

    out = ensemble_forward(x, conv_w, cls_w)
    jax.block_until_ready(out["logit"])
    jax.block_until_ready(out["feature"])

    ref = _reference_forward(x, conv_w, cls_w)
    assert out["logit"].shape == (B, T * N_CLS)
    assert out["feature"].shape == (B, T * D)
    assert out["aux_logit"] is None
    # bf16 MXU inputs for the conv, f32 accumulation, f32 head -> tight tolerance.
    assert jnp.allclose(out["feature"], ref["feature"], atol=2e-2, rtol=2e-2)
    assert jnp.allclose(out["logit"], ref["logit"], atol=2e-2, rtol=2e-2)
    print("KERNEL_OK")
</pallas_src>

<mosaic_0001>
module attributes {stable_mosaic.version = 11 : i64} {
  func.func @_ensemble_kernel(%arg0: i32, %arg1: i32, %arg2: memref<1x362x4xbf16, #tpu.memory_space<vmem>>, %arg3: memref<9x4x96xbf16, #tpu.memory_space<vmem>>, %arg4: memref<1x96x24xf32, #tpu.memory_space<vmem>>, %arg5: memref<1x1x96xf32, #tpu.memory_space<vmem>>, %arg6: memref<1x1x24xf32, #tpu.memory_space<vmem>>) attributes {dimension_semantics = [#tpu.dimension_semantics<parallel>, #tpu.dimension_semantics<parallel>], iteration_bounds = array<i64: 2, 1>, scalar_prefetch = 0 : i64, scratch_operands = 0 : i64, tpu.core_type = #tpu.core_type<tc>, window_params = [{transform_indices = @transform_0, window_bounds = array<i64: 1, 362, 4>}, {transform_indices = @transform_1, window_bounds = array<i64: 9, 4, 96>}, {transform_indices = @transform_2, window_bounds = array<i64: 1, 96, 24>}, {transform_indices = @transform_3, window_bounds = array<i64: 1, 1, 96>}, {transform_indices = @transform_4, window_bounds = array<i64: 1, 1, 24>}]} {
    %c0 = arith.constant 0 : index
    %c0_0 = arith.constant 0 : index
    %c0_1 = arith.constant 0 : index
    %0 = vector.load %arg2[%c0, %c0_0, %c0_1] : memref<1x362x4xbf16, #tpu.memory_space<vmem>>, vector<1x324x4xbf16>
    %1 = vector.shape_cast %0 : vector<1x324x4xbf16> to vector<324x4xbf16>
    %c0_2 = arith.constant 0 : index
    %c0_3 = arith.constant 0 : index
    %c0_4 = arith.constant 0 : index
    %2 = vector.load %arg3[%c0_2, %c0_3, %c0_4] : memref<9x4x96xbf16, #tpu.memory_space<vmem>>, vector<1x4x96xbf16>
    %3 = vector.shape_cast %2 : vector<1x4x96xbf16> to vector<4x96xbf16>
    %cst = arith.constant dense<0.000000e+00> : vector<324x96xf32>
    %4 = tpu.matmul %1, %3, %cst {dimension_numbers = #tpu.dot_dimension_numbers<[1], [0], [0], [1], [0, 0, 1, 1], [], []>} : vector<324x4xbf16>, vector<4x96xbf16>, vector<324x96xf32> -> vector<324x96xf32>
    %c0_5 = arith.constant 0 : index
    %c1 = arith.constant 1 : index
    %c0_6 = arith.constant 0 : index
    %5 = vector.load %arg2[%c0_5, %c1, %c0_6] : memref<1x362x4xbf16, #tpu.memory_space<vmem>>, vector<1x324x4xbf16>
    %6 = vector.shape_cast %5 : vector<1x324x4xbf16> to vector<324x4xbf16>
    %c1_7 = arith.constant 1 : index
    %c0_8 = arith.constant 0 : index
    %c0_9 = arith.constant 0 : index
    %7 = vector.load %arg3[%c1_7, %c0_8, %c0_9] : memref<9x4x96xbf16, #tpu.memory_space<vmem>>, vector<1x4x96xbf16>
    %8 = vector.shape_cast %7 : vector<1x4x96xbf16> to vector<4x96xbf16>
    %cst_10 = arith.constant dense<0.000000e+00> : vector<324x96xf32>
    %9 = tpu.matmul %6, %8, %cst_10 {dimension_numbers = #tpu.dot_dimension_numbers<[1], [0], [0], [1], [0, 0, 1, 1], [], []>} : vector<324x4xbf16>, vector<4x96xbf16>, vector<324x96xf32> -> vector<324x96xf32>
    %10 = arith.addf %4, %9 : vector<324x96xf32>
    %c0_11 = arith.constant 0 : index
    %c2 = arith.constant 2 : index
    %c0_12 = arith.constant 0 : index
    %11 = vector.load %arg2[%c0_11, %c2, %c0_12] : memref<1x362x4xbf16, #tpu.memory_space<vmem>>, vector<1x324x4xbf16>
    %12 = vector.shape_cast %11 : vector<1x324x4xbf16> to vector<324x4xbf16>
    %c2_13 = arith.constant 2 : index
    %c0_14 = arith.constant 0 : index
    %c0_15 = arith.constant 0 : index
    %13 = vector.load %arg3[%c2_13, %c0_14, %c0_15] : memref<9x4x96xbf16, #tpu.memory_space<vmem>>, vector<1x4x96xbf16>
    %14 = vector.shape_cast %13 : vector<1x4x96xbf16> to vector<4x96xbf16>
    %cst_16 = arith.constant dense<0.000000e+00> : vector<324x96xf32>
    %15 = tpu.matmul %12, %14, %cst_16 {dimension_numbers = #tpu.dot_dimension_numbers<[1], [0], [0], [1], [0, 0, 1, 1], [], []>} : vector<324x4xbf16>, vector<4x96xbf16>, vector<324x96xf32> -> vector<324x96xf32>
    %16 = arith.addf %10, %15 : vector<324x96xf32>
    %c0_17 = arith.constant 0 : index
    %c18 = arith.constant 18 : index
    %c0_18 = arith.constant 0 : index
    %17 = vector.load %arg2[%c0_17, %c18, %c0_18] : memref<1x362x4xbf16, #tpu.memory_space<vmem>>, vector<1x324x4xbf16>
    %18 = vector.shape_cast %17 : vector<1x324x4xbf16> to vector<324x4xbf16>
    %c3 = arith.constant 3 : index
    %c0_19 = arith.constant 0 : index
    %c0_20 = arith.constant 0 : index
    %19 = vector.load %arg3[%c3, %c0_19, %c0_20] : memref<9x4x96xbf16, #tpu.memory_space<vmem>>, vector<1x4x96xbf16>
    %20 = vector.shape_cast %19 : vector<1x4x96xbf16> to vector<4x96xbf16>
    %cst_21 = arith.constant dense<0.000000e+00> : vector<324x96xf32>
    %21 = tpu.matmul %18, %20, %cst_21 {dimension_numbers = #tpu.dot_dimension_numbers<[1], [0], [0], [1], [0, 0, 1, 1], [], []>} : vector<324x4xbf16>, vector<4x96xbf16>, vector<324x96xf32> -> vector<324x96xf32>
    %22 = arith.addf %16, %21 : vector<324x96xf32>
    %c0_22 = arith.constant 0 : index
    %c19 = arith.constant 19 : index
    %c0_23 = arith.constant 0 : index
    %23 = vector.load %arg2[%c0_22, %c19, %c0_23] : memref<1x362x4xbf16, #tpu.memory_space<vmem>>, vector<1x324x4xbf16>
    %24 = vector.shape_cast %23 : vector<1x324x4xbf16> to vector<324x4xbf16>
    %c4 = arith.constant 4 : index
    %c0_24 = arith.constant 0 : index
    %c0_25 = arith.constant 0 : index
    %25 = vector.load %arg3[%c4, %c0_24, %c0_25] : memref<9x4x96xbf16, #tpu.memory_space<vmem>>, vector<1x4x96xbf16>
    %26 = vector.shape_cast %25 : vector<1x4x96xbf16> to vector<4x96xbf16>
    %cst_26 = arith.constant dense<0.000000e+00> : vector<324x96xf32>
    %27 = tpu.matmul %24, %26, %cst_26 {dimension_numbers = #tpu.dot_dimension_numbers<[1], [0], [0], [1], [0, 0, 1, 1], [], []>} : vector<324x4xbf16>, vector<4x96xbf16>, vector<324x96xf32> -> vector<324x96xf32>
    %28 = arith.addf %22, %27 : vector<324x96xf32>
    %c0_27 = arith.constant 0 : index
    %c20 = arith.constant 20 : index
    %c0_28 = arith.constant 0 : index
    %29 = vector.load %arg2[%c0_27, %c20, %c0_28] : memref<1x362x4xbf16, #tpu.memory_space<vmem>>, vector<1x324x4xbf16>
    %30 = vector.shape_cast %29 : vector<1x324x4xbf16> to vector<324x4xbf16>
    %c5 = arith.constant 5 : index
    %c0_29 = arith.constant 0 : index
    %c0_30 = arith.constant 0 : index
    %31 = vector.load %arg3[%c5, %c0_29, %c0_30] : memref<9x4x96xbf16, #tpu.memory_space<vmem>>, vector<1x4x96xbf16>
    %32 = vector.shape_cast %31 : vector<1x4x96xbf16> to vector<4x96xbf16>
    %cst_31 = arith.constant dense<0.000000e+00> : vector<324x96xf32>
    %33 = tpu.matmul %30, %32, %cst_31 {dimension_numbers = #tpu.dot_dimension_numbers<[1], [0], [0], [1], [0, 0, 1, 1], [], []>} : vector<324x4xbf16>, vector<4x96xbf16>, vector<324x96xf32> -> vector<324x96xf32>
    %34 = arith.addf %28, %33 : vector<324x96xf32>
    %c0_32 = arith.constant 0 : index
    %c36 = arith.constant 36 : index
    %c0_33 = arith.constant 0 : index
    %35 = vector.load %arg2[%c0_32, %c36, %c0_33] : memref<1x362x4xbf16, #tpu.memory_space<vmem>>, vector<1x324x4xbf16>
    %36 = vector.shape_cast %35 : vector<1x324x4xbf16> to vector<324x4xbf16>
    %c6 = arith.constant 6 : index
    %c0_34 = arith.constant 0 : index
    %c0_35 = arith.constant 0 : index
    %37 = vector.load %arg3[%c6, %c0_34, %c0_35] : memref<9x4x96xbf16, #tpu.memory_space<vmem>>, vector<1x4x96xbf16>
    %38 = vector.shape_cast %37 : vector<1x4x96xbf16> to vector<4x96xbf16>
    %cst_36 = arith.constant dense<0.000000e+00> : vector<324x96xf32>
    %39 = tpu.matmul %36, %38, %cst_36 {dimension_numbers = #tpu.dot_dimension_numbers<[1], [0], [0], [1], [0, 0, 1, 1], [], []>} : vector<324x4xbf16>, vector<4x96xbf16>, vector<324x96xf32> -> vector<324x96xf32>
    %40 = arith.addf %34, %39 : vector<324x96xf32>
    %c0_37 = arith.constant 0 : index
    %c37 = arith.constant 37 : index
    %c0_38 = arith.constant 0 : index
    %41 = vector.load %arg2[%c0_37, %c37, %c0_38] : memref<1x362x4xbf16, #tpu.memory_space<vmem>>, vector<1x324x4xbf16>
    %42 = vector.shape_cast %41 : vector<1x324x4xbf16> to vector<324x4xbf16>
    %c7 = arith.constant 7 : index
    %c0_39 = arith.constant 0 : index
    %c0_40 = arith.constant 0 : index
    %43 = vector.load %arg3[%c7, %c0_39, %c0_40] : memref<9x4x96xbf16, #tpu.memory_space<vmem>>, vector<1x4x96xbf16>
    %44 = vector.shape_cast %43 : vector<1x4x96xbf16> to vector<4x96xbf16>
    %cst_41 = arith.constant dense<0.000000e+00> : vector<324x96xf32>
    %45 = tpu.matmul %42, %44, %cst_41 {dimension_numbers = #tpu.dot_dimension_numbers<[1], [0], [0], [1], [0, 0, 1, 1], [], []>} : vector<324x4xbf16>, vector<4x96xbf16>, vector<324x96xf32> -> vector<324x96xf32>
    %46 = arith.addf %40, %45 : vector<324x96xf32>
    %c0_42 = arith.constant 0 : index
    %c38 = arith.constant 38 : index
    %c0_43 = arith.constant 0 : index
    %47 = vector.load %arg2[%c0_42, %c38, %c0_43] : memref<1x362x4xbf16, #tpu.memory_space<vmem>>, vector<1x324x4xbf16>
    %48 = vector.shape_cast %47 : vector<1x324x4xbf16> to vector<324x4xbf16>
    %c8 = arith.constant 8 : index
    %c0_44 = arith.constant 0 : index
    %c0_45 = arith.constant 0 : index
    %49 = vector.load %arg3[%c8, %c0_44, %c0_45] : memref<9x4x96xbf16, #tpu.memory_space<vmem>>, vector<1x4x96xbf16>
    %50 = vector.shape_cast %49 : vector<1x4x96xbf16> to vector<4x96xbf16>
    %cst_46 = arith.constant dense<0.000000e+00> : vector<324x96xf32>
    %51 = tpu.matmul %48, %50, %cst_46 {dimension_numbers = #tpu.dot_dimension_numbers<[1], [0], [0], [1], [0, 0, 1, 1], [], []>} : vector<324x4xbf16>, vector<4x96xbf16>, vector<324x96xf32> -> vector<324x96xf32>
    %52 = arith.addf %46, %51 : vector<324x96xf32>
    %cst_47 = arith.constant 0.000000e+00 : f32
    %53 = vector.broadcast %cst_47 : f32 to vector<324x96xf32>
    %54 = arith.maximumf %52, %53 : vector<324x96xf32>
    %55 = tpu.iota {dimensions = array<i32: 0>} : vector<324x1xi32>
    %c18_i32 = arith.constant 18 : i32
    %c0_i32 = arith.constant 0 : i32
    %56 = arith.cmpi eq, %c18_i32, %c0_i32 : i32
    %c1_i32 = arith.constant 1 : i32
    %57 = arith.select %56, %c1_i32, %c18_i32 : i32
    %58 = vector.broadcast %57 : i32 to vector<324x1xi32>
    %59 = arith.remsi %55, %58 : vector<324x1xi32>
    %c0_i32_48 = arith.constant 0 : i32
    %60 = vector.broadcast %c0_i32_48 : i32 to vector<324x1xi32>
    %61 = arith.cmpi ne, %59, %60 : vector<324x1xi32>
    %c0_i32_49 = arith.constant 0 : i32
    %62 = vector.broadcast %c0_i32_49 : i32 to vector<324x1xi32>
    %63 = arith.cmpi slt, %59, %62 : vector<324x1xi32>
    %c0_i32_50 = arith.constant 0 : i32
    %64 = arith.cmpi slt, %57, %c0_i32_50 : i32
    %65 = vector.broadcast %64 : i1 to vector<324x1xi1>
    %66 = vector.broadcast %65 : vector<324x1xi1> to vector<324x1xi1>
    %67 = arith.xori %63, %66 : vector<324x1xi1>
    %68 = arith.andi %67, %61 : vector<324x1xi1>
    %69 = vector.broadcast %57 : i32 to vector<324x1xi32>
    %70 = arith.addi %59, %69 : vector<324x1xi32>
    %71 = arith.select %68, %70, %59 : vector<324x1xi1>, vector<324x1xi32>
    %c18_i32_51 = arith.constant 18 : i32
    %72 = vector.broadcast %c18_i32_51 : i32 to vector<324x1xi32>
    %73 = arith.cmpi sge, %55, %72 : vector<324x1xi32>
    %c306_i32 = arith.constant 306 : i32
    %74 = vector.broadcast %c306_i32 : i32 to vector<324x1xi32>
    %75 = arith.cmpi slt, %55, %74 : vector<324x1xi32>
    %76 = arith.andi %73, %75 : vector<324x1xi1>
    %c1_i32_52 = arith.constant 1 : i32
    %77 = vector.broadcast %c1_i32_52 : i32 to vector<324x1xi32>
    %78 = arith.cmpi sge, %71, %77 : vector<324x1xi32>
    %79 = arith.andi %76, %78 : vector<324x1xi1>
    %c16_i32 = arith.constant 16 : i32
    %80 = vector.broadcast %c16_i32 : i32 to vector<324x1xi32>
    %81 = arith.cmpi sle, %71, %80 : vector<324x1xi32>
    %82 = arith.andi %79, %81 : vector<324x1xi1>
    %cst_53 = arith.constant 0.000000e+00 : f32
    %83 = vector.shape_cast %82 : vector<324x1xi1> to vector<324x1xi1>
    %84 = vector.broadcast %83 : vector<324x1xi1> to vector<324x96xi1>
    %85 = vector.broadcast %cst_53 : f32 to vector<324x96xf32>
    %86 = arith.select %84, %54, %85 : vector<324x96xi1>, vector<324x96xf32>
    %cst_54 = arith.constant dense<0.000000e+00> : vector<96xf32>
    %87 = vector.multi_reduction <add>, %86, %cst_54 [0] : vector<324x96xf32> to vector<96xf32>
    %88 = vector.shape_cast %87 : vector<96xf32> to vector<1x96xf32>
    %cst_55 = arith.constant 3.906250e-03 : f32
    %89 = vector.broadcast %cst_55 : f32 to vector<1x96xf32>
    %90 = arith.mulf %88, %89 : vector<1x96xf32>
    %c0_56 = arith.constant 0 : index
    %c0_57 = arith.constant 0 : index
    %c0_58 = arith.constant 0 : index
    %91 = vector.load %arg5[%c0_56, %c0_57, %c0_58] : memref<1x1x96xf32, #tpu.memory_space<vmem>>, vector<1x1x96xf32>
    %92 = vector.shape_cast %91 : vector<1x1x96xf32> to vector<1x96xf32>
    %93 = vector.shape_cast %90 : vector<1x96xf32> to vector<1x1x96xf32>
    tpu.vector_store %arg5[%c0_56, %c0_57, %c0_58], %93 {strides = array<i32>} : memref<1x1x96xf32, #tpu.memory_space<vmem>>, vector<1x1x96xf32>,
    %c0_59 = arith.constant 0 : index
    %c0_60 = arith.constant 0 : index
    %c0_61 = arith.constant 0 : index
    %94 = vector.load %arg4[%c0_59, %c0_60, %c0_61] : memref<1x96x24xf32, #tpu.memory_space<vmem>>, vector<1x96x24xf32>
    %95 = vector.shape_cast %94 : vector<1x96x24xf32> to vector<96x24xf32>
    %cst_62 = arith.constant dense<0.000000e+00> : vector<1x24xf32>
    %96 = tpu.matmul %90, %95, %cst_62 {dimension_numbers = #tpu.dot_dimension_numbers<[1], [0], [0], [1], [0, 0, 1, 1], [], []>} : vector<1x96xf32>, vector<96x24xf32>, vector<1x24xf32> -> vector<1x24xf32>
    %c0_63 = arith.constant 0 : index
    %c0_64 = arith.constant 0 : index
    %c0_65 = arith.constant 0 : index
    %97 = vector.load %arg6[%c0_63, %c0_64, %c0_65] : memref<1x1x24xf32, #tpu.memory_space<vmem>>, vector<1x1x24xf32>
    %98 = vector.shape_cast %97 : vector<1x1x24xf32> to vector<1x24xf32>
    %99 = vector.shape_cast %96 : vector<1x24xf32> to vector<1x1x24xf32>
    tpu.vector_store %arg6[%c0_63, %c0_64, %c0_65], %99 {strides = array<i32>} : memref<1x1x24xf32, #tpu.memory_space<vmem>>, vector<1x1x24xf32>,
    return
  }
  func.func @transform_0(%arg0: i32, %arg1: i32) -> (i32, i32, i32) {
    %c0_i32 = arith.constant 0 : i32
    %c0_i32_0 = arith.constant 0 : i32
    %c0_i32_1 = arith.constant 0 : i32
    return %arg0, %c0_i32, %c0_i32_0 : i32, i32, i32
  }
  func.func @transform_1(%arg0: i32, %arg1: i32) -> (i32, i32, i32) {
    %c0_i32 = arith.constant 0 : i32
    %c0_i32_0 = arith.constant 0 : i32
    %c0_i32_1 = arith.constant 0 : i32
    return %c0_i32, %c0_i32_0, %arg1 : i32, i32, i32
  }
  func.func @transform_2(%arg0: i32, %arg1: i32) -> (i32, i32, i32) {
    %c0_i32 = arith.constant 0 : i32
    %c0_i32_0 = arith.constant 0 : i32
    %c0_i32_1 = arith.constant 0 : i32
    return %arg1, %c0_i32, %c0_i32_0 : i32, i32, i32
  }
  func.func @transform_3(%arg0: i32, %arg1: i32) -> (i32, i32, i32) {
    %c0_i32 = arith.constant 0 : i32
    %c0_i32_0 = arith.constant 0 : i32
    return %arg0, %c0_i32, %arg1 : i32, i32, i32
  }
  func.func @transform_4(%arg0: i32, %arg1: i32) -> (i32, i32, i32) {
    %c0_i32 = arith.constant 0 : i32
    %c0_i32_0 = arith.constant 0 : i32
    return %arg0, %c0_i32, %arg1 : i32, i32, i32
  }
}

</mosaic_0001>

<bundles_post_ra>
// kernel: tpu_custom_call.1
= control target key start
LH: loop header
LB: loop body
LE: loop exit
PB: predicated region body
PF: predicated region fallthrough
CT: control target
= control target key end

     0   :  { %10 = vsyncpa [#allocation3], 0  ;;  %s10416_s0 = inlined_call_operand.vmem [shape: bf16[2,362,4], index: 0, kind: input, shape index: {}]   ;;  %s10417_s1 = inlined_call_operand.vmem [shape: bf16[9,4,96], index: 1, kind: input, shape index: {}]   ;;  %s10418_s2 = inlined_call_operand.vmem [shape: f32[1,96,24], index: 2, kind: input, shape index: {}]   ;;  %s10419_s3 = inlined_call_operand.hbm [shape: f32[2,1,96], index: 3, kind: output, shape index: {0}]   ;;  %s10420_s4 = inlined_call_operand.hbm [shape: f32[2,1,24], index: 4, kind: output, shape index: {1}]  }
   0x1   :  { %12 = vsyncpa [#allocation3 + $0x1], 0 }
   0x2   :  { %13 = vsyncpa [#allocation5], 0 }
   0x3   :  { %15 = vsyncpa [#allocation5 + $0x1], 0  ;;  %s7457_s15 = smov 0   ;;  %s7459_s16 = smov 0  }
   0x4   :  { %s7461_s17 = smov 0   ;;  %s7463_s18 = smov 0  }
   0x5   :  { %s7465_s19 = smov 0   ;;  %s7467_s20 = smov 0  }
   0x6 LB: > { %s5775_s21 = sadd.s32 4294967295, %s7426_s20   ;;  %s5776_s22 = sadd.s32 4294967294, %s7426_s20   ;;  %s7426_s20 = sphi %s7467_s20, %s21_s20   ;;  %s7422_s19 = sphi %s7465_s19, %s10569_s19   ;;  %s7418_s18 = sphi %s7463_s18, %s10568_s18   ;;  %s7414_s17 = sphi %s7461_s17, %s10567_s17   ;;  %s7410_s16 = sphi %s7459_s16, %s10566_s16   ;;  %s7406_s15 = sphi %s7457_s15, %s10565_s15  }
   0x7   : > { %s33_s23 = sadd.s32 1, %s7422_s19  ;;  %s120_s24 = sadd.s32 1, %s7414_s17 }
   0x8   : > { %p35_p0 = scmp.ge.s32.totalorder %s33_s23, 2  ;;  %p130_p1 = scmp.ne.s32.totalorder %s7414_s17, %s7410_s16 }
   0x9   : > { %p131_p2 = scmp.eq.s32.totalorder %s5775_s21, 1  ;;  %p136_p3 = scmp.ne.s32.totalorder %s7410_s16, %s7406_s15 }
   0xa   : > { %s10571_s23 = smov (%p35_p0, %s33_s23), 0  ;;  %p137_p5 = scmp.eq.s32.totalorder %s5776_s22, 1 }
   0xb   : > { %p7497_p4 = por %p131_p2, %p130_p1  ;;  %s115_s26 = ssub.s32 %s7422_s19, %s10571_s23 }
   0xc   : > { %p5781_p6 = scmp.ge.s32.totalorder %s7426_s20, 1  ;;  %p118_p7 = scmp.eq.s32.totalorder %s115_s26, 0 }
   0xd   : > { %p7504_p8 = por %p137_p5, %p136_p3  ;;  %p206_p9 = scmp.lt.s32.totalorder %s7426_s20, 3 }
   0xe   : > { %s7510_s28 = scalar_select %p118_p7, %s7414_s17, %s120_s24  }
   0xf   : > { %p207_p10 = pnand %p5781_p6, %p206_p9 }
  0x11   : > { %210 = sbr.rel (%p207_p10) target bundleno = 1206 (0x4b6), region = 32 }
  0x16   : > { %v5783_v0 = vld [vmem:[%s10417_s1 + $0x2] sm:$0x3]  ;;  %vm639_vm0 = vcmask 1041408   ;;  %p244_p11 = scmp.lt.s32.totalorder %s7418_s18, 1  ;;  %v10421_v1 = vmov 0.0   ;;  %vm7429_vm1 = vmmov 0  }
  0x17   : > { %6285 = vmatprep.subr.bf16.mxu0 %v10421_v1  ;;  %7086 = vmatprep.subr.bf16.mxu1 %v10421_v1  ;;  %v641_v2 = vsel %vm639_vm0, %v5783_v0, 0  ;;  %vm407_vm2 = vsmask.f32 7424  ;;  %v5848_v12 = vld [vmem:[%s10417_s1 + $0x4] sm:$0x3]  ;;  %vm575_vm3 = vcmask 31744  }
  0x18   : > { %6286 = vmatpush3.bf16.msra.mxu0 %v641_v2  ;;  %7087 = vmatpush3.bf16.msra.mxu1 %v641_v2  ;;  %s245_s5 = scalar_select %p244_p11, %s7418_s18, 1  ;;  %v300_v20 = vld [vmem:[%s10417_s1] sm:$0x3]  ;;  %v1204_v26 = vsel %vm639_vm0, %v5848_v12, 0  ;;  %vm1098_vm4 = vcmask 1046528   ;;  %vm2449_vm6 = vcmask 1045504  }
  0x19   : > { %6287 = vmatprep.mubr.msk.bf16.mxu0 %vm7429_vm1, %v10421_v1  ;;  %6331 = vmatprep.mubr.msk.bf16.mxu1 %vm7429_vm1, %v10421_v1  ;;  %v890_v31 = vsel %vm639_vm0, %v300_v20, 0  ;;  %vm1947_vm5 = vsmask.f32 6400  ;;  %vm3441_vm7 = vsmask.f32 5376  ;;  %vm3943_vm8 = vcmask 1044480  }
  0x1a   : > { %6457 = vmatprep.subr.bf16.mxu0 %v10421_v1  ;;  %s7088_s6 = smul.u32 184, %s245_s5  ;;  %6371 = vmatprep.subr.bf16.mxu1 %v10421_v1  ;;  %s6070_s30 = sshll.u32 %s7418_s18, 4 }
  0x1b   : > { %s5636_s7 = scalar_lea.hbm %s10419_s3, %s6070_s30  ;;  %s7430_s12 = smov [#allocation2]  }
  0x1c   : > { %s7529_s9 = scalar_lea.vmem %s10416_s0, %s7088_s6  ;;  %s7324_s13 = sshll.u32 %s7430_s12, 4  ;;  %s7325_s13 = int_to_ptr.vmem [resolvable:$false] %s7324_s13 }
  0x1d   : > { %v259_v3 = vld [vmem:[%s7529_s9] sm:$0xf]  ;;  %v7533_v4 = vld [vmem:[%s7529_s9 + $0x4] sm:$0xf]  ;;  %v7539_v6 = vld [vmem:[%s7529_s9 + $0x8] sm:$0xff]   ;;  %s7326_s14 = scalar_lea.vmem %s7325_s13, 32 }
  0x1e   : > { %v7536_v5 = vcombine.low %v259_v3, %v7533_v4  ;;  %v416_v9 = vshll.u32 %v7539_v6, 16  ;;  %v7545_v10 = vld [vmem:[%s7529_s9 + $0x58] sm:$0xff]   ;;  %v7548_v11 = vld [vmem:[%s7529_s9 + $0x60] sm:$0xff]   ;;  %v7554_v13 = vld [vmem:[%s7529_s9 + $0x10] sm:$0xff]   ;;  %v420_v21 = vshrl.u32 %v7539_v6, 16 }
  0x1f   : > { %v7557_v14 = vld [vmem:[%s7529_s9 + $0x68] sm:$0xff]   ;;  %v496_v17 = vshll.u32 %v7545_v10, 16  ;;  %v500_v18 = vshrl.u32 %v7545_v10, 16  ;;  %v504_v19 = vshll.u32 %v7548_v11, 16  ;;  %v424_v24 = vshll.u32 %v7554_v13, 16  ;;  %v7577_v32 = vld [vmem:[%s7529_s9 + $0x18] sm:$0xff]  }
  0x20   : > { %v409_v7 = vshrl.u32 %v7536_v5, 16  ;;  %v411_v8 = vshll.u32 %v7536_v5, 16  ;;  %v418_v16 = vrot.slane %v416_v9, 1  ;;  %v508_v29 = vshrl.u32 %v7548_v11, 16  ;;  %v7584_v36 = vld [vmem:[%s7529_s9 + $0x70] sm:$0xff]   ;;  %v7595_v43 = vld [vmem:[%s7529_s9 + $0x20] sm:$0xff]  }
  0x21   : > { %v7566_v23 = vrot.slane %v496_v17, 1  ;;  %v506_v25 = vrot.slane %v504_v19, 1  ;;  %v512_v30 = vshll.u32 %v7557_v14, 16  ;;  %v426_v35 = vrot.slane %v424_v24, 1  ;;  %v7599_v45 = vld [vmem:[%s7529_s9 + $0x78] sm:$0xff]   ;;  %v7603_v47 = vld [vmem:[%s7529_s9 + $0x28] sm:$0xff]  }
  0x22   : > { %v413_v15 = vrot.slane %v411_v8, 1  ;;  %v422_v34 = vor.u32 %v420_v21, %v418_v16  ;;  %v428_v39 = vshrl.u32 %v7554_v13, 16  ;;  %v432_v40 = vshll.u32 %v7577_v32, 16  ;;  %v7607_v48 = vld [vmem:[%s7529_s9 + $0x80] sm:$0xff]   ;;  %v7618_v56 = vld [vmem:[%s7529_s9 + $0x30] sm:$0xff]   ;;  %v7626_v62 = vld [vmem:[%s7529_s9 + $0x88] sm:$0xff]  }
  0x23   : > { %v502_v28 = vor.u32 %v500_v18, %v7566_v23  ;;  %v510_v37 = vor.u32 %v508_v29, %v506_v25  ;;  %v514_v38 = vrot.slane %v512_v30, 1  ;;  %v516_v42 = vshrl.u32 %v7557_v14, 16  ;;  %v7630_v3 = vld [vmem:[%s7529_s9 + $0x38] sm:$0xff]   ;;  %v7643_v19 = vld [vmem:[%s7529_s9 + $0x40] sm:$0xff]  }
  0x24   : > { %v414_v22 = vor.u32 %v413_v15, %v409_v7  ;;  %v427_v41 = vsel %vm407_vm2, %v422_v34, %v426_v35  ;;  %v520_v44 = vshll.u32 %v7584_v36, 16  ;;  %v430_v49 = vor.u32 %v428_v39, %v426_v35  ;;  %v7633_v7 = vld [vmem:[%s7529_s9 + $0x50] sm:$0xff]   ;;  %v7662_v34 = vld [vmem:[%s7529_s9 + $0x98] sm:$0xff]  }
  0x25   : > { %v507_v33 = vsel %vm407_vm2, %v502_v28, %v506_v25  ;;  %v515_v46 = vsel %vm407_vm2, %v510_v37, %v514_v38  ;;  %v434_v50 = vrot.slane %v432_v40, 1  ;;  %v440_v51 = vshll.u32 %v7595_v43, 16 }
  0x26   : > { %v419_v27 = vsel %vm407_vm2, %v414_v22, %v418_v16  ;;  %6332 = vmatmul.mubr.msk.bf16.vlgmr.msra.gmra.mxu1 %vm575_vm3, %v507_v33  ;;  %v518_v52 = vor.u32 %v516_v42, %v514_v38  ;;  %v522_v53 = vrot.slane %v520_v44, 1  ;;  %v528_v54 = vshll.u32 %v7599_v45, 16  ;;  %v7639_v16 = vld [vmem:[%s7529_s9 + $0x90] sm:$0xff]  }
  0x27   : > { %6288 = vmatmul.mubr.msk.bf16.vlgmr.msra.gmra.mxu0 %vm575_vm3, %v419_v27  ;;  %6372 = vmatpush3.bf16.msra.mxu1 %v890_v31  ;;  %v448_v55 = vshll.u32 %v7603_v47, 16  ;;  %v436_v57 = vshrl.u32 %v7577_v32, 16  ;;  %v524_v58 = vshrl.u32 %v7584_v36, 16  ;;  %v536_v59 = vshll.u32 %v7607_v48, 16 }
  0x28   : > { %6458 = vmatpush3.bf16.msra.mxu0 %v1204_v26  ;;  %6291 = vmatprep.mubr.msk.bf16.mxu0 %vm7429_vm1, %v10421_v1  ;;  %v435_v60 = vsel %vm407_vm2, %v430_v49, %v434_v50  ;;  %v444_v61 = vshrl.u32 %v7595_v43, 16  ;;  %v523_v63 = vsel %vm407_vm2, %v518_v52, %v522_v53  ;;  %v442_v0 = vrot.slane %v440_v51, 1  ;;  %v7679_v52 = vld [vmem:[%s7529_s9 + $0x48] sm:$0xff]  }
  0x29   : > { %6629 = vmatprep.subr.bf16.mxu0 %v10421_v1  ;;  %6335 = vmatprep.mubr.msk.bf16.mxu1 %vm7429_vm1, %v10421_v1  ;;  %v530_v2 = vrot.slane %v528_v54, 1  ;;  %v450_v8 = vrot.slane %v448_v55, 1  ;;  %v532_v9 = vshrl.u32 %v7599_v45, 16  ;;  %v452_v12 = vshrl.u32 %v7603_v47, 16 }
  0x2a   : > { %6543 = vmatprep.subr.bf16.mxu1 %v10421_v1  ;;  %v456_v15 = vshll.u32 %v7618_v56, 16  ;;  %v438_v17 = vor.u32 %v436_v57, %v434_v50  ;;  %v538_v18 = vrot.slane %v536_v59, 1  ;;  %v540_v20 = vshrl.u32 %v7607_v48, 16 }
  0x2b   : > { %v544_v21 = vshll.u32 %v7626_v62, 16  ;;  %v460_v22 = vshrl.u32 %v7618_v56, 16  ;;  %v488_v24 = vshll.u32 %v7633_v7, 16  ;;  %v526_v25 = vor.u32 %v524_v58, %v522_v53 }
  0x2c   : > { %v464_v26 = vshll.u32 %v7630_v3, 16  ;;  %v492_v27 = vshrl.u32 %v7633_v7, 16  ;;  %v552_v28 = vshll.u32 %v7639_v16, 16  ;;  %v458_v30 = vrot.slane %v456_v15, 1 }
  0x2d   : > { %v7657_v29 = vrot.slane %v488_v24, 1  ;;  %v548_v31 = vshrl.u32 %v7626_v62, 16  ;;  %v472_v33 = vshll.u32 %v7643_v19, 16  ;;  %v443_v35 = vsel %vm407_vm2, %v438_v17, %v442_v0 }
  0x2e   : > { %6336 = vmatmul.mubr.msk.bf16.gmra.mxu1 %vm575_vm3, %v515_v46  ;;  %v531_v38 = vsel %vm407_vm2, %v526_v25, %v530_v2  ;;  %v546_v39 = vrot.slane %v544_v21, 1  ;;  %v466_v40 = vrot.slane %v464_v26, 1  ;;  %v468_v42 = vshrl.u32 %v7630_v3, 16 }
  0x2f   : > { %6292 = vmatmul.mubr.msk.bf16.gmra.mxu0 %vm575_vm3, %v427_v41  ;;  %6339 = vmatprep.mubr.msk.bf16.mxu1 %vm7429_vm1, %v10421_v1  ;;  %v494_v37 = vor.u32 %v492_v27, %v7657_v29  ;;  %v554_v41 = vrot.slane %v552_v28, 1  ;;  %v556_v44 = vshrl.u32 %v7639_v16, 16  ;;  %v474_v49 = vrot.slane %v472_v33, 1 }
  0x30   : > { %6295 = vmatprep.mubr.msk.bf16.mxu0 %vm7429_vm1, %v10421_v1  ;;  %v560_v50 = vshll.u32 %v7662_v34, 16  ;;  %v446_v51 = vor.u32 %v444_v61, %v442_v0  ;;  %v534_v53 = vor.u32 %v532_v9, %v530_v2  ;;  %v476_v55 = vshrl.u32 %v7643_v19, 16 }
  0x31   : > { %v7671_v46 = vsel %vm407_vm2, %v494_v37, %v7566_v23  ;;  %v480_v57 = vshll.u32 %v7679_v52, 16  ;;  %v454_v58 = vor.u32 %v452_v12, %v450_v8  ;;  %v542_v59 = vor.u32 %v540_v20, %v538_v18 }
  0x32   : > { %v451_v23 = vsel %vm407_vm2, %v446_v51, %v450_v8  ;;  %v539_v54 = vsel %vm407_vm2, %v534_v53, %v538_v18  ;;  %v564_v0 = vshrl.u32 %v7662_v34, 16  ;;  %v462_v2 = vor.u32 %v460_v22, %v458_v30  ;;  %v7701_v8 = vld [vmem:[%s7529_s9 + $0xa0] ss:$0 sps:$4 sm:$0x77]  }
  0x33   : > { %v547_v61 = vsel %vm407_vm2, %v542_v59, %v546_v39  ;;  %v550_v9 = vor.u32 %v548_v31, %v546_v39  ;;  %v568_v17 = vshll.u32 %v7701_v8, 16  ;;  %v484_v18 = vshrl.u32 %v7679_v52, 16  ;;  %v1092_v39 = vld [vmem:[%s7529_s9] sm:$0xe] }
  0x34   : > { %v467_v12 = vsel %vm407_vm2, %v462_v2, %v466_v40  ;;  %v470_v20 = vor.u32 %v468_v42, %v466_v40  ;;  %v558_v21 = vor.u32 %v556_v44, %v554_v41  ;;  %v482_v25 = vrot.slane %v480_v57, 1  ;;  %v5871_v40 = vld [vmem:[%s10417_s1 + $0x6] sm:$0x3] }
  0x35   : > { %v555_v15 = vsel %vm407_vm2, %v550_v9, %v554_v41  ;;  %v570_v26 = vrot.slane %v568_v17, 1  ;;  %v478_v27 = vor.u32 %v476_v55, %v474_v49  ;;  %v5849_v41 = vcombine.low %v1092_v39, %v7533_v4  ;;  %v5914_v4 = vld [vmem:[%s10417_s1 + $0x8] sm:$0x3] }
  0x36   : > { %6340 = vmatmul.mubr.msk.bf16.gmra.mxu1 %vm575_vm3, %v523_v63  ;;  %v562_v63 = vrot.slane %v560_v50, 1  ;;  %v475_v22 = vsel %vm407_vm2, %v470_v20, %v474_v49  ;;  %v486_v33 = vor.u32 %v484_v18, %v482_v25  ;;  %v1100_v44 = vrot.slane %v7539_v6, 1 }
  0x37   : > { %6296 = vmatmul.mubr.msk.bf16.gmra.mxu0 %vm575_vm3, %v435_v60  ;;  %6343 = vmatprep.mubr.msk.bf16.mxu1 %vm7429_vm1, %v10421_v1  ;;  %v459_v60 = vsel %vm407_vm2, %v454_v58, %v458_v30  ;;  %v483_v30 = vsel %vm407_vm2, %v478_v27, %v482_v25  ;;  %v1099_v42 = vrot.slane %v5849_v41, 1  ;;  %v2200_v49 = vsel %vm639_vm0, %v5914_v4, 0 }
  0x38   : > { %6299 = vmatprep.mubr.msk.bf16.mxu0 %vm7429_vm1, %v10421_v1  ;;  %v563_v24 = vsel %vm407_vm2, %v558_v21, %v562_v63  ;;  %v566_v28 = vor.u32 %v564_v0, %v562_v63  ;;  %v491_v37 = vsel %vm407_vm2, %v486_v33, %v7657_v29  ;;  %v1698_v29 = vsel %vm639_vm0, %v5871_v40, 0 }
  0x39   : > { %v1104_v51 = vrot.slane %v7577_v32, 1  ;;  %v1106_v53 = vrot.slane %v7595_v43, 1  ;;  %v1112_v55 = vrot.slane %v7630_v3, 1  ;;  %v1114_v57 = vrot.slane %v7643_v19, 1 }
  0x3a   : > { %v571_v31 = vsel %vm407_vm2, %v566_v28, %v570_v26  ;;  %v1116_v58 = vrot.slane %v7679_v52, 1  ;;  %v1118_v59 = vrot.slane %v7633_v7, 1  ;;  %v1124_v63 = vrot.slane %v7557_v14, 1 }
  0x3b   : > { %v1126_v0 = vrot.slane %v7584_v36, 1  ;;  %v1128_v9 = vrot.slane %v7599_v45, 1 }
  0x3d   : > { %v1129_v18 = vsel %vm1098_vm4, %v1126_v0, %v1128_v9 }
  0x3e   : > { %6344 = vmatmul.mubr.msk.bf16.gmra.mxu1 %vm575_vm3, %v531_v38 }
  0x3f   : > { %6300 = vmatmul.mubr.msk.bf16.gmra.mxu0 %vm575_vm3, %v443_v35  ;;  %6347 = vmatprep.mubr.msk.bf16.mxu1 %vm7429_vm1, %v10421_v1  ;;  %v572_v35 = vshrl.u32 %v7701_v8, 16 }
  0x40   : > { %6303 = vmatprep.mubr.msk.bf16.mxu0 %vm7429_vm1, %v10421_v1 }
  0x41   : > { %v574_v38 = vor.u32 %v572_v35, %v570_v26 }
  0x46   : > { %6348 = vmatmul.mubr.msk.bf16.gmra.mxu1 %vm575_vm3, %v539_v54  ;;  %v1110_v54 = vrot.slane %v7618_v56, 1 }
  0x47   : > { %6304 = vmatmul.mubr.msk.bf16.gmra.mxu0 %vm575_vm3, %v451_v23  ;;  %6351 = vmatprep.mubr.msk.bf16.mxu1 %vm7429_vm1, %v10421_v1  ;;  %v1108_v23 = vrot.slane %v7603_v47, 1 }
  0x48   : > { %6307 = vmatprep.mubr.msk.bf16.mxu0 %vm7429_vm1, %v10421_v1 }
  0x4e   : > { %6352 = vmatmul.mubr.msk.bf16.gmra.mxu1 %vm575_vm3, %v547_v61  ;;  %v1122_v61 = vrot.slane %v7548_v11, 1 }
  0x4f   : > { %6308 = vmatmul.mubr.msk.bf16.gmra.mxu0 %vm575_vm3, %v459_v60  ;;  %6355 = vmatprep.mubr.msk.bf16.mxu1 %vm7429_vm1, %v10421_v1  ;;  %v1120_v60 = vrot.slane %v7545_v10, 1 }
  0x50   : > { %6311 = vmatprep.mubr.msk.bf16.mxu0 %vm7429_vm1, %v10421_v1 }
  0x56   : > { %6356 = vmatmul.mubr.msk.bf16.gmra.mxu1 %vm575_vm3, %v555_v15 }
  0x57   : > { %6312 = vmatmul.mubr.msk.bf16.gmra.mxu0 %vm575_vm3, %v467_v12  ;;  %6359 = vmatprep.mubr.msk.bf16.mxu1 %vm7429_vm1, %v10421_v1 }
  0x58   : > { %6315 = vmatprep.mubr.msk.bf16.mxu0 %vm7429_vm1, %v10421_v1 }
  0x5e   : > { %6360 = vmatmul.mubr.msk.bf16.gmra.mxu1 %vm575_vm3, %v563_v24 }
  0x5f   : > { %6316 = vmatmul.mubr.msk.bf16.gmra.mxu0 %vm575_vm3, %v475_v22  ;;  %6363 = vmatprep.mubr.msk.bf16.mxu1 %vm7429_vm1, %v10421_v1 }
  0x60   : > { %6319 = vmatprep.mubr.msk.bf16.mxu0 %vm7429_vm1, %v10421_v1 }
  0x66   : > { %6364 = vmatmul.mubr.msk.bf16.gmra.mxu1 %vm575_vm3, %v571_v31 }
  0x67   : > { %6320 = vmatmul.mubr.msk.bf16.gmra.mxu0 %vm575_vm3, %v483_v30  ;;  %6367 = vmatprep.mubr.msk.bf16.mxu1 %vm7429_vm1, %v10421_v1 }
  0x68   : > { %6323 = vmatprep.mubr.msk.bf16.mxu0 %vm7429_vm1, %v10421_v1 }
  0x6e   : > { %6368 = vmatmul.mubr.msk.bf16.gmra.mxu1 %vm575_vm3, %v574_v38 }
  0x6f   : > { %6324 = vmatmul.mubr.msk.bf16.gmra.mxu0 %vm575_vm3, %v491_v37  ;;  %6373 = vmatprep.mubr.msk.bf16.mxu1 %vm7429_vm1, %v10421_v1 }
  0x70   : > { %6327 = vmatprep.mubr.msk.bf16.mxu0 %vm7429_vm1, %v10421_v1 }
  0x76   : > { %6374 = vmatmul.mubr.msk.bf16.vlgmr.msra.gmra.mxu1 %vm575_vm3, %v7536_v5  ;;  %v1102_v5 = vrot.slane %v7554_v13, 1 }
  0x77   : > { %6328 = vmatmul.mubr.msk.bf16.gmra.mxu0 %vm575_vm3, %v7671_v46  ;;  %6544 = vmatpush3.bf16.msra.mxu1 %v1698_v29  ;;  %v1101_v46 = vsel %vm1098_vm4, %v1099_v42, %v1100_v44 }
  0x78   : > { %6459 = vmatprep.mubr.msk.bf16.mxu0 %vm7429_vm1, %v10421_v1  ;;  %6377 = vmatprep.mubr.msk.bf16.mxu1 %vm7429_vm1, %v10421_v1  ;;  %v1103_v50 = vsel %vm1098_vm4, %v1100_v44, %v1102_v5 }
  0x79   : > { %6715 = vmatprep.subr.bf16.mxu1 %v10421_v1 }
  0x7e   : > { %6378 = vmatmul.mubr.msk.bf16.gmra.mxu1 %vm575_vm3, %v7539_v6  ;;  %v1105_v6 = vsel %vm1098_vm4, %v1102_v5, %v1104_v51 }
  0x7f   : > { %6460 = vmatmul.mubr.msk.bf16.vlgmr.msra.gmra.mxu0 %vm575_vm3, %v1101_v46  ;;  %6381 = vmatprep.mubr.msk.bf16.mxu1 %vm7429_vm1, %v10421_v1 }
  0x80   : > { %6630 = vmatpush3.bf16.msra.mxu0 %v2200_v49  ;;  %6463 = vmatprep.mubr.msk.bf16.mxu0 %vm7429_vm1, %v10421_v1 }
  0x81   : > { %6801 = vmatprep.subr.bf16.mxu0 %v10421_v1 }
  0x86   : > { %6382 = vmatmul.mubr.msk.bf16.gmra.mxu1 %vm575_vm3, %v7554_v13  ;;  %v1107_v13 = vsel %vm1098_vm4, %v1104_v51, %v1106_v53 }
  0x87   : > { %6464 = vmatmul.mubr.msk.bf16.gmra.mxu0 %vm575_vm3, %v1103_v50  ;;  %6385 = vmatprep.mubr.msk.bf16.mxu1 %vm7429_vm1, %v10421_v1 }
  0x88   : > { %6467 = vmatprep.mubr.msk.bf16.mxu0 %vm7429_vm1, %v10421_v1 }
  0x8e   : > { %6386 = vmatmul.mubr.msk.bf16.gmra.mxu1 %vm575_vm3, %v7577_v32  ;;  %v1109_v32 = vsel %vm1098_vm4, %v1106_v53, %v1108_v23 }
  0x8f   : > { %6468 = vmatmul.mubr.msk.bf16.gmra.mxu0 %vm575_vm3, %v1105_v6  ;;  %6389 = vmatprep.mubr.msk.bf16.mxu1 %vm7429_vm1, %v10421_v1 }
  0x90   : > { %6471 = vmatprep.mubr.msk.bf16.mxu0 %vm7429_vm1, %v10421_v1 }
  0x96   : > { %6390 = vmatmul.mubr.msk.bf16.gmra.mxu1 %vm575_vm3, %v7595_v43  ;;  %v1111_v43 = vsel %vm1098_vm4, %v1108_v23, %v1110_v54 }
  0x97   : > { %6472 = vmatmul.mubr.msk.bf16.gmra.mxu0 %vm575_vm3, %v1107_v13  ;;  %6393 = vmatprep.mubr.msk.bf16.mxu1 %vm7429_vm1, %v10421_v1 }
  0x98   : > { %6475 = vmatprep.mubr.msk.bf16.mxu0 %vm7429_vm1, %v10421_v1 }
  0x9e   : > { %6394 = vmatmul.mubr.msk.bf16.gmra.mxu1 %vm575_vm3, %v7603_v47  ;;  %v1113_v47 = vsel %vm1098_vm4, %v1110_v54, %v1112_v55 }
  0x9f   : > { %6476 = vmatmul.mubr.msk.bf16.gmra.mxu0 %vm575_vm3, %v1109_v32  ;;  %6397 = vmatprep.mubr.msk.bf16.mxu1 %vm7429_vm1, %v10421_v1 }
  0xa0   : > { %6479 = vmatprep.mubr.msk.bf16.mxu0 %vm7429_vm1, %v10421_v1 }
  0xa6   : > { %6398 = vmatmul.mubr.msk.bf16.gmra.mxu1 %vm575_vm3, %v7618_v56  ;;  %v1115_v56 = vsel %vm1098_vm4, %v1112_v55, %v1114_v57 }
  0xa7   : > { %6480 = vmatmul.mubr.msk.bf16.gmra.mxu0 %vm575_vm3, %v1111_v43  ;;  %6401 = vmatprep.mubr.msk.bf16.mxu1 %vm7429_vm1, %v10421_v1 }
  0xa8   : > { %6483 = vmatprep.mubr.msk.bf16.mxu0 %vm7429_vm1, %v10421_v1 }
  0xae   : > { %6402 = vmatmul.mubr.msk.bf16.gmra.mxu1 %vm575_vm3, %v7630_v3  ;;  %v1117_v3 = vsel %vm1098_vm4, %v1114_v57, %v1116_v58 }
  0xaf   : > { %6484 = vmatmul.mubr.msk.bf16.gmra.mxu0 %vm575_vm3, %v1113_v47  ;;  %6405 = vmatprep.mubr.msk.bf16.mxu1 %vm7429_vm1, %v10421_v1 }
  0xb0   : > { %6487 = vmatprep.mubr.msk.bf16.mxu0 %vm7429_vm1, %v10421_v1 }
  0xb6   : > { %6406 = vmatmul.mubr.msk.bf16.gmra.mxu1 %vm575_vm3, %v7643_v19  ;;  %v1119_v19 = vsel %vm1098_vm4, %v1116_v58, %v1118_v59 }
  0xb7   : > { %6488 = vmatmul.mubr.msk.bf16.gmra.mxu0 %vm575_vm3, %v1115_v56  ;;  %6409 = vmatprep.mubr.msk.bf16.mxu1 %vm7429_vm1, %v10421_v1 }
  0xb8   : > { %6491 = vmatprep.mubr.msk.bf16.mxu0 %vm7429_vm1, %v10421_v1 }
  0xbe   : > { %6410 = vmatmul.mubr.msk.bf16.gmra.mxu1 %vm575_vm3, %v7679_v52  ;;  %v1121_v52 = vsel %vm1098_vm4, %v1118_v59, %v1120_v60 }
  0xbf   : > { %6492 = vmatmul.mubr.msk.bf16.gmra.mxu0 %vm575_vm3, %v1117_v3  ;;  %6413 = vmatprep.mubr.msk.bf16.mxu1 %vm7429_vm1, %v10421_v1 }
  0xc0   : > { %6495 = vmatprep.mubr.msk.bf16.mxu0 %vm7429_vm1, %v10421_v1 }
  0xc6   : > { %6414 = vmatmul.mubr.msk.bf16.gmra.mxu1 %vm575_vm3, %v7633_v7  ;;  %v1123_v7 = vsel %vm1098_vm4, %v1120_v60, %v1122_v61 }
  0xc7   : > { %6496 = vmatmul.mubr.msk.bf16.gmra.mxu0 %vm575_vm3, %v1119_v19  ;;  %6417 = vmatprep.mubr.msk.bf16.mxu1 %vm7429_vm1, %v10421_v1 }
  0xc8   : > { %6499 = vmatprep.mubr.msk.bf16.mxu0 %vm7429_vm1, %v10421_v1 }
  0xce   : > { %6418 = vmatmul.mubr.msk.bf16.gmra.mxu1 %vm575_vm3, %v7545_v10  ;;  %v1125_v10 = vsel %vm1098_vm4, %v1122_v61, %v1124_v63 }
  0xcf   : > { %6500 = vmatmul.mubr.msk.bf16.gmra.mxu0 %vm575_vm3, %v1121_v52  ;;  %6421 = vmatprep.mubr.msk.bf16.mxu1 %vm7429_vm1, %v10421_v1 }
  0xd0   : > { %6503 = vmatprep.mubr.msk.bf16.mxu0 %vm7429_vm1, %v10421_v1 }
  0xd6   : > { %6422 = vmatmul.mubr.msk.bf16.gmra.mxu1 %vm575_vm3, %v7548_v11  ;;  %v1127_v11 = vsel %vm1098_vm4, %v1124_v63, %v1126_v0  ;;  %v1448_v63 = vld [vmem:[%s7529_s9 + $0xc] sm:$0xf] }
  0xd7   : > { %6504 = vmatmul.mubr.msk.bf16.gmra.mxu0 %vm575_vm3, %v1123_v7  ;;  %6425 = vmatprep.mubr.msk.bf16.mxu1 %vm7429_vm1, %v10421_v1  ;;  %v1447_v7 = vld [vmem:[%s7529_s9 + $0x8] sm:$0xe] }
  0xd8   : > { %6507 = vmatprep.mubr.msk.bf16.mxu0 %vm7429_vm1, %v10421_v1 }
  0xde   : > { %6426 = vmatmul.mubr.msk.bf16.gmra.mxu1 %vm575_vm3, %v7557_v14 }
  0xdf   : > { %6508 = vmatmul.mubr.msk.bf16.gmra.mxu0 %vm575_vm3, %v1125_v10  ;;  %6429 = vmatprep.mubr.msk.bf16.mxu1 %vm7429_vm1, %v10421_v1 }
  0xe0   : > { %6511 = vmatprep.mubr.msk.bf16.mxu0 %vm7429_vm1, %v10421_v1 }
  0xe6   : > { %v7883_v12 = vpop.f32.mrf.mxu1  ;;  %6430 = vmatmul.mubr.msk.bf16.gmra.mxu1 %vm575_vm3, %v7584_v36  ;;  %v1130_v36 = vrot.slane %v7607_v48, 1 }
  0xe7   : > { %v677_v2 = vpop.f32.mrf.mxu0  ;;  %6512 = vmatmul.mubr.msk.bf16.gmra.mxu0 %vm575_vm3, %v1127_v11  ;;  %6433 = vmatprep.mubr.msk.bf16.mxu1 %vm7429_vm1, %v10421_v1 }
  0xe8   : > { %6515 = vmatprep.mubr.msk.bf16.mxu0 %vm7429_vm1, %v10421_v1  ;;  %v6333_v14 = vpop.f32.mrf.mxu1  ;;  %v1131_v30 = vsel %vm1098_vm4, %v1128_v9, %v1130_v36  ;;  %v5872_v2 = vcombine.low %v1447_v7, %v1448_v63  ;;  %v7249_v9 = vld [vmem:[%s7529_s9 + $0x10] sm:$0xff]  }
  0xe9   : > { %v6289_v15 = vpop.f32.mrf.mxu0 }
  0xea   : > { %v7890_v20 = vpop.f32.mrf.mxu1 }
  0xeb   : > { %v680_v17 = vpop.f32.mrf.mxu0 }
  0xec   : > { %v6334_v22 = vpop.f32.mrf.mxu1  ;;  %v1952_v17 = vshll.u32 %v5872_v2, 16 }
  0xed   : > { %v6290_v21 = vpop.f32.mrf.mxu0 }
  0xee   : > { %v7898_v25 = vpop.f32.mrf.mxu1  ;;  %6434 = vmatmul.mubr.msk.bf16.gmra.mxu1 %vm575_vm3, %v7599_v45  ;;  %v1132_v45 = vrot.slane %v7626_v62, 1  ;;  %v1960_v21 = vshll.u32 %v7249_v9, 16 }
  0xef   : > { %v7892_v24 = vpop.f32.mrf.mxu0  ;;  %6516 = vmatmul.mubr.msk.bf16.gmra.mxu0 %vm575_vm3, %v1129_v18  ;;  %6437 = vmatprep.mubr.msk.bf16.mxu1 %vm7429_vm1, %v10421_v1  ;;  %v1957_v18 = vshrl.u32 %v7249_v9, 16 }
  0xf0   : > { %6519 = vmatprep.mubr.msk.bf16.mxu0 %vm7429_vm1, %v10421_v1  ;;  %v6337_v27 = vpop.f32.mrf.mxu1  ;;  %v1133_v29 = vsel %vm1098_vm4, %v1130_v36, %v1132_v45 }
  0xf1   : > { %v6293_v26 = vpop.f32.mrf.mxu0  ;;  %v1594_v27 = vrot.slane %v7249_v9, 1 }
  0xf2   : > { %v7907_v31 = vpop.f32.mrf.mxu1  ;;  %v1593_v26 = vrot.slane %v5872_v2, 1 }
  0xf3   : > { %v7904_v28 = vpop.f32.mrf.mxu0 }
  0xf4   : > { %v6338_v35 = vpop.f32.mrf.mxu1 }
  0xf5   : > { %v6294_v33 = vpop.f32.mrf.mxu0  ;;  %v5937_v35 = vld [vmem:[%s10417_s1 + $0xa] sm:$0x3] }
  0xf6   : > { %v7915_v38 = vpop.f32.mrf.mxu1  ;;  %6438 = vmatmul.mubr.msk.bf16.gmra.mxu1 %vm575_vm3, %v7607_v48  ;;  %v1134_v48 = vrot.slane %v7639_v16, 1 }
  0xf7   : > { %v7909_v37 = vpop.f32.mrf.mxu0  ;;  %6520 = vmatmul.mubr.msk.bf16.gmra.mxu0 %vm575_vm3, %v1131_v30  ;;  %6441 = vmatprep.mubr.msk.bf16.mxu1 %vm7429_vm1, %v10421_v1 }
  0xf8   : > { %6523 = vmatprep.mubr.msk.bf16.mxu0 %vm7429_vm1, %v10421_v1  ;;  %v6341_v40 = vpop.f32.mrf.mxu1  ;;  %v1135_v6 = vsel %vm1098_vm4, %v1132_v45, %v1134_v48 }
  0xf9   : > { %v6297_v39 = vpop.f32.mrf.mxu0  ;;  %v1959_v40 = vrot.slane %v1957_v18, 1 }
  0xfa   : > { %v7924_v42 = vpop.f32.mrf.mxu1  ;;  %v1954_v39 = vrot.slane %v1952_v17, 2 }
  0xfb   : > { %v7921_v41 = vpop.f32.mrf.mxu0 }
  0xfc   : > { %v6342_v4 = vpop.f32.mrf.mxu1 }
  0xfd   : > { %v6298_v44 = vpop.f32.mrf.mxu0 }
  0xfe   : > { %v7932_v49 = vpop.f32.mrf.mxu1  ;;  %6442 = vmatmul.mubr.msk.bf16.gmra.mxu1 %vm575_vm3, %v7626_v62  ;;  %v1136_v62 = vrot.slane %v7662_v34, 1 }
  0xff   : > { %v7926_v46 = vpop.f32.mrf.mxu0  ;;  %6524 = vmatmul.mubr.msk.bf16.gmra.mxu0 %vm575_vm3, %v1133_v29  ;;  %6445 = vmatprep.mubr.msk.bf16.mxu1 %vm7429_vm1, %v10421_v1  ;;  %v1962_v29 = vrot.slane %v1960_v21, 2 }
 0x100   : > { %6527 = vmatprep.mubr.msk.bf16.mxu0 %vm7429_vm1, %v10421_v1  ;;  %v6345_v50 = vpop.f32.mrf.mxu1  ;;  %v1137_v57 = vsel %vm1098_vm4, %v1134_v48, %v1136_v62  ;;  %v1595_v48 = vsel %vm1098_vm4, %v1593_v26, %v1594_v27 }
 0x101   : > { %v6301_v5 = vpop.f32.mrf.mxu0 }
 0x102   : > { %v7941_v53 = vpop.f32.mrf.mxu1  ;;  %v7250_v5 = vld [vmem:[%s7529_s9 + $0x18] sm:$0xff]  }
 0x103   : > { %v7938_v51 = vpop.f32.mrf.mxu0 }
 0x104   : > { %v6346_v23 = vpop.f32.mrf.mxu1 }
 0x105   : > { %v6302_v13 = vpop.f32.mrf.mxu0 }
 0x106   : > { %v7949_v54 = vpop.f32.mrf.mxu1  ;;  %6446 = vmatmul.mubr.msk.bf16.gmra.mxu1 %vm575_vm3, %v7639_v16  ;;  %v1138_v16 = vrot.slane %v7701_v8, 1  ;;  %v7247_v8 = vld [vmem:[%s7529_s9 + $0xa0] ss:$0 sps:$4 sm:$0x33]   ;;  %v2555_v13 = vsel %vm639_vm0, %v5937_v35, 0 }
 0x107   : > { %v7943_v32 = vpop.f32.mrf.mxu0  ;;  %6528 = vmatmul.mubr.msk.bf16.gmra.mxu0 %vm575_vm3, %v1135_v6  ;;  %6449 = vmatprep.mubr.msk.bf16.mxu1 %vm7429_vm1, %v10421_v1 }
 0x108   : > { %6531 = vmatprep.mubr.msk.bf16.mxu0 %vm7429_vm1, %v10421_v1  ;;  %v6349_v55 = vpop.f32.mrf.mxu1  ;;  %v1139_v10 = vsel %vm1098_vm4, %v1136_v62, %v1138_v16  ;;  %v1963_v62 = vor.u32 %v1962_v29, %v1959_v40 }
 0x109   : > { %v6305_v43 = vpop.f32.mrf.mxu0  ;;  %v1969_v55 = vshll.u32 %v7250_v5, 16 }
 0x10a   : > { %v7958_v56 = vpop.f32.mrf.mxu1  ;;  %v1966_v43 = vshrl.u32 %v7250_v5, 16 }
 0x10b   : > { %v7955_v47 = vpop.f32.mrf.mxu0 }
 0x10c   : > { %v6350_v3 = vpop.f32.mrf.mxu1  ;;  %v1968_v63 = vrot.slane %v1966_v43, 1 }
 0x10d   : > { %v6306_v58 = vpop.f32.mrf.mxu0  ;;  %v1596_v3 = vrot.slane %v7250_v5, 1 }
 0x10e   : > { %v7966_v19 = vpop.f32.mrf.mxu1  ;;  %6450 = vmatmul.mubr.msk.bf16.gmra.mxu1 %vm575_vm3, %v7662_v34  ;;  %v1949_v34 = vshrl.u32 %v5872_v2, 16 }
 0x10f   : > { %v7960_v59 = vpop.f32.mrf.mxu0  ;;  %6532 = vmatmul.mubr.msk.bf16.gmra.mxu0 %vm575_vm3, %v1137_v57  ;;  %6453 = vmatprep.mubr.msk.bf16.mxu1 %vm7429_vm1, %v10421_v1  ;;  %v1597_v9 = vsel %vm1098_vm4, %v1594_v27, %v1596_v3 }
 0x110   : > { %6535 = vmatprep.mubr.msk.bf16.mxu0 %vm7429_vm1, %v10421_v1  ;;  %v6353_v52 = vpop.f32.mrf.mxu1  ;;  %v1951_v45 = vrot.slane %v1949_v34, 1 }
 0x111   : > { %v6309_v60 = vpop.f32.mrf.mxu0 }
 0x112   : > { %v7977_v0 = vpop.f32.mrf.mxu1  ;;  %v1955_v23 = vor.u32 %v1954_v39, %v1951_v45 }
 0x113   : > { %v7972_v61 = vpop.f32.mrf.mxu0 }
 0x114   : > { %v6354_v15 = vpop.f32.mrf.mxu1  ;;  %v1964_v7 = vsel %vm1947_vm5, %v1955_v23, %v1963_v62 }
 0x115   : > { %v6310_v11 = vpop.f32.mrf.mxu0  ;;  %v7251_v15 = vld [vmem:[%s7529_s9 + $0x20] sm:$0xff]  }
 0x116   : > { %v7986_v22 = vpop.f32.mrf.mxu1  ;;  %6454 = vmatmul.mubr.msk.bf16.gmra.mxu1 %vm575_vm3, %v7247_v8  ;;  %v1975_v21 = vshrl.u32 %v7251_v15, 16  ;;  %v1598_v27 = vrot.slane %v7251_v15, 1 }
 0x117   : > { %v7981_v14 = vpop.f32.mrf.mxu0  ;;  %6536 = vmatmul.mubr.msk.bf16.gmra.mxu0 %vm575_vm3, %v1139_v10  ;;  %6545 = vmatprep.mubr.msk.bf16.mxu1 %vm7429_vm1, %v10421_v1  ;;  %v1971_v10 = vrot.slane %v1969_v55, 2 }
 0x118   : > { %6539 = vmatprep.mubr.msk.bf16.mxu0 %vm7429_vm1, %v10421_v1  ;;  %v6357_v30 = vpop.f32.mrf.mxu1  ;;  %v1977_v40 = vrot.slane %v1975_v21, 1  ;;  %v1599_v5 = vsel %vm1098_vm4, %v1596_v3, %v1598_v27 }
 0x119   : > { %v6313_v36 = vpop.f32.mrf.mxu0  ;;  %v1972_v18 = vor.u32 %v1971_v10, %v1968_v63 }
 0x11a   : > { %v7996_v44 = vpop.f32.mrf.mxu1  ;;  %v1978_v36 = vshll.u32 %v7251_v15, 16 }
 0x11b   : > { %v7991_v33 = vpop.f32.mrf.mxu0  ;;  %v1973_v39 = vsel %vm1947_vm5, %v1963_v62, %v1972_v18 }
 0x11c   : > { %v6358_v50 = vpop.f32.mrf.mxu1  ;;  %v1980_v29 = vrot.slane %v1978_v36, 2 }
 0x11d   : > { %v6314_v4 = vpop.f32.mrf.mxu0  ;;  %v7252_v50 = vld [vmem:[%s7529_s9 + $0x28] sm:$0xff]  }
 0x11e   : > { %v8006_v57 = vpop.f32.mrf.mxu1  ;;  %6546 = vmatmul.mubr.msk.bf16.vlgmr.msra.gmra.mxu1 %vm575_vm3, %v1595_v48  ;;  %v1981_v43 = vor.u32 %v1980_v29, %v1977_v40  ;;  %v1984_v55 = vshrl.u32 %v7252_v50, 16  ;;  %v1600_v3 = vrot.slane %v7252_v50, 1 }
 0x11f   : > { %v8000_v6 = vpop.f32.mrf.mxu0  ;;  %6540 = vmatmul.mubr.msk.bf16.gmra.mxu0 %vm575_vm3, %v1138_v16  ;;  %6716 = vmatpush3.bf16.msra.mxu1 %v2555_v13  ;;  %v5960_v16 = vld [vmem:[%s10417_s1 + $0xc] sm:$0x3] }
 0x120   : > { %6631 = vmatprep.mubr.msk.bf16.mxu0 %vm7429_vm1, %v10421_v1  ;;  %6549 = vmatprep.mubr.msk.bf16.mxu1 %vm7429_vm1, %v10421_v1  ;;  %v6361_v60 = vpop.f32.mrf.mxu1  ;;  %v3049_v2 = vsel %vm639_vm0, %v5960_v16, 0  ;;  %v1982_v63 = vsel %vm1947_vm5, %v1972_v18, %v1981_v43  ;;  %v1986_v10 = vrot.slane %v1984_v55, 1  ;;  %v1601_v15 = vsel %vm1098_vm4, %v1598_v27, %v1600_v3 }
 0x121   : > { %v6317_v58 = vpop.f32.mrf.mxu0  ;;  %6887 = vmatprep.subr.bf16.mxu1 %v10421_v1 }
 0x122   : > { %v8018_v11 = vpop.f32.mrf.mxu1  ;;  %v1987_v58 = vshll.u32 %v7252_v50, 16 }
 0x123   : > { %v8014_v52 = vpop.f32.mrf.mxu0 }
 0x124   : > { %v6362_v34 = vpop.f32.mrf.mxu1 }
 0x125   : > { %v6318_v8 = vpop.f32.mrf.mxu0  ;;  %v7253_v34 = vld [vmem:[%s7529_s9 + $0x30] sm:$0xff]  }
 0x126   : > { %v8028_v26 = vpop.f32.mrf.mxu1  ;;  %6550 = vmatmul.mubr.msk.bf16.gmra.mxu1 %vm575_vm3, %v1597_v9  ;;  %v1989_v8 = vrot.slane %v1987_v58, 2  ;;  %v1602_v27 = vrot.slane %v7253_v34, 1 }
 0x127   : > { %v8023_v17 = vpop.f32.mrf.mxu0  ;;  %6632 = vmatmul.mubr.msk.bf16.vlgmr.msra.gmra.mxu0 %vm575_vm3, %v1964_v7  ;;  %6553 = vmatprep.mubr.msk.bf16.mxu1 %vm7429_vm1, %v10421_v1 }
 0x128   : > { %6802 = vmatpush3.bf16.msra.mxu0 %v3049_v2  ;;  %6635 = vmatprep.mubr.msk.bf16.mxu0 %vm7429_vm1, %v10421_v1  ;;  %v6365_v35 = vpop.f32.mrf.mxu1  ;;  %v1603_v58 = vsel %vm1098_vm4, %v1600_v3, %v1602_v27 }
 0x129   : > { %v6321_v30 = vpop.f32.mrf.mxu0  ;;  %6973 = vmatprep.subr.bf16.mxu0 %v10421_v1  ;;  %v1993_v35 = vshrl.u32 %v7253_v34, 16 }
 0x12a   : > { %v832_v4 = vpop.f32.mrf.mxu1  ;;  %v1990_v30 = vor.u32 %v1989_v8, %v1986_v10 }
 0x12b   : > { %v8034_v45 = vpop.f32.mrf.mxu0 }
 0x12c   : > { %v6366_v13 = vpop.f32.mrf.mxu1 }
 0x12d   : > { %v6322_v48 = vpop.f32.mrf.mxu0 }
 0x12e   : > { %v837_v62 = vpop.f32.mrf.mxu1  ;;  %6554 = vmatmul.mubr.msk.bf16.gmra.mxu1 %vm575_vm3, %v1599_v5  ;;  %v1991_v48 = vsel %vm1947_vm5, %v1981_v43, %v1990_v30  ;;  %v1995_v5 = vrot.slane %v1993_v35, 1 }
 0x12f   : > { %v8039_v23 = vpop.f32.mrf.mxu0  ;;  %6636 = vmatmul.mubr.msk.bf16.gmra.mxu0 %vm575_vm3, %v1973_v39  ;;  %6557 = vmatprep.mubr.msk.bf16.mxu1 %vm7429_vm1, %v10421_v1  ;;  %v1996_v39 = vshll.u32 %v7253_v34, 16  ;;  %v8065_v62 = vld [vmem:[%s7529_s9 + $0x38] sm:$0xff]  }
 0x130   : > { %6639 = vmatprep.mubr.msk.bf16.mxu0 %vm7429_vm1, %v10421_v1  ;;  %v6369_v60 = vpop.f32.mrf.mxu1  ;;  %v2002_v10 = vshrl.u32 %v8065_v62, 16  ;;  %v2005_v43 = vshll.u32 %v8065_v62, 16  ;;  %v1604_v3 = vrot.slane %v8065_v62, 1 }
 0x131   : > { %v6325_v16 = vpop.f32.mrf.mxu0  ;;  %v1998_v50 = vrot.slane %v1996_v39, 2 }
 0x132   : > { %v840_v2 = vpop.f32.mrf.mxu1  ;;  %v2007_v35 = vrot.slane %v2005_v43, 2 }
 0x133   : > { %v8047_v7 = vpop.f32.mrf.mxu0 }
 0x134   : > { %v6370_v21 = vpop.f32.mrf.mxu1 }
 0x135   : > { %v6326_v9 = vpop.f32.mrf.mxu0  ;;  %v2004_v21 = vrot.slane %v2002_v10, 1 }
 0x136   : > { %v926_v18 = vpop.f32.mrf.mxu1  ;;  %6558 = vmatmul.mubr.msk.bf16.gmra.mxu1 %vm575_vm3, %v1601_v15 }
 0x137   : > { %v8052_v36 = vpop.f32.mrf.mxu0  ;;  %6640 = vmatmul.mubr.msk.bf16.gmra.mxu0 %vm575_vm3, %v1982_v63  ;;  %6561 = vmatprep.mubr.msk.bf16.mxu1 %vm7429_vm1, %v10421_v1  ;;  %v1999_v63 = vor.u32 %v1998_v50, %v1995_v5 }
 0x138   : > { %6643 = vmatprep.mubr.msk.bf16.mxu0 %vm7429_vm1, %v10421_v1  ;;  %v6375_v29 = vpop.f32.mrf.mxu1 }
 0x139   : > { %v6329_v40 = vpop.f32.mrf.mxu0  ;;  %v2000_v34 = vsel %vm1947_vm5, %v1990_v30, %v1999_v63  ;;  %v1605_v29 = vsel %vm1098_vm4, %v1602_v27, %v1604_v3  ;;  %v2008_v30 = vor.u32 %v2007_v35, %v2004_v21 }
 0x13a   : > { %v929_v13 = vpop.f32.mrf.mxu1 }
 0x13b   : > { %v8060_v4 = vpop.f32.mrf.mxu0 }
 0x13c   : > { %v6376_v16 = vpop.f32.mrf.mxu1 }
 0x13d   : > { %v6330_v55 = vpop.f32.mrf.mxu0 }
 0x13e   : > { %v934_v8 = vpop.f32.mrf.mxu1  ;;  %6562 = vmatmul.mubr.msk.bf16.gmra.mxu1 %vm575_vm3, %v1603_v58 }
 0x13f   : > { %v1240_v60 = vpop.f32.mrf.mxu0  ;;  %6644 = vmatmul.mubr.msk.bf16.gmra.mxu0 %vm575_vm3, %v1991_v48  ;;  %6565 = vmatprep.mubr.msk.bf16.mxu1 %vm7429_vm1, %v10421_v1  ;;  %v935_v40 = vadd.f32 %v934_v8, %v7892_v24  ;;  %v8080_v48 = vld [vmem:[%s7529_s9 + $0x40] sm:$0xff]  }
 0x140   : > { %6647 = vmatprep.mubr.msk.bf16.mxu0 %vm7429_vm1, %v10421_v1  ;;  %v6379_v9 = vpop.f32.mrf.mxu1  ;;  %v2011_v55 = vshrl.u32 %v8080_v48, 16  ;;  %v2014_v58 = vshll.u32 %v8080_v48, 16  ;;  %v1606_v60 = vrot.slane %v8080_v48, 1 }
 0x141   : > { %v6461_v2 = vpop.f32.mrf.mxu0 }
 0x142   : > { %v937_v39 = vpop.f32.mrf.mxu1  ;;  %v2009_v2 = vsel %vm1947_vm5, %v1999_v63, %v2008_v30  ;;  %v2013_v9 = vrot.slane %v2011_v55, 1 }
 0x143   : > { %v1243_v15 = vpop.f32.mrf.mxu0  ;;  %v938_v27 = vadd.f32 %v937_v39, %v7904_v28  ;;  %v8100_v28 = vld [vmem:[%s7529_s9 + $0x48] sm:$0xff]  }
 0x144   : > { %v6380_v5 = vpop.f32.mrf.mxu1  ;;  %v2016_v15 = vrot.slane %v2014_v58, 2  ;;  %v1608_v58 = vrot.slane %v8100_v28, 1 }
 0x145   : > { %v6462_v18 = vpop.f32.mrf.mxu0  ;;  %v2020_v5 = vshrl.u32 %v8100_v28, 16 }
 0x146   : > { %v942_v16 = vpop.f32.mrf.mxu1  ;;  %6566 = vmatmul.mubr.msk.bf16.gmra.mxu1 %vm575_vm3, %v1605_v29  ;;  %v1607_v18 = vsel %vm1098_vm4, %v1604_v3, %v1606_v60  ;;  %v2017_v63 = vor.u32 %v2016_v15, %v2013_v9 }
 0x147   : > { %v1248_v50 = vpop.f32.mrf.mxu0  ;;  %6648 = vmatmul.mubr.msk.bf16.gmra.mxu0 %vm575_vm3, %v2000_v34  ;;  %6569 = vmatprep.mubr.msk.bf16.mxu1 %vm7429_vm1, %v10421_v1  ;;  %v943_v35 = vadd.f32 %v942_v16, %v7909_v37 }
 0x148   : > { %v8083_v13 = vadd.f32 %v1248_v50, %v935_v40  ;;  %6651 = vmatprep.mubr.msk.bf16.mxu0 %vm7429_vm1, %v10421_v1  ;;  %v6383_v10 = vpop.f32.mrf.mxu1  ;;  %v2023_v50 = vshll.u32 %v8100_v28, 16 }
 0x149   : > { %v6465_v24 = vpop.f32.mrf.mxu0  ;;  %v2018_v10 = vsel %vm1947_vm5, %v2008_v30, %v2017_v63 }
 0x14a   : > { %v945_v34 = vpop.f32.mrf.mxu1 }
 0x14b   : > { %v1251_v43 = vpop.f32.mrf.mxu0  ;;  %v946_v3 = vadd.f32 %v945_v34, %v7921_v41  ;;  %v8120_v41 = vld [vmem:[%s7529_s9 + $0x50] sm:$0xff]  }
 0x14c   : > { %v8094_v8 = vadd.f32 %v1251_v43, %v938_v27  ;;  %v6384_v39 = vpop.f32.mrf.mxu1  ;;  %v2022_v43 = vrot.slane %v2020_v5, 1  ;;  %v2032_v5 = vshll.u32 %v8120_v41, 16 }
 0x14d   : > { %v6466_v21 = vpop.f32.mrf.mxu0 }
 0x14e   : > { %v950_v55 = vpop.f32.mrf.mxu1  ;;  %6570 = vmatmul.mubr.msk.bf16.gmra.mxu1 %vm575_vm3, %v1607_v18 }
 0x14f   : > { %v1256_v40 = vpop.f32.mrf.mxu0  ;;  %6652 = vmatmul.mubr.msk.bf16.gmra.mxu0 %vm575_vm3, %v2009_v2  ;;  %6573 = vmatprep.mubr.msk.bf16.mxu1 %vm7429_vm1, %v10421_v1  ;;  %v2025_v2 = vrot.slane %v2023_v50, 2  ;;  %v951_v21 = vadd.f32 %v950_v55, %v7926_v46  ;;  %v1610_v55 = vrot.slane %v8120_v41, 1 }
 0x150   : > { %v8103_v29 = vadd.f32 %v1256_v40, %v943_v35  ;;  %6655 = vmatprep.mubr.msk.bf16.mxu0 %vm7429_vm1, %v10421_v1  ;;  %v6387_v16 = vpop.f32.mrf.mxu1  ;;  %v1609_v35 = vsel %vm1098_vm4, %v1606_v60, %v1608_v58  ;;  %v2029_v40 = vshrl.u32 %v8120_v41, 16 }
 0x151   : > { %v6469_v37 = vpop.f32.mrf.mxu0  ;;  %v2026_v30 = vor.u32 %v2025_v2, %v2022_v43  ;;  %v2034_v43 = vrot.slane %v2032_v5, 2 }
 0x152   : > { %v953_v9 = vpop.f32.mrf.mxu1 }
 0x153   : > { %v1259_v24 = vpop.f32.mrf.mxu0  ;;  %v954_v60 = vadd.f32 %v953_v9, %v7938_v51  ;;  %v8140_v51 = vld [vmem:[%s7529_s9 + $0x58] sm:$0xff]  }
 0x154   : > { %v8114_v27 = vadd.f32 %v1259_v24, %v946_v3  ;;  %v6388_v34 = vpop.f32.mrf.mxu1  ;;  %v2027_v24 = vsel %vm1947_vm5, %v2017_v63, %v2026_v30  ;;  %v2041_v5 = vshll.u32 %v8140_v51, 16 }
 0x155   : > { %v6470_v15 = vpop.f32.mrf.mxu0 }
 0x156   : > { %v958_v50 = vpop.f32.mrf.mxu1  ;;  %6574 = vmatmul.mubr.msk.bf16.gmra.mxu1 %vm575_vm3, %v1609_v35  ;;  %v1611_v35 = vsel %vm1098_vm4, %v1608_v58, %v1610_v55 }
 0x157   : > { %v1264_v18 = vpop.f32.mrf.mxu0  ;;  %6656 = vmatmul.mubr.msk.bf16.gmra.mxu0 %vm575_vm3, %v2018_v10  ;;  %6577 = vmatprep.mubr.msk.bf16.mxu1 %vm7429_vm1, %v10421_v1  ;;  %v2031_v10 = vrot.slane %v2029_v40, 1  ;;  %v2038_v40 = vshrl.u32 %v8140_v51, 16 }
 0x158   : > { %v8123_v39 = vadd.f32 %v1264_v18, %v951_v21  ;;  %6659 = vmatprep.mubr.msk.bf16.mxu0 %vm7429_vm1, %v10421_v1  ;;  %v6391_v37 = vpop.f32.mrf.mxu1  ;;  %v959_v21 = vadd.f32 %v958_v50, %v7943_v32  ;;  %v1612_v50 = vrot.slane %v8140_v51, 1 }
 0x159   : > { %v6473_v46 = vpop.f32.mrf.mxu0  ;;  %v2035_v63 = vor.u32 %v2034_v43, %v2031_v10  ;;  %v2040_v10 = vrot.slane %v2038_v40, 1  ;;  %v2043_v43 = vrot.slane %v2041_v5, 2 }
 0x15a   : > { %v961_v2 = vpop.f32.mrf.mxu1 }
 0x15b   : > { %v1267_v3 = vpop.f32.mrf.mxu0  ;;  %v962_v58 = vadd.f32 %v961_v2, %v7955_v47  ;;  %v8160_v47 = vld [vmem:[%s7529_s9 + $0x60] sm:$0xff]  }
 0x15c   : > { %v8134_v16 = vadd.f32 %v1267_v3, %v954_v60  ;;  %v6392_v9 = vpop.f32.mrf.mxu1  ;;  %v2047_v40 = vshrl.u32 %v8160_v47, 16  ;;  %v2050_v5 = vshll.u32 %v8160_v47, 16 }
 0x15d   : > { %v6474_v15 = vpop.f32.mrf.mxu0  ;;  %v1613_v9 = vsel %vm1098_vm4, %v1610_v55, %v1612_v50 }
 0x15e   : > { %v966_v46 = vpop.f32.mrf.mxu1  ;;  %6578 = vmatmul.mubr.msk.bf16.gmra.mxu1 %vm575_vm3, %v1611_v35 }
 0x15f   : > { %v1272_v34 = vpop.f32.mrf.mxu0  ;;  %6660 = vmatmul.mubr.msk.bf16.gmra.mxu0 %vm575_vm3, %v2027_v24  ;;  %6581 = vmatprep.mubr.msk.bf16.mxu1 %vm7429_vm1, %v10421_v1  ;;  %v2036_v24 = vsel %vm1947_vm5, %v2026_v30, %v2035_v63  ;;  %v967_v35 = vadd.f32 %v966_v46, %v7960_v59  ;;  %v2044_v30 = vor.u32 %v2043_v43, %v2040_v10  ;;  %v1614_v46 = vrot.slane %v8160_v47, 1 }
 0x160   : > { %v8143_v18 = vadd.f32 %v1272_v34, %v959_v21  ;;  %6663 = vmatprep.mubr.msk.bf16.mxu0 %vm7429_vm1, %v10421_v1  ;;  %v6395_v60 = vpop.f32.mrf.mxu1  ;;  %v2049_v43 = vrot.slane %v2047_v40, 1 }
 0x161   : > { %v6477_v32 = vpop.f32.mrf.mxu0  ;;  %v2045_v10 = vsel %vm1947_vm5, %v2035_v63, %v2044_v30 }
 0x162   : > { %v969_v15 = vpop.f32.mrf.mxu1 }
 0x163   : > { %v1275_v37 = vpop.f32.mrf.mxu0  ;;  %v970_v55 = vadd.f32 %v969_v15, %v7972_v61  ;;  %v8180_v61 = vld [vmem:[%s7529_s9 + $0x68] sm:$0xff]  }
 0x164   : > { %v8154_v3 = vadd.f32 %v1275_v37, %v962_v58  ;;  %v6396_v2 = vpop.f32.mrf.mxu1  ;;  %10432 = vst [vmem:[#allocation8_spill] sm:$0xff] %v8180_v61  ;;  %v2056_v40 = vshrl.u32 %v8180_v61, 16 }
 0x165   : > { %v6478_v21 = vpop.f32.mrf.mxu0 }
 0x166   : > { %v974_v58 = vpop.f32.mrf.mxu1  ;;  %6582 = vmatmul.mubr.msk.bf16.gmra.mxu1 %vm575_vm3, %v1613_v9  ;;  %v2052_v21 = vrot.slane %v2050_v5, 2  ;;  %v2059_v5 = vshll.u32 %v8180_v61, 16 }
 0x167   : > { %v1280_v34 = vpop.f32.mrf.mxu0  ;;  %6664 = vmatmul.mubr.msk.bf16.gmra.mxu0 %vm575_vm3, %v2036_v24  ;;  %6585 = vmatprep.mubr.msk.bf16.mxu1 %vm7429_vm1, %v10421_v1  ;;  %v975_v9 = vadd.f32 %v974_v58, %v7981_v14  ;;  %v1616_v58 = vrot.slane %v8180_v61, 1 }
 0x168   : > { %v8163_v32 = vadd.f32 %v1280_v34, %v967_v35  ;;  %6667 = vmatprep.mubr.msk.bf16.mxu0 %vm7429_vm1, %v10421_v1  ;;  %v6399_v60 = vpop.f32.mrf.mxu1  ;;  %v1615_v34 = vsel %vm1098_vm4, %v1612_v50, %v1614_v46  ;;  %v2053_v63 = vor.u32 %v2052_v21, %v2049_v43  ;;  %v2058_v21 = vrot.slane %v2056_v40, 1 }
 0x169   : > { %v6481_v59 = vpop.f32.mrf.mxu0 }
 0x16a   : > { %v977_v35 = vpop.f32.mrf.mxu1  ;;  %v2054_v43 = vsel %vm1947_vm5, %v2044_v30, %v2053_v63 }
 0x16b   : > { %v1283_v37 = vpop.f32.mrf.mxu0  ;;  %v978_v50 = vadd.f32 %v977_v35, %v7991_v33  ;;  %v8200_v33 = vld [vmem:[%s7529_s9 + $0x70] sm:$0xff]  }
 0x16c   : > { %v8174_v24 = vadd.f32 %v1283_v37, %v970_v55  ;;  %v6400_v15 = vpop.f32.mrf.mxu1  ;;  %10433 = vst [vmem:[#allocation9_spill] sm:$0xff] %v8200_v33  ;;  %v2065_v40 = vshrl.u32 %v8200_v33, 16 }
 0x16d   : > { %v6482_v2 = vpop.f32.mrf.mxu0 }
 0x16e   : > { %v982_v55 = vpop.f32.mrf.mxu1  ;;  %6586 = vmatmul.mubr.msk.bf16.gmra.mxu1 %vm575_vm3, %v1615_v34 }
 0x16f   : > { %v1288_v59 = vpop.f32.mrf.mxu0  ;;  %6668 = vmatmul.mubr.msk.bf16.gmra.mxu0 %vm575_vm3, %v2045_v10  ;;  %6589 = vmatprep.mubr.msk.bf16.mxu1 %vm7429_vm1, %v10421_v1  ;;  %v983_v34 = vadd.f32 %v982_v55, %v8000_v6 }
 0x170   : > { %v8183_v60 = vadd.f32 %v1288_v59, %v975_v9  ;;  %6671 = vmatprep.mubr.msk.bf16.mxu0 %vm7429_vm1, %v10421_v1  ;;  %v6403_v37 = vpop.f32.mrf.mxu1  ;;  %v2061_v9 = vrot.slane %v2059_v5, 2  ;;  %v2068_v5 = vshll.u32 %v8200_v33, 16 }
 0x171   : > { %v6485_v14 = vpop.f32.mrf.mxu0 }
 0x172   : > { %v985_v15 = vpop.f32.mrf.mxu1  ;;  %v1617_v14 = vsel %vm1098_vm4, %v1614_v46, %v1616_v58  ;;  %v2062_v30 = vor.u32 %v2061_v9, %v2058_v21  ;;  %v2067_v9 = vrot.slane %v2065_v40, 1 }
 0x173   : > { %v1291_v10 = vpop.f32.mrf.mxu0  ;;  %v986_v46 = vadd.f32 %v985_v15, %v8014_v52  ;;  %v8220_v52 = vld [vmem:[%s7529_s9 + $0x78] sm:$0xff]  }
 0x174   : > { %v8194_v2 = vadd.f32 %v1291_v10, %v978_v50  ;;  %v6404_v35 = vpop.f32.mrf.mxu1  ;;  %v10435_v50 = vmov 0.0   ;;  %v2063_v21 = vsel %vm1947_vm5, %v2053_v63, %v2062_v30  ;;  %10436 = vst [vmem:[#allocation11_spill] sm:$0xff] %v8220_v52  ;;  %v2074_v40 = vshrl.u32 %v8220_v52, 16 }
 0x175   : > { %v6486_v59 = vpop.f32.mrf.mxu0 }
 0x176   : > { %v990_v10 = vpop.f32.mrf.mxu1  ;;  %6590 = vmatmul.mubr.msk.bf16.gmra.mxu1 %vm575_vm3, %v1617_v14 }
 0x177   : > { %v1296_v1 = vpop.f32.mrf.mxu0  ;;  %6672 = vmatmul.mubr.msk.bf16.gmra.mxu0 %vm575_vm3, %v2054_v43  ;;  %6593 = vmatprep.mubr.msk.bf16.mxu1 %vm7429_vm1, %v10435_v50  ;;  %v991_v14 = vadd.f32 %v990_v10, %v8023_v17 }
 0x178   : > { %v8203_v37 = vadd.f32 %v1296_v1, %v983_v34  ;;  %6675 = vmatprep.mubr.msk.bf16.mxu0 %vm7429_vm1, %v10435_v50  ;;  %v1618_v1 = vrot.slane %v8200_v33, 1  ;;  %v6407_v55 = vpop.f32.mrf.mxu1  ;;  %v2070_v34 = vrot.slane %v2068_v5, 2 }
 0x179   : > { %v6489_v6 = vpop.f32.mrf.mxu0 }
 0x17a   : > { %10434 = vst [vmem:[#allocation10_spill] sm:$0xff] %v8203_v37  ;;  %v993_v35 = vpop.f32.mrf.mxu1  ;;  %v1619_v6 = vsel %vm1098_vm4, %v1616_v58, %v1618_v1  ;;  %v2071_v63 = vor.u32 %v2070_v34, %v2067_v9  ;;  %v2076_v9 = vrot.slane %v2074_v40, 1 }
 0x17b   : > { %v1299_v43 = vpop.f32.mrf.mxu0  ;;  %v994_v58 = vadd.f32 %v993_v35, %v8034_v45  ;;  %v8240_v45 = vld [vmem:[%s7529_s9 + $0x80] sm:$0xff]  }
 0x17c   : > { %v8214_v59 = vadd.f32 %v1299_v43, %v986_v46  ;;  %v6408_v15 = vpop.f32.mrf.mxu1  ;;  %10437 = vst [vmem:[#allocation12_spill] sm:$0xff] %v8240_v45  ;;  %v2083_v40 = vshrl.u32 %v8240_v45, 16 }
 0x17d   : > { %v6490_v61 = vpop.f32.mrf.mxu0 }
 0x17e   : > { %v2077_v61 = vshll.u32 %v8220_v52, 16  ;;  %v998_v5 = vpop.f32.mrf.mxu1  ;;  %6594 = vmatmul.mubr.msk.bf16.gmra.mxu1 %vm575_vm3, %v1619_v6 }
 0x17f   : > { %v1304_v37 = vpop.f32.mrf.mxu0  ;;  %6676 = vmatmul.mubr.msk.bf16.gmra.mxu0 %vm575_vm3, %v2063_v21  ;;  %6597 = vmatprep.mubr.msk.bf16.mxu1 %vm7429_vm1, %v10435_v50  ;;  %v2072_v21 = vsel %vm1947_vm5, %v2062_v30, %v2071_v63  ;;  %v999_v6 = vadd.f32 %v998_v5, %v8039_v23 }
 0x180   : > { %v8223_v55 = vadd.f32 %v1304_v37, %v991_v14  ;;  %6679 = vmatprep.mubr.msk.bf16.mxu0 %vm7429_vm1, %v10435_v50  ;;  %v1620_v37 = vrot.slane %v8220_v52, 1  ;;  %v6411_v10 = vpop.f32.mrf.mxu1  ;;  %v2079_v34 = vrot.slane %v2077_v61, 2  ;;  %v2086_v61 = vshll.u32 %v8240_v45, 16 }
 0x181   : > { %v6493_v17 = vpop.f32.mrf.mxu0 }
 0x182   : > { %v1001_v14 = vpop.f32.mrf.mxu1  ;;  %v1621_v17 = vsel %vm1098_vm4, %v1618_v1, %v1620_v37  ;;  %v2080_v30 = vor.u32 %v2079_v34, %v2076_v9  ;;  %v2085_v34 = vrot.slane %v2083_v40, 1 }
 0x183   : > { %v1307_v46 = vpop.f32.mrf.mxu0  ;;  %v1002_v1 = vadd.f32 %v1001_v14, %v8047_v7  ;;  %v8260_v7 = vld [vmem:[%s7529_s9 + $0x88] sm:$0xff]  }
 0x184   : > { %v8234_v43 = vadd.f32 %v1307_v46, %v994_v58  ;;  %v6412_v35 = vpop.f32.mrf.mxu1  ;;  %v2081_v9 = vsel %vm1947_vm5, %v2071_v63, %v2080_v30  ;;  %10438 = vst [vmem:[#allocation13_spill] sm:$0xff] %v8260_v7  ;;  %v2092_v40 = vshrl.u32 %v8260_v7, 16 }
 0x185   : > { %v6494_v15 = vpop.f32.mrf.mxu0 }
 0x186   : > { %v1006_v58 = vpop.f32.mrf.mxu1  ;;  %6598 = vmatmul.mubr.msk.bf16.gmra.mxu1 %vm575_vm3, %v1621_v17  ;;  %v2088_v15 = vrot.slane %v2086_v61, 2  ;;  %v2095_v61 = vshll.u32 %v8260_v7, 16 }
 0x187   : > { %v1312_v33 = vpop.f32.mrf.mxu0  ;;  %6680 = vmatmul.mubr.msk.bf16.gmra.mxu0 %vm575_vm3, %v2072_v21  ;;  %6601 = vmatprep.mubr.msk.bf16.mxu1 %vm7429_vm1, %v10435_v50  ;;  %v1007_v17 = vadd.f32 %v1006_v58, %v8052_v36 }
 0x188   : > { %v8243_v10 = vadd.f32 %v1312_v33, %v999_v6  ;;  %6683 = vmatprep.mubr.msk.bf16.mxu0 %vm7429_vm1, %v10435_v50  ;;  %v1622_v33 = vrot.slane %v8240_v45, 1  ;;  %v6415_v5 = vpop.f32.mrf.mxu1  ;;  %v2089_v63 = vor.u32 %v2088_v15, %v2085_v34  ;;  %v2094_v15 = vrot.slane %v2092_v40, 1 }
 0x189   : > { %v6497_v23 = vpop.f32.mrf.mxu0 }
 0x18a   : > { %v1009_v6 = vpop.f32.mrf.mxu1  ;;  %v1623_v23 = vsel %vm1098_vm4, %v1620_v37, %v1622_v33  ;;  %v2090_v34 = vsel %vm1947_vm5, %v2080_v30, %v2089_v63 }
 0x18b   : > { %v1315_v46 = vpop.f32.mrf.mxu0  ;;  %v1010_v37 = vadd.f32 %v1009_v6, %v8060_v4  ;;  %v8280_v4 = vld [vmem:[%s7529_s9 + $0x90] sm:$0xff]  }
 0x18c   : > { %v8254_v21 = vadd.f32 %v1315_v46, %v1002_v1  ;;  %v6416_v14 = vpop.f32.mrf.mxu1  ;;  %10439 = vst [vmem:[#allocation14_spill] sm:$0xff] %v8280_v4  ;;  %v2101_v40 = vshrl.u32 %v8280_v4, 16 }
 0x18d   : > { %v6498_v35 = vpop.f32.mrf.mxu0 }
 0x18e   : > { %v1014_v1 = vpop.f32.mrf.mxu1  ;;  %6602 = vmatmul.mubr.msk.bf16.gmra.mxu1 %vm575_vm3, %v1623_v23  ;;  %v2097_v35 = vrot.slane %v2095_v61, 2  ;;  %v2104_v61 = vshll.u32 %v8280_v4, 16 }
 0x18f   : > { %v1320_v52 = vpop.f32.mrf.mxu0  ;;  %6684 = vmatmul.mubr.msk.bf16.gmra.mxu0 %vm575_vm3, %v2081_v9  ;;  %6605 = vmatprep.mubr.msk.bf16.mxu1 %vm7429_vm1, %v10435_v50  ;;  %v1015_v23 = vadd.f32 %v1014_v1, %v7883_v12 }
 0x190   : > { %v8263_v5 = vadd.f32 %v1320_v52, %v1007_v17  ;;  %6687 = vmatprep.mubr.msk.bf16.mxu0 %vm7429_vm1, %v10435_v50  ;;  %v1624_v52 = vrot.slane %v8260_v7, 1  ;;  %v6419_v58 = vpop.f32.mrf.mxu1  ;;  %v2098_v30 = vor.u32 %v2097_v35, %v2094_v15  ;;  %v2103_v35 = vrot.slane %v2101_v40, 1 }
 0x191   : > { %v6501_v36 = vpop.f32.mrf.mxu0 }
 0x192   : > { %v1017_v17 = vpop.f32.mrf.mxu1  ;;  %v1625_v36 = vsel %vm1098_vm4, %v1622_v33, %v1624_v52  ;;  %v2099_v15 = vsel %vm1947_vm5, %v2089_v63, %v2098_v30 }
 0x193   : > { %v1323_v46 = vpop.f32.mrf.mxu0  ;;  %v1018_v33 = vadd.f32 %v1017_v17, %v7890_v20  ;;  %v8300_v20 = vld [vmem:[%s7529_s9 + $0x98] sm:$0xff]  }
 0x194   : > { %v8274_v9 = vadd.f32 %v1323_v46, %v1010_v37  ;;  %v6420_v6 = vpop.f32.mrf.mxu1  ;;  %10440 = vst [vmem:[#allocation15_spill] sm:$0xff] %v8300_v20  ;;  %v2110_v40 = vshrl.u32 %v8300_v20, 16 }
 0x195   : > { %v6502_v14 = vpop.f32.mrf.mxu0 }
 0x196   : > { %v1022_v37 = vpop.f32.mrf.mxu1  ;;  %6606 = vmatmul.mubr.msk.bf16.gmra.mxu1 %vm575_vm3, %v1625_v36  ;;  %v2106_v14 = vrot.slane %v2104_v61, 2  ;;  %v2113_v61 = vshll.u32 %v8300_v20, 16 }
 0x197   : > { %v1328_v45 = vpop.f32.mrf.mxu0  ;;  %6688 = vmatmul.mubr.msk.bf16.gmra.mxu0 %vm575_vm3, %v2090_v34  ;;  %6609 = vmatprep.mubr.msk.bf16.mxu1 %vm7429_vm1, %v10435_v50  ;;  %v1023_v36 = vadd.f32 %v1022_v37, %v7898_v25 }
 0x198   : > { %v8283_v58 = vadd.f32 %v1328_v45, %v1015_v23  ;;  %6691 = vmatprep.mubr.msk.bf16.mxu0 %vm7429_vm1, %v10435_v50  ;;  %v1626_v45 = vrot.slane %v8280_v4, 1  ;;  %v6423_v1 = vpop.f32.mrf.mxu1  ;;  %v2107_v63 = vor.u32 %v2106_v14, %v2103_v35  ;;  %v2112_v14 = vrot.slane %v2110_v40, 1 }
 0x199   : > { %v6505_v12 = vpop.f32.mrf.mxu0 }
 0x19a   : > { %v1025_v23 = vpop.f32.mrf.mxu1  ;;  %v1627_v12 = vsel %vm1098_vm4, %v1624_v52, %v1626_v45  ;;  %v2108_v35 = vsel %vm1947_vm5, %v2098_v30, %v2107_v63 }
 0x19b   : > { %v1331_v46 = vpop.f32.mrf.mxu0  ;;  %v1026_v52 = vadd.f32 %v1025_v23, %v7907_v31  ;;  %v8320_v31 = vld [vmem:[%s7529_s9 + $0xa0] sm:$0xff]  }
 0x19c   : > { %v8294_v34 = vadd.f32 %v1331_v46, %v1018_v33  ;;  %v6424_v17 = vpop.f32.mrf.mxu1  ;;  %v2119_v40 = vshrl.u32 %v8320_v31, 16 }
 0x19d   : > { %v6506_v6 = vpop.f32.mrf.mxu0 }
 0x19e   : > { %v1030_v33 = vpop.f32.mrf.mxu1  ;;  %6610 = vmatmul.mubr.msk.bf16.gmra.mxu1 %vm575_vm3, %v1627_v12  ;;  %v2115_v6 = vrot.slane %v2113_v61, 2  ;;  %v2122_v61 = vshll.u32 %v8320_v31, 16 }
 0x19f   : > { %v1336_v7 = vpop.f32.mrf.mxu0  ;;  %6692 = vmatmul.mubr.msk.bf16.gmra.mxu0 %vm575_vm3, %v2099_v15  ;;  %6613 = vmatprep.mubr.msk.bf16.mxu1 %vm7429_vm1, %v10435_v50  ;;  %v1031_v12 = vadd.f32 %v1030_v33, %v7915_v38 }
 0x1a0   : > { %v8303_v1 = vadd.f32 %v1336_v7, %v1023_v36  ;;  %6695 = vmatprep.mubr.msk.bf16.mxu0 %vm7429_vm1, %v10435_v50  ;;  %v1628_v7 = vrot.slane %v8300_v20, 1  ;;  %v6427_v37 = vpop.f32.mrf.mxu1  ;;  %v2116_v30 = vor.u32 %v2115_v6, %v2112_v14  ;;  %v2121_v6 = vrot.slane %v2119_v40, 1 }
 0x1a1   : > { %v6509_v25 = vpop.f32.mrf.mxu0 }
 0x1a2   : > { %v1033_v36 = vpop.f32.mrf.mxu1  ;;  %v1629_v25 = vsel %vm1098_vm4, %v1626_v45, %v1628_v7  ;;  %v2117_v14 = vsel %vm1947_vm5, %v2107_v63, %v2116_v30 }
 0x1a3   : > { %v1339_v46 = vpop.f32.mrf.mxu0  ;;  %v1034_v33 = vadd.f32 %v1033_v36, %v7924_v42  ;;  %v7268_v36 = vld [vmem:[%s7529_s9 + $0xa8] ss:$0 sps:$4 sm:$0x77]  }
 0x1a4   : > { %v8314_v15 = vadd.f32 %v1339_v46, %v1026_v52  ;;  %v6428_v23 = vpop.f32.mrf.mxu1 }
 0x1a5   : > { %v6510_v17 = vpop.f32.mrf.mxu0 }
 0x1a6   : > { %v1038_v38 = vpop.f32.mrf.mxu1  ;;  %6614 = vmatmul.mubr.msk.bf16.gmra.mxu1 %vm575_vm3, %v1629_v25  ;;  %v2124_v17 = vrot.slane %v2122_v61, 2 }
 0x1a7   : > { %v1344_v4 = vpop.f32.mrf.mxu0  ;;  %6696 = vmatmul.mubr.msk.bf16.gmra.mxu0 %vm575_vm3, %v2108_v35  ;;  %6617 = vmatprep.mubr.msk.bf16.mxu1 %vm7429_vm1, %v10435_v50 }
 0x1a8   : > { %v8323_v37 = vadd.f32 %v1344_v4, %v1031_v12  ;;  %6699 = vmatprep.mubr.msk.bf16.mxu0 %vm7429_vm1, %v10435_v50  ;;  %v1630_v4 = vrot.slane %v8320_v31, 1  ;;  %v6431_v52 = vpop.f32.mrf.mxu1  ;;  %v8338_v12 = vld [vmem:[%s7529_s9 + $0xa8] ss:$0 sps:$4 sm:$0xff]   ;;  %v2125_v63 = vor.u32 %v2124_v17, %v2121_v6 }
 0x1a9   : > { %v6513_v45 = vpop.f32.mrf.mxu0  ;;  %v2128_v40 = vshrl.u32 %v8338_v12, 16  ;;  %v2131_v61 = vshll.u32 %v8338_v12, 16 }
 0x1aa   : > { %10441 = vst [vmem:[#allocation16_spill] sm:$0xff] %v8323_v37  ;;  %v1041_v25 = vpop.f32.mrf.mxu1  ;;  %v1039_v45 = vadd.f32 %v1038_v38, %v7932_v49  ;;  %v1631_v42 = vsel %vm1098_vm4, %v1628_v7, %v1630_v4 }
 0x1ab   : > { %v1347_v46 = vpop.f32.mrf.mxu0  ;;  %v1042_v7 = vadd.f32 %v1041_v25, %v7941_v53  ;;  %v2130_v6 = vrot.slane %v2128_v40, 1  ;;  %v2133_v17 = vrot.slane %v2131_v61, 2 }
 0x1ac   : > { %v8334_v35 = vadd.f32 %v1347_v46, %v1034_v33  ;;  %v6432_v20 = vpop.f32.mrf.mxu1 }
 0x1ad   : > { %v6514_v23 = vpop.f32.mrf.mxu0  ;;  %v1632_v20 = vrot.slane %v7268_v36, 1 }
 0x1ae   : > { %v1046_v33 = vpop.f32.mrf.mxu1  ;;  %6618 = vmatmul.mubr.msk.bf16.gmra.mxu1 %vm575_vm3, %v1631_v42 }
 0x1af   : > { %v1352_v37 = vpop.f32.mrf.mxu0  ;;  %6700 = vmatmul.mubr.msk.bf16.gmra.mxu0 %vm575_vm3, %v2117_v14  ;;  %6621 = vmatprep.mubr.msk.bf16.mxu1 %vm7429_vm1, %v10435_v50  ;;  %v2126_v14 = vsel %vm1947_vm5, %v2116_v30, %v2125_v63  ;;  %v1047_v42 = vadd.f32 %v1046_v33, %v7949_v54  ;;  %v2134_v30 = vor.u32 %v2133_v17, %v2130_v6  ;;  %v2443_v33 = vld [vmem:[%s7529_s9 + $0x8] sm:$0xc]  ;;  %v7314_v17 = vld [vmem:[%s7529_s9 + $0xc] sm:$0xf] }
 0x1b0   : > { %v8344_v52 = vadd.f32 %v1352_v37, %v1039_v45  ;;  %6703 = vmatprep.mubr.msk.bf16.mxu0 %vm7429_vm1, %v10435_v50  ;;  %v6435_v37 = vpop.f32.mrf.mxu1 }
 0x1b1   : > { %v6517_v49 = vpop.f32.mrf.mxu0 }
 0x1b2   : > { %v1049_v23 = vpop.f32.mrf.mxu1  ;;  %v1633_v49 = vsel %vm1098_vm4, %v1630_v4, %v1632_v20 }
 0x1b3   : > { %v1355_v38 = vpop.f32.mrf.mxu0 }
 0x1b4   : > { %v8354_v46 = vadd.f32 %v1355_v38, %v1042_v7  ;;  %v6436_v53 = vpop.f32.mrf.mxu1  ;;  %v1050_v7 = vadd.f32 %v1049_v23, %v7958_v56  ;;  %v2135_v38 = vsel %vm1947_vm5, %v2125_v63, %v2134_v30 }
 0x1b5   : > { %v6518_v45 = vpop.f32.mrf.mxu0 }
 0x1b6   : > { %v1054_v40 = vpop.f32.mrf.mxu1  ;;  %6622 = vmatmul.mubr.msk.bf16.gmra.mxu1 %vm575_vm3, %v1633_v49 }
 0x1b7   : > { %v1360_v25 = vpop.f32.mrf.mxu0  ;;  %6704 = vmatmul.mubr.msk.bf16.gmra.mxu0 %vm575_vm3, %v2126_v14  ;;  %6625 = vmatprep.mubr.msk.bf16.mxu1 %vm7429_vm1, %v10435_v50  ;;  %v1055_v6 = vadd.f32 %v1054_v40, %v7966_v19  ;;  %v7315_v40 = vld [vmem:[%s7529_s9 + $0x10] sm:$0xff]  }
 0x1b8   : > { %v8360_v36 = vadd.f32 %v1360_v25, %v1047_v42  ;;  %6707 = vmatprep.mubr.msk.bf16.mxu0 %vm7429_vm1, %v10435_v50  ;;  %v6439_v54 = vpop.f32.mrf.mxu1  ;;  %v5938_v42 = vcombine.low %v2443_v33, %v7314_v17  ;;  %v6003_v33 = vld [vmem:[%s10417_s1 + $0xe] sm:$0x3] }
 0x1b9   : > { %v6521_v61 = vpop.f32.mrf.mxu0 }
 0x1ba   : > { %v1057_v14 = vpop.f32.mrf.mxu1  ;;  %v2450_v19 = vrot.slane %v5938_v42, 2  ;;  %v2451_v61 = vrot.slane %v7315_v40, 2 }
 0x1bb   : > { %v1363_v4 = vpop.f32.mrf.mxu0  ;;  %v1058_v25 = vadd.f32 %v1057_v14, %v7977_v0 }
 0x1bc   : > { %v8369_v37 = vadd.f32 %v1363_v4, %v1050_v7  ;;  %v6440_v49 = vpop.f32.mrf.mxu1  ;;  %v2452_v14 = vsel %vm2449_vm6, %v2450_v19, %v2451_v61 }
 0x1bd   : > { %v6522_v45 = vpop.f32.mrf.mxu0  ;;  %v3694_v49 = vsel %vm639_vm0, %v6003_v33, 0 }
 0x1be   : > { %v1062_v23 = vpop.f32.mrf.mxu1  ;;  %6626 = vmatmul.mubr.msk.bf16.gmra.mxu1 %vm575_vm3, %v1632_v20  ;;  %v7272_v20 = vld [vmem:[%s7529_s9 + $0x18] sm:$0xff]  }
 0x1bf   : > { %v1368_v53 = vpop.f32.mrf.mxu0  ;;  %6708 = vmatmul.mubr.msk.bf16.gmra.mxu0 %vm575_vm3, %v2135_v38  ;;  %6717 = vmatprep.mubr.msk.bf16.mxu1 %vm7429_vm1, %v10435_v50  ;;  %v7271_v38 = vld [vmem:[%s7529_s9 + $0x10] sm:$0xfc]   ;;  %v1063_v0 = vadd.f32 %v1062_v23, %v7986_v22 }
 0x1c0   : > { %v8375_v56 = vadd.f32 %v1368_v53, %v1055_v6  ;;  %6711 = vmatprep.mubr.msk.bf16.mxu0 %vm7429_vm1, %v10435_v50  ;;  %v6443_v7 = vpop.f32.mrf.mxu1 }
 0x1c1   : > { %v6525_v63 = vpop.f32.mrf.mxu0  ;;  %v6046_v7 = vld [vmem:[%s10417_s1 + $0x10] sm:$0x3] }
 0x1c2   : > { %v1065_v45 = vpop.f32.mrf.mxu1  ;;  %v2944_v63 = vrot.slane %v7271_v38, 2 }
 0x1c3   : > { %v1371_v54 = vpop.f32.mrf.mxu0  ;;  %v1066_v23 = vadd.f32 %v1065_v45, %v7996_v44 }
 0x1c4   : > { %v8384_v4 = vadd.f32 %v1371_v54, %v1058_v25  ;;  %v6444_v17 = vpop.f32.mrf.mxu1  ;;  %v2945_v25 = vrot.slane %v7272_v20, 2 }
 0x1c5   : > { %v6526_v6 = vpop.f32.mrf.mxu0 }
 0x1c6   : > { %v1070_v40 = vpop.f32.mrf.mxu1  ;;  %6718 = vmatmul.mubr.msk.bf16.vlgmr.msra.gmra.mxu1 %vm575_vm3, %v2452_v14  ;;  %v2946_v20 = vsel %vm2449_vm6, %v2944_v63, %v2945_v25  ;;  %v7273_v6 = vld [vmem:[%s7529_s9 + $0x20] sm:$0xff]  }
 0x1c7   : > { %v1376_v42 = vpop.f32.mrf.mxu0  ;;  %6712 = vmatmul.mubr.msk.bf16.gmra.mxu0 %vm575_vm3, %v2134_v30  ;;  %6888 = vmatpush3.bf16.msra.mxu1 %v3694_v49  ;;  %v7316_v30 = vld [vmem:[%s7529_s9 + $0x18] sm:$0xff]   ;;  %v1071_v14 = vadd.f32 %v1070_v40, %v8006_v57  ;;  %v2947_v63 = vrot.slane %v7273_v6, 2 }
 0x1c8   : > { %v8395_v53 = vadd.f32 %v1376_v42, %v1063_v0  ;;  %6803 = vmatprep.mubr.msk.bf16.mxu0 %vm7429_vm1, %v10435_v50  ;;  %6721 = vmatprep.mubr.msk.bf16.mxu1 %vm7429_vm1, %v10435_v50  ;;  %v2453_v19 = vrot.slane %v7316_v30, 2  ;;  %v6447_v54 = vpop.f32.mrf.mxu1  ;;  %v4049_v0 = vsel %vm639_vm0, %v6046_v7, 0 }
 0x1c9   : > { %v6529_v22 = vpop.f32.mrf.mxu0  ;;  %7059 = vmatprep.subr.mxu1 %v10435_v50 }
 0x1ca   : > { %v1073_v44 = vpop.f32.mrf.mxu1  ;;  %v2454_v17 = vsel %vm2449_vm6, %v2451_v61, %v2453_v19  ;;  %v7317_v61 = vld [vmem:[%s7529_s9 + $0x20] sm:$0xff]  }
 0x1cb   : > { %v1379_v33 = vpop.f32.mrf.mxu0  ;;  %v1074_v57 = vadd.f32 %v1073_v44, %v8018_v11  ;;  %v2455_v40 = vrot.slane %v7317_v61, 2 }
 0x1cc   : > { %v8408_v38 = vadd.f32 %v1379_v33, %v1066_v23  ;;  %v6448_v42 = vpop.f32.mrf.mxu1 }
 0x1cd   : > { %v6530_v45 = vpop.f32.mrf.mxu0 }
 0x1ce   : > { %v1078_v23 = vpop.f32.mrf.mxu1  ;;  %6722 = vmatmul.mubr.msk.bf16.gmra.mxu1 %vm575_vm3, %v2454_v17  ;;  %v7274_v45 = vld [vmem:[%s7529_s9 + $0x28] sm:$0xff]   ;;  %v2456_v17 = vsel %vm2449_vm6, %v2453_v19, %v2455_v40 }
 0x1cf   : > { %v1384_v49 = vpop.f32.mrf.mxu0  ;;  %6804 = vmatmul.mubr.msk.bf16.vlgmr.msra.gmra.mxu0 %vm575_vm3, %v2946_v20  ;;  %6725 = vmatprep.mubr.msk.bf16.mxu1 %vm7429_vm1, %v10435_v50  ;;  %v2948_v20 = vsel %vm2449_vm6, %v2945_v25, %v2947_v63 }
 0x1d0   : > { %v8416_v22 = vadd.f32 %v1384_v49, %v1071_v14  ;;  %6974 = vmatpush3.bf16.msra.mxu0 %v4049_v0  ;;  %6807 = vmatprep.mubr.msk.bf16.mxu0 %vm7429_vm1, %v10435_v50  ;;  %v6451_v7 = vpop.f32.mrf.mxu1  ;;  %v1079_v14 = vadd.f32 %v1078_v23, %v8028_v26  ;;  %v2949_v49 = vrot.slane %v7274_v45, 2  ;;  %v7318_v26 = vld [vmem:[%s7529_s9 + $0x28] sm:$0xff]  }
 0x1d1   : > { %v6533_v30 = vpop.f32.mrf.mxu0  ;;  %v2457_v19 = vrot.slane %v7318_v26, 2  ;;  %v7275_v7 = vld [vmem:[%s7529_s9 + $0x30] sm:$0xff]   ;;  %v7276_v26 = vld [vmem:[%s7529_s9 + $0x38] sm:$0xff]  }
 0x1d2   : > { %v1081_v6 = vpop.f32.mrf.mxu1  ;;  %v2950_v61 = vsel %vm2449_vm6, %v2947_v63, %v2949_v49  ;;  %v7319_v63 = vld [vmem:[%s7529_s9 + $0x30] sm:$0xff]  }
 0x1d3   : > { %v1387_v54 = vpop.f32.mrf.mxu0  ;;  %v2458_v45 = vsel %vm2449_vm6, %v2455_v40, %v2457_v19 }
 0x1d4   : > { %v8425_v33 = vadd.f32 %v1387_v54, %v1074_v57  ;;  %v6452_v11 = vpop.f32.mrf.mxu1 }
 0x1d5   : > { %v6534_v0 = vpop.f32.mrf.mxu0 }
 0x1d6   : > { %v1086_v25 = vpop.f32.mrf.mxu1  ;;  %6726 = vmatmul.mubr.msk.bf16.gmra.mxu1 %vm575_vm3, %v2456_v17 }
 0x1d7   : > { %v1392_v44 = vpop.f32.mrf.mxu0  ;;  %6808 = vmatmul.mubr.msk.bf16.gmra.mxu0 %vm575_vm3, %v2948_v20  ;;  %6729 = vmatprep.mubr.msk.bf16.mxu1 %vm7429_vm1, %v10435_v50 }
 0x1d8   : > { %v8432_v42 = vadd.f32 %v1392_v44, %v1079_v14  ;;  %6811 = vmatprep.mubr.msk.bf16.mxu0 %vm7429_vm1, %v10435_v50  ;;  %v6455_v23 = vpop.f32.mrf.mxu1  ;;  %v2951_v14 = vrot.slane %v7275_v7, 2  ;;  %v2459_v44 = vrot.slane %v7319_v63, 2  ;;  %v7277_v63 = vld [vmem:[%s7529_s9 + $0x40] sm:$0xff]  }
 0x1d9   : > { %v6537_v30 = vpop.f32.mrf.mxu0 }
 0x1da   : > { %v1089_v54 = vpop.f32.mrf.mxu1  ;;  %v2952_v40 = vsel %vm2449_vm6, %v2949_v49, %v2951_v14 }
 0x1db   : > { %v1395_v57 = vpop.f32.mrf.mxu0 }
 0x1dc   : > { %v6456_v6 = vpop.f32.mrf.mxu1 }
 0x1dd   : > { %v6538_v20 = vpop.f32.mrf.mxu0 }
 0x1de   : > { %v1734_v17 = vpop.f32.mrf.mxu1  ;;  %6730 = vmatmul.mubr.msk.bf16.gmra.mxu1 %vm575_vm3, %v2458_v45  ;;  %v2953_v20 = vrot.slane %v7276_v26, 2 }
 0x1df   : > { %v1400_v0 = vpop.f32.mrf.mxu0  ;;  %6812 = vmatmul.mubr.msk.bf16.gmra.mxu0 %vm575_vm3, %v2950_v61  ;;  %6733 = vmatprep.mubr.msk.bf16.mxu1 %vm7429_vm1, %v10435_v50  ;;  %v2460_v61 = vsel %vm2449_vm6, %v2457_v19, %v2459_v44 }
 0x1e0   : > { %6815 = vmatprep.mubr.msk.bf16.mxu0 %vm7429_vm1, %v10435_v50  ;;  %v6547_v25 = vpop.f32.mrf.mxu1  ;;  %v2461_v0 = vrot.slane %v8065_v62, 2  ;;  %v2955_v62 = vrot.slane %v7277_v63, 2 }
 0x1e1   : > { %v6541_v11 = vpop.f32.mrf.mxu0 }
 0x1e2   : > { %v1737_v23 = vpop.f32.mrf.mxu1  ;;  %v2954_v11 = vsel %vm2449_vm6, %v2951_v14, %v2953_v20  ;;  %v2462_v26 = vsel %vm2449_vm6, %v2459_v44, %v2461_v0 }
 0x1e3   : > { %v1403_v30 = vpop.f32.mrf.mxu0 }
 0x1e4   : > { %v6548_v7 = vpop.f32.mrf.mxu1 }
 0x1e5   : > { %v6542_v57 = vpop.f32.mrf.mxu0 }
 0x1e6   : > { %v1742_v45 = vpop.f32.mrf.mxu1  ;;  %6734 = vmatmul.mubr.msk.bf16.gmra.mxu1 %vm575_vm3, %v2460_v61 }
 0x1e7   : > { %v2236_v54 = vpop.f32.mrf.mxu0  ;;  %6816 = vmatmul.mubr.msk.bf16.gmra.mxu0 %vm575_vm3, %v2952_v40  ;;  %v1902_v49 = vadd.f32 %v1742_v45, %v8083_v13  ;;  %6737 = vmatprep.mubr.msk.bf16.mxu1 %vm7429_vm1, %v10435_v50 }
 0x1e8   : > { %6819 = vmatprep.mubr.msk.bf16.mxu0 %vm7429_vm1, %v10435_v50  ;;  %v6551_v19 = vpop.f32.mrf.mxu1 }
 0x1e9   : > { %v6633_v6 = vpop.f32.mrf.mxu0 }
 0x1ea   : > { %v1745_v25 = vpop.f32.mrf.mxu1  ;;  %v2956_v6 = vsel %vm2449_vm6, %v2953_v20, %v2955_v62 }
 0x1eb   : > { %v2239_v17 = vpop.f32.mrf.mxu0  ;;  %v1903_v40 = vadd.f32 %v1745_v25, %v8094_v8  ;;  %v2463_v8 = vrot.slane %v8080_v48, 2 }
 0x1ec   : > { %v6552_v23 = vpop.f32.mrf.mxu1 }
 0x1ed   : > { %v6634_v30 = vpop.f32.mrf.mxu0  ;;  %v2464_v63 = vsel %vm2449_vm6, %v2461_v0, %v2463_v8 }
 0x1ee   : > { %v1750_v61 = vpop.f32.mrf.mxu1  ;;  %6738 = vmatmul.mubr.msk.bf16.gmra.mxu1 %vm575_vm3, %v2462_v26 }
 0x1ef   : > { %v2244_v57 = vpop.f32.mrf.mxu0  ;;  %6820 = vmatmul.mubr.msk.bf16.gmra.mxu0 %vm575_vm3, %v2954_v11  ;;  %v1904_v7 = vadd.f32 %v1750_v61, %v8103_v29  ;;  %6741 = vmatprep.mubr.msk.bf16.mxu1 %vm7429_vm1, %v10435_v50 }
 0x1f0   : > { %v8466_v13 = vadd.f32 %v2244_v57, %v1902_v49  ;;  %6823 = vmatprep.mubr.msk.bf16.mxu0 %vm7429_vm1, %v10435_v50  ;;  %v6555_v44 = vpop.f32.mrf.mxu1  ;;  %v7278_v49 = vld [vmem:[%s7529_s9 + $0x48] sm:$0xff]  }
 0x1f1   : > { %v6637_v14 = vpop.f32.mrf.mxu0  ;;  %v2957_v48 = vrot.slane %v7278_v49, 2 }
 0x1f2   : > { %v1753_v19 = vpop.f32.mrf.mxu1  ;;  %v7279_v14 = vld [vmem:[%s7529_s9 + $0x50] sm:$0xff]  }
 0x1f3   : > { %v2247_v54 = vpop.f32.mrf.mxu0  ;;  %v1905_v11 = vadd.f32 %v1753_v19, %v8114_v27  ;;  %v2465_v27 = vrot.slane %v8100_v28, 2  ;;  %v2958_v61 = vsel %vm2449_vm6, %v2955_v62, %v2957_v48  ;;  %v2959_v28 = vrot.slane %v7279_v14, 2 }
 0x1f4   : > { %v8475_v45 = vadd.f32 %v2247_v54, %v1903_v40  ;;  %v6556_v25 = vpop.f32.mrf.mxu1 }
 0x1f5   : > { %v6638_v17 = vpop.f32.mrf.mxu0 }
 0x1f6   : > { %v1758_v40 = vpop.f32.mrf.mxu1  ;;  %6742 = vmatmul.mubr.msk.bf16.gmra.mxu1 %vm575_vm3, %v2464_v63 }
 0x1f7   : > { %v2252_v29 = vpop.f32.mrf.mxu0  ;;  %6824 = vmatmul.mubr.msk.bf16.gmra.mxu0 %vm575_vm3, %v2956_v6  ;;  %v1906_v26 = vadd.f32 %v1758_v40, %v8123_v39  ;;  %6745 = vmatprep.mubr.msk.bf16.mxu1 %vm7429_vm1, %v10435_v50  ;;  %v2466_v6 = vsel %vm2449_vm6, %v2463_v8, %v2465_v27  ;;  %v7280_v40 = vld [vmem:[%s7529_s9 + $0x58] sm:$0xff]  }
 0x1f8   : > { %v8482_v30 = vadd.f32 %v2252_v29, %v1904_v7  ;;  %6827 = vmatprep.mubr.msk.bf16.mxu0 %vm7429_vm1, %v10435_v50  ;;  %v6559_v0 = vpop.f32.mrf.mxu1  ;;  %v2960_v29 = vsel %vm2449_vm6, %v2957_v48, %v2959_v28 }
 0x1f9   : > { %v6641_v20 = vpop.f32.mrf.mxu0 }
 0x1fa   : > { %v1761_v7 = vpop.f32.mrf.mxu1 }
 0x1fb   : > { %v2255_v23 = vpop.f32.mrf.mxu0  ;;  %v1907_v54 = vadd.f32 %v1761_v7, %v8134_v16  ;;  %v2467_v16 = vrot.slane %v8120_v41, 2  ;;  %v2961_v41 = vrot.slane %v7280_v40, 2 }
 0x1fc   : > { %v8491_v57 = vadd.f32 %v2255_v23, %v1905_v11  ;;  %v6560_v49 = vpop.f32.mrf.mxu1 }
 0x1fd   : > { %v6642_v44 = vpop.f32.mrf.mxu0  ;;  %v2468_v23 = vsel %vm2449_vm6, %v2465_v27, %v2467_v16  ;;  %v2962_v49 = vsel %vm2449_vm6, %v2959_v28, %v2961_v41 }
 0x1fe   : > { %v1766_v17 = vpop.f32.mrf.mxu1  ;;  %6746 = vmatmul.mubr.msk.bf16.gmra.mxu1 %vm575_vm3, %v2466_v6 }
 0x1ff   : > { %v2260_v39 = vpop.f32.mrf.mxu0  ;;  %6828 = vmatmul.mubr.msk.bf16.gmra.mxu0 %vm575_vm3, %v2958_v61  ;;  %v1908_v11 = vadd.f32 %v1766_v17, %v8143_v18  ;;  %6749 = vmatprep.mubr.msk.bf16.mxu1 %vm7429_vm1, %v10435_v50 }
 0x200   : > { %v8498_v19 = vadd.f32 %v2260_v39, %v1906_v26  ;;  %6831 = vmatprep.mubr.msk.bf16.mxu0 %vm7429_vm1, %v10435_v50  ;;  %v6563_v8 = vpop.f32.mrf.mxu1  ;;  %v7281_v39 = vld [vmem:[%s7529_s9 + $0x60] sm:$0xff]  }
 0x201   : > { %v6645_v62 = vpop.f32.mrf.mxu0 }
 0x202   : > { %v1769_v20 = vpop.f32.mrf.mxu1 }
 0x203   : > { %v2263_v63 = vpop.f32.mrf.mxu0  ;;  %v1909_v0 = vadd.f32 %v1769_v20, %v8154_v3  ;;  %v2469_v3 = vrot.slane %v8140_v51, 2  ;;  %v2963_v51 = vrot.slane %v7281_v39, 2  ;;  %v10442_v39 = vld [vmem:[#allocation10_spill] sm:$0xff] }
 0x204   : > { %v8507_v25 = vadd.f32 %v2263_v63, %v1907_v54  ;;  %v6564_v61 = vpop.f32.mrf.mxu1 }
 0x205   : > { %v6646_v26 = vpop.f32.mrf.mxu0  ;;  %v2470_v8 = vsel %vm2449_vm6, %v2467_v16, %v2469_v3  ;;  %v7282_v61 = vld [vmem:[%s7529_s9 + $0x68] sm:$0xff]  }
 0x206   : > { %v1774_v7 = vpop.f32.mrf.mxu1  ;;  %6750 = vmatmul.mubr.msk.bf16.gmra.mxu1 %vm575_vm3, %v2468_v23  ;;  %v2964_v23 = vsel %vm2449_vm6, %v2961_v41, %v2963_v51 }
 0x207   : > { %v2268_v18 = vpop.f32.mrf.mxu0  ;;  %6832 = vmatmul.mubr.msk.bf16.gmra.mxu0 %vm575_vm3, %v2960_v29  ;;  %v1910_v44 = vadd.f32 %v1774_v7, %v8163_v32  ;;  %6753 = vmatprep.mubr.msk.bf16.mxu1 %vm7429_vm1, %v10435_v50 }
 0x208   : > { %v8514_v14 = vadd.f32 %v2268_v18, %v1908_v11  ;;  %6835 = vmatprep.mubr.msk.bf16.mxu0 %vm7429_vm1, %v10435_v50  ;;  %v6567_v27 = vpop.f32.mrf.mxu1 }
 0x209   : > { %v6649_v48 = vpop.f32.mrf.mxu0 }
 0x20a   : > { %v1777_v17 = vpop.f32.mrf.mxu1 }
 0x20b   : > { %v2271_v54 = vpop.f32.mrf.mxu0  ;;  %v1911_v11 = vadd.f32 %v1777_v17, %v8174_v24  ;;  %v2471_v24 = vrot.slane %v8160_v47, 2  ;;  %v2965_v47 = vrot.slane %v7282_v61, 2 }
 0x20c   : > { %v8523_v6 = vadd.f32 %v2271_v54, %v1909_v0  ;;  %v6568_v63 = vpop.f32.mrf.mxu1 }
 0x20d   : > { %v6650_v62 = vpop.f32.mrf.mxu0  ;;  %v2966_v63 = vsel %vm2449_vm6, %v2963_v51, %v2965_v47 }
 0x20e   : > { %v1782_v40 = vpop.f32.mrf.mxu1  ;;  %6754 = vmatmul.mubr.msk.bf16.gmra.mxu1 %vm575_vm3, %v2470_v8 }
 0x20f   : > { %v2276_v32 = vpop.f32.mrf.mxu0  ;;  %6836 = vmatmul.mubr.msk.bf16.gmra.mxu0 %vm575_vm3, %v2962_v49  ;;  %v1912_v20 = vadd.f32 %v1782_v40, %v8183_v60  ;;  %6757 = vmatprep.mubr.msk.bf16.mxu1 %vm7429_vm1, %v10435_v50 }
 0x210   : > { %v8530_v29 = vadd.f32 %v2276_v32, %v1910_v44  ;;  %6839 = vmatprep.mubr.msk.bf16.mxu0 %vm7429_vm1, %v10435_v50  ;;  %v6571_v16 = vpop.f32.mrf.mxu1  ;;  %v2472_v44 = vsel %vm2449_vm6, %v2469_v3, %v2471_v24  ;;  %v7283_v32 = vld [vmem:[%s7529_s9 + $0x70] sm:$0xff]  }
 0x211   : > { %v6653_v28 = vpop.f32.mrf.mxu0 }
 0x212   : > { %v1785_v18 = vpop.f32.mrf.mxu1 }
 0x213   : > { %v2279_v26 = vpop.f32.mrf.mxu0  ;;  %v1913_v48 = vadd.f32 %v1785_v18, %v8194_v2  ;;  %v10443_v2 = vld [vmem:[#allocation8_spill] sm:$0xff]  ;;  %v2967_v18 = vrot.slane %v7283_v32, 2 }
 0x214   : > { %v8539_v0 = vadd.f32 %v2279_v26, %v1911_v11  ;;  %v6572_v27 = vpop.f32.mrf.mxu1  ;;  %v2473_v3 = vrot.slane %v10443_v2, 2 }
 0x215   : > { %v6654_v7 = vpop.f32.mrf.mxu0 }
 0x216   : > { %v1790_v49 = vpop.f32.mrf.mxu1  ;;  %6758 = vmatmul.mubr.msk.bf16.gmra.mxu1 %vm575_vm3, %v2472_v44  ;;  %v2474_v16 = vsel %vm2449_vm6, %v2471_v24, %v2473_v3 }
 0x217   : > { %v2284_v60 = vpop.f32.mrf.mxu0  ;;  %6840 = vmatmul.mubr.msk.bf16.gmra.mxu0 %vm575_vm3, %v2964_v23  ;;  %v1914_v17 = vadd.f32 %v1790_v49, %v10442_v39  ;;  %6761 = vmatprep.mubr.msk.bf16.mxu1 %vm7429_vm1, %v10435_v50  ;;  %v2968_v49 = vsel %vm2449_vm6, %v2965_v47, %v2967_v18 }
 0x218   : > { %v8546_v54 = vadd.f32 %v2284_v60, %v1912_v20  ;;  %6843 = vmatprep.mubr.msk.bf16.mxu0 %vm7429_vm1, %v10435_v50  ;;  %v6575_v62 = vpop.f32.mrf.mxu1 }
 0x219   : > { %v6657_v41 = vpop.f32.mrf.mxu0 }
 0x21a   : > { %v1793_v40 = vpop.f32.mrf.mxu1  ;;  %v7284_v41 = vld [vmem:[%s7529_s9 + $0x78] sm:$0xff]  }
 0x21b   : > { %v2287_v11 = vpop.f32.mrf.mxu0  ;;  %v1915_v20 = vadd.f32 %v1793_v40, %v8214_v59  ;;  %v10444_v59 = vld [vmem:[#allocation9_spill] sm:$0xff]  ;;  %v2969_v32 = vrot.slane %v7284_v41, 2 }
 0x21c   : > { %v8555_v8 = vadd.f32 %v2287_v11, %v1913_v48  ;;  %v6576_v26 = vpop.f32.mrf.mxu1  ;;  %v2475_v24 = vrot.slane %v10444_v59, 2 }
 0x21d   : > { %v6658_v28 = vpop.f32.mrf.mxu0 }
 0x21e   : > { %v1798_v7 = vpop.f32.mrf.mxu1  ;;  %6762 = vmatmul.mubr.msk.bf16.gmra.mxu1 %vm575_vm3, %v2474_v16  ;;  %v2476_v62 = vsel %vm2449_vm6, %v2473_v3, %v2475_v24 }
 0x21f   : > { %v2292_v23 = vpop.f32.mrf.mxu0  ;;  %6844 = vmatmul.mubr.msk.bf16.gmra.mxu0 %vm575_vm3, %v2966_v63  ;;  %v1916_v48 = vadd.f32 %v1798_v7, %v8223_v55  ;;  %6765 = vmatprep.mubr.msk.bf16.mxu1 %vm7429_vm1, %v10435_v50  ;;  %v7285_v7 = vld [vmem:[%s7529_s9 + $0x80] sm:$0xff]  }
 0x220   : > { %v8562_v61 = vadd.f32 %v2292_v23, %v1914_v17  ;;  %6847 = vmatprep.mubr.msk.bf16.mxu0 %vm7429_vm1, %v10435_v50  ;;  %v6579_v44 = vpop.f32.mrf.mxu1  ;;  %v2970_v23 = vsel %vm2449_vm6, %v2967_v18, %v2969_v32  ;;  %v2971_v41 = vrot.slane %v7285_v7, 2 }
 0x221   : > { %v6661_v51 = vpop.f32.mrf.mxu0 }
 0x222   : > { %v1801_v39 = vpop.f32.mrf.mxu1 }
 0x223   : > { %v2295_v27 = vpop.f32.mrf.mxu0  ;;  %v1917_v2 = vadd.f32 %v1801_v39, %v8234_v43  ;;  %v10445_v43 = vld [vmem:[#allocation11_spill] sm:$0xff] }
 0x224   : > { %v8571_v60 = vadd.f32 %v2295_v27, %v1915_v20  ;;  %v6580_v11 = vpop.f32.mrf.mxu1  ;;  %v2477_v3 = vrot.slane %v10445_v43, 2 }
 0x225   : > { %v6662_v17 = vpop.f32.mrf.mxu0 }
 0x226   : > { %v1806_v40 = vpop.f32.mrf.mxu1  ;;  %6766 = vmatmul.mubr.msk.bf16.gmra.mxu1 %vm575_vm3, %v2476_v62  ;;  %v2478_v44 = vsel %vm2449_vm6, %v2475_v24, %v2477_v3 }
 0x227   : > { %v2300_v55 = vpop.f32.mrf.mxu0  ;;  %6848 = vmatmul.mubr.msk.bf16.gmra.mxu0 %vm575_vm3, %v2968_v49  ;;  %v1918_v28 = vadd.f32 %v1806_v40, %v8243_v10  ;;  %6769 = vmatprep.mubr.msk.bf16.mxu1 %vm7429_vm1, %v10435_v50  ;;  %v7286_v40 = vld [vmem:[%s7529_s9 + $0x88] sm:$0xff]  }
 0x228   : > { %v8578_v63 = vadd.f32 %v2300_v55, %v1916_v48  ;;  %6851 = vmatprep.mubr.msk.bf16.mxu0 %vm7429_vm1, %v10435_v50  ;;  %v6583_v20 = vpop.f32.mrf.mxu1  ;;  %v2972_v55 = vsel %vm2449_vm6, %v2969_v32, %v2971_v41  ;;  %v2973_v7 = vrot.slane %v7286_v40, 2 }
 0x229   : > { %v6665_v47 = vpop.f32.mrf.mxu0 }
 0x22a   : > { %v1809_v51 = vpop.f32.mrf.mxu1 }
 0x22b   : > { %v2303_v16 = vpop.f32.mrf.mxu0  ;;  %v1919_v59 = vadd.f32 %v1809_v51, %v8254_v21  ;;  %v10446_v21 = vld [vmem:[#allocation12_spill] sm:$0xff] }
 0x22c   : > { %v8587_v26 = vadd.f32 %v2303_v16, %v1917_v2  ;;  %v6584_v27 = vpop.f32.mrf.mxu1  ;;  %v2479_v24 = vrot.slane %v10446_v21, 2 }
 0x22d   : > { %v6666_v48 = vpop.f32.mrf.mxu0 }
 0x22e   : > { %v1814_v39 = vpop.f32.mrf.mxu1  ;;  %6770 = vmatmul.mubr.msk.bf16.gmra.mxu1 %vm575_vm3, %v2478_v44  ;;  %v2480_v20 = vsel %vm2449_vm6, %v2477_v3, %v2479_v24 }
 0x22f   : > { %v2308_v10 = vpop.f32.mrf.mxu0  ;;  %6852 = vmatmul.mubr.msk.bf16.gmra.mxu0 %vm575_vm3, %v2970_v23  ;;  %v1920_v17 = vadd.f32 %v1814_v39, %v8263_v5  ;;  %6773 = vmatprep.mubr.msk.bf16.mxu1 %vm7429_vm1, %v10435_v50  ;;  %v7287_v39 = vld [vmem:[%s7529_s9 + $0x90] sm:$0xff]  }
 0x230   : > { %v8594_v49 = vadd.f32 %v2308_v10, %v1918_v28  ;;  %6855 = vmatprep.mubr.msk.bf16.mxu0 %vm7429_vm1, %v10435_v50  ;;  %v6587_v2 = vpop.f32.mrf.mxu1  ;;  %v2974_v10 = vsel %vm2449_vm6, %v2971_v41, %v2973_v7  ;;  %v2975_v40 = vrot.slane %v7287_v39, 2 }
 0x231   : > { %v6669_v18 = vpop.f32.mrf.mxu0 }
 0x232   : > { %v1817_v47 = vpop.f32.mrf.mxu1 }
 0x233   : > { %v2311_v62 = vpop.f32.mrf.mxu0  ;;  %v1921_v43 = vadd.f32 %v1817_v47, %v8274_v9  ;;  %v10447_v9 = vld [vmem:[#allocation13_spill] sm:$0xff] }
 0x234   : > { %v8603_v11 = vadd.f32 %v2311_v62, %v1919_v59  ;;  %v6588_v16 = vpop.f32.mrf.mxu1  ;;  %v2481_v3 = vrot.slane %v10447_v9, 2 }
 0x235   : > { %v6670_v28 = vpop.f32.mrf.mxu0 }
 0x236   : > { %v1822_v51 = vpop.f32.mrf.mxu1  ;;  %6774 = vmatmul.mubr.msk.bf16.gmra.mxu1 %vm575_vm3, %v2480_v20  ;;  %v2482_v2 = vsel %vm2449_vm6, %v2479_v24, %v2481_v3 }
 0x237   : > { %v2316_v5 = vpop.f32.mrf.mxu0  ;;  %6856 = vmatmul.mubr.msk.bf16.gmra.mxu0 %vm575_vm3, %v2972_v55  ;;  %v1922_v48 = vadd.f32 %v1822_v51, %v8283_v58  ;;  %6777 = vmatprep.mubr.msk.bf16.mxu1 %vm7429_vm1, %v10435_v50  ;;  %v7288_v51 = vld [vmem:[%s7529_s9 + $0x98] sm:$0xff]  }
 0x238   : > { %v8610_v23 = vadd.f32 %v2316_v5, %v1920_v17  ;;  %6859 = vmatprep.mubr.msk.bf16.mxu0 %vm7429_vm1, %v10435_v50  ;;  %v6591_v59 = vpop.f32.mrf.mxu1  ;;  %v2976_v5 = vsel %vm2449_vm6, %v2973_v7, %v2975_v40  ;;  %v2977_v39 = vrot.slane %v7288_v51, 2 }
 0x239   : > { %v6673_v32 = vpop.f32.mrf.mxu0 }
 0x23a   : > { %v1825_v18 = vpop.f32.mrf.mxu1 }
 0x23b   : > { %v2319_v44 = vpop.f32.mrf.mxu0  ;;  %v1923_v21 = vadd.f32 %v1825_v18, %v8294_v34  ;;  %v10448_v34 = vld [vmem:[#allocation14_spill] sm:$0xff] }
 0x23c   : > { %v8619_v27 = vadd.f32 %v2319_v44, %v1921_v43  ;;  %v6592_v62 = vpop.f32.mrf.mxu1  ;;  %v2483_v24 = vrot.slane %v10448_v34, 2 }
 0x23d   : > { %v6674_v17 = vpop.f32.mrf.mxu0 }
 0x23e   : > { %v1830_v47 = vpop.f32.mrf.mxu1  ;;  %6778 = vmatmul.mubr.msk.bf16.gmra.mxu1 %vm575_vm3, %v2482_v2  ;;  %v2484_v59 = vsel %vm2449_vm6, %v2481_v3, %v2483_v24  ;;  %v10449_v17 = vld [vmem:[#allocation16_spill] sm:$0xff] }
 0x23f   : > { %v2324_v58 = vpop.f32.mrf.mxu0  ;;  %6860 = vmatmul.mubr.msk.bf16.gmra.mxu0 %vm575_vm3, %v2974_v10  ;;  %v1924_v28 = vadd.f32 %v1830_v47, %v8303_v1  ;;  %6781 = vmatprep.mubr.msk.bf16.mxu1 %vm7429_vm1, %v10435_v50  ;;  %v2978_v47 = vsel %vm2449_vm6, %v2975_v40, %v2977_v39 }
 0x240   : > { %v8626_v55 = vadd.f32 %v2324_v58, %v1922_v48  ;;  %6863 = vmatprep.mubr.msk.bf16.mxu0 %vm7429_vm1, %v10435_v50  ;;  %v6595_v43 = vpop.f32.mrf.mxu1 }
 0x241   : > { %v6677_v41 = vpop.f32.mrf.mxu0 }
 0x242   : > { %v1833_v32 = vpop.f32.mrf.mxu1  ;;  %v7289_v41 = vld [vmem:[%s7529_s9 + $0xa0] sm:$0xff]  }
 0x243   : > { %v2327_v20 = vpop.f32.mrf.mxu0  ;;  %v1925_v9 = vadd.f32 %v1833_v32, %v8314_v15  ;;  %v10450_v15 = vld [vmem:[#allocation15_spill] sm:$0xff] }
 0x244   : > { %v8635_v16 = vadd.f32 %v2327_v20, %v1923_v21  ;;  %v6596_v44 = vpop.f32.mrf.mxu1  ;;  %v2485_v3 = vrot.slane %v10450_v15, 2 }
 0x245   : > { %v6678_v48 = vpop.f32.mrf.mxu0 }
 0x246   : > { %v1838_v18 = vpop.f32.mrf.mxu1  ;;  %6782 = vmatmul.mubr.msk.bf16.gmra.mxu1 %vm575_vm3, %v2484_v59  ;;  %v2486_v20 = vsel %vm2449_vm6, %v2483_v24, %v2485_v3  ;;  %v2979_v48 = vrot.slane %v7289_v41, 2 }
 0x247   : > { %v2332_v1 = vpop.f32.mrf.mxu0  ;;  %6864 = vmatmul.mubr.msk.bf16.gmra.mxu0 %vm575_vm3, %v2976_v5  ;;  %v1926_v21 = vadd.f32 %v1838_v18, %v10449_v17  ;;  %6785 = vmatprep.mubr.msk.bf16.mxu1 %vm7429_vm1, %v10435_v50 }
 0x248   : > { %v8642_v10 = vadd.f32 %v2332_v1, %v1924_v28  ;;  %6867 = vmatprep.mubr.msk.bf16.mxu0 %vm7429_vm1, %v10435_v50  ;;  %v6599_v2 = vpop.f32.mrf.mxu1  ;;  %v2980_v18 = vsel %vm2449_vm6, %v2977_v39, %v2979_v48 }
 0x249   : > { %v6681_v7 = vpop.f32.mrf.mxu0 }
 0x24a   : > { %v1841_v28 = vpop.f32.mrf.mxu1  ;;  %v7290_v7 = vld [vmem:[%s7529_s9 + $0xa8] sm:$0xff]  }
 0x24b   : > { %v2335_v62 = vpop.f32.mrf.mxu0  ;;  %v1927_v43 = vadd.f32 %v1841_v28, %v8334_v35  ;;  %v2487_v35 = vrot.slane %v8320_v31, 2  ;;  %v2981_v39 = vrot.slane %v7290_v7, 2  ;;  %v3292_v28 = vld [vmem:[%s7529_s9 + $0x10] sm:$0xc] }
 0x24c   : > { %v8651_v58 = vadd.f32 %v2335_v62, %v1925_v9  ;;  %v6600_v5 = vpop.f32.mrf.mxu1 }
 0x24d   : > { %v6682_v34 = vpop.f32.mrf.mxu0 }
 0x24e   : > { %v1846_v9 = vpop.f32.mrf.mxu1  ;;  %6786 = vmatmul.mubr.msk.bf16.gmra.mxu1 %vm575_vm3, %v2486_v20  ;;  %v8685_v34 = vld [vmem:[%s7529_s9 + $0x14] sm:$0xf] }
 0x24f   : > { %v2340_v51 = vpop.f32.mrf.mxu0  ;;  %6868 = vmatmul.mubr.msk.bf16.gmra.mxu0 %vm575_vm3, %v2978_v47  ;;  %v1928_v59 = vadd.f32 %v1846_v9, %v8344_v52  ;;  %6789 = vmatprep.mubr.msk.bf16.mxu1 %vm7429_vm1, %v10435_v50  ;;  %v2488_v52 = vsel %vm2449_vm6, %v2485_v3, %v2487_v35  ;;  %v2489_v3 = vrot.slane %v8338_v12, 2  ;;  %v8691_v9 = vld [vmem:[%s7529_s9 + $0xb0] ss:$0 sps:$4 sm:$0xff]   ;;  %v8697_v12 = vld [vmem:[%s7529_s9 + $0x18] sm:$0xff]  }
 0x250   : > { %v8658_v32 = vadd.f32 %v2340_v51, %v1926_v21  ;;  %6871 = vmatprep.mubr.msk.bf16.mxu0 %vm7429_vm1, %v10435_v50  ;;  %v6603_v24 = vpop.f32.mrf.mxu1  ;;  %v2982_v51 = vsel %vm2449_vm6, %v2979_v48, %v2981_v39  ;;  %v2983_v48 = vrot.slane %v8691_v9, 2 }
 0x251   : > { %v6685_v40 = vpop.f32.mrf.mxu0 }
 0x252   : > { %v1849_v17 = vpop.f32.mrf.mxu1 }
 0x253   : > { %v2343_v44 = vpop.f32.mrf.mxu0  ;;  %v1929_v15 = vadd.f32 %v1849_v17, %v8354_v46 }
 0x254   : > { %v8667_v1 = vadd.f32 %v2343_v44, %v1927_v43  ;;  %v6604_v2 = vpop.f32.mrf.mxu1  ;;  %v2490_v44 = vsel %vm2449_vm6, %v2487_v35, %v2489_v3 }
 0x255   : > { %v6686_v21 = vpop.f32.mrf.mxu0  ;;  %v3451_v2 = vshrl.u32 %v8697_v12, 16 }
 0x256   : > { %v1854_v47 = vpop.f32.mrf.mxu1  ;;  %6790 = vmatmul.mubr.msk.bf16.gmra.mxu1 %vm575_vm3, %v2488_v52 }
 0x257   : > { %v2348_v62 = vpop.f32.mrf.mxu0  ;;  %6872 = vmatmul.mubr.msk.bf16.gmra.mxu0 %vm575_vm3, %v2980_v18  ;;  %v1930_v46 = vadd.f32 %v1854_v47, %v8360_v36  ;;  %6793 = vmatprep.mubr.msk.bf16.mxu1 %vm7429_vm1, %v10435_v50  ;;  %v6004_v36 = vcombine.low %v3292_v28, %v8685_v34  ;;  %v2984_v28 = vsel %vm2449_vm6, %v2981_v39, %v2983_v48 }
 0x258   : > { %v8674_v31 = vadd.f32 %v2348_v62, %v1928_v59  ;;  %6875 = vmatprep.mubr.msk.bf16.mxu0 %vm7429_vm1, %v10435_v50  ;;  %v6607_v43 = vpop.f32.mrf.mxu1  ;;  %v3454_v62 = vshll.u32 %v8697_v12, 16 }
 0x259   : > { %v6689_v41 = vpop.f32.mrf.mxu0  ;;  %v3446_v52 = vshll.u32 %v6004_v36, 16 }
 0x25a   : > { %v1857_v40 = vpop.f32.mrf.mxu1 }
 0x25b   : > { %v2351_v20 = vpop.f32.mrf.mxu0  ;;  %v1931_v24 = vadd.f32 %v1857_v40, %v8369_v37  ;;  %v3443_v37 = vshrl.u32 %v6004_v36, 16  ;;  %v3448_v9 = vrot.slane %v3446_v52, 3  ;;  %v3453_v40 = vrot.slane %v3451_v2, 2  ;;  %v8716_v36 = vld [vmem:[%s7529_s9 + $0x20] sm:$0xff]  }
 0x25c   : > { %v8687_v5 = vadd.f32 %v2351_v20, %v1929_v15  ;;  %v6608_v18 = vpop.f32.mrf.mxu1  ;;  %v3460_v52 = vshrl.u32 %v8716_v36, 16 }
 0x25d   : > { %v6690_v59 = vpop.f32.mrf.mxu0 }
 0x25e   : > { %v1862_v21 = vpop.f32.mrf.mxu1  ;;  %6794 = vmatmul.mubr.msk.bf16.gmra.mxu1 %vm575_vm3, %v2490_v44  ;;  %v3456_v59 = vrot.slane %v3454_v62, 3 }
 0x25f   : > { %v2356_v7 = vpop.f32.mrf.mxu0  ;;  %6876 = vmatmul.mubr.msk.bf16.gmra.mxu0 %vm575_vm3, %v2982_v51  ;;  %v1932_v35 = vadd.f32 %v1862_v21, %v8375_v56  ;;  %6797 = vmatprep.mubr.msk.bf16.mxu1 %vm7429_vm1, %v10435_v50  ;;  %v3445_v51 = vrot.slane %v3443_v37, 2 }
 0x260   : > { %v8700_v17 = vadd.f32 %v2356_v7, %v1930_v46  ;;  %6879 = vmatprep.mubr.msk.bf16.mxu0 %vm7429_vm1, %v10435_v50  ;;  %v6611_v47 = vpop.f32.mrf.mxu1  ;;  %v3457_v37 = vor.u32 %v3456_v59, %v3453_v40 }
 0x261   : > { %v6693_v15 = vpop.f32.mrf.mxu0  ;;  %v3449_v21 = vor.u32 %v3448_v9, %v3445_v51  ;;  %v8736_v9 = vld [vmem:[%s7529_s9 + $0x28] sm:$0xff]  }
 0x262   : > { %v1865_v43 = vpop.f32.mrf.mxu1  ;;  %v3937_v15 = vld [vmem:[%s7529_s9 + $0x10] sm:$0x8] }
 0x263   : > { %v2359_v41 = vpop.f32.mrf.mxu0  ;;  %v1933_v56 = vadd.f32 %v1865_v43, %v8384_v4  ;;  %v3458_v43 = vsel %vm3441_vm7, %v3449_v21, %v3457_v37  ;;  %v3472_v21 = vshll.u32 %v8736_v9, 16 }
 0x264   : > { %v8711_v46 = vadd.f32 %v2359_v41, %v1931_v24  ;;  %v6612_v44 = vpop.f32.mrf.mxu1 }
 0x265   : > { %v6694_v20 = vpop.f32.mrf.mxu0 }
 0x266   : > { %v1870_v39 = vpop.f32.mrf.mxu1  ;;  %6798 = vmatmul.mubr.msk.bf16.gmra.mxu1 %vm575_vm3, %v2489_v3  ;;  %v6047_v3 = vcombine.low %v3937_v15, %v8685_v34  ;;  %v3462_v20 = vrot.slane %v3460_v52, 2 }
 0x267   : > { %v2364_v18 = vpop.f32.mrf.mxu0  ;;  %6880 = vmatmul.mubr.msk.bf16.gmra.mxu0 %vm575_vm3, %v2984_v28  ;;  %v1934_v4 = vadd.f32 %v1870_v39, %v8395_v53  ;;  %6889 = vmatprep.mubr.msk.bf16.mxu1 %vm7429_vm1, %v10435_v50 }
 0x268   : > { %v8719_v7 = vadd.f32 %v2364_v18, %v1932_v35  ;;  %6883 = vmatprep.mubr.msk.bf16.mxu0 %vm7429_vm1, %v10435_v50  ;;  %v3463_v35 = vshll.u32 %v8716_v36, 16  ;;  %v6615_v2 = vpop.f32.mrf.mxu1  ;;  %v3944_v34 = vrot.slane %v6047_v3, 3 }
 0x269   : > { %v6697_v24 = vpop.f32.mrf.mxu0 }
 0x26a   : > { %v1873_v41 = vpop.f32.mrf.mxu1  ;;  %v3465_v51 = vrot.slane %v3463_v35, 3  ;;  %v3469_v24 = vshrl.u32 %v8736_v9, 16 }
 0x26b   : > { %v2367_v62 = vpop.f32.mrf.mxu0  ;;  %v1935_v53 = vadd.f32 %v1873_v41, %v8408_v38  ;;  %v3474_v41 = vrot.slane %v3472_v21, 3 }
 0x26c   : > { %v8730_v47 = vadd.f32 %v2367_v62, %v1933_v56  ;;  %v6616_v40 = vpop.f32.mrf.mxu1  ;;  %v3945_v56 = vrot.slane %v8697_v12, 3  ;;  %v3471_v3 = vrot.slane %v3469_v24, 2 }
 0x26d   : > { %v6698_v28 = vpop.f32.mrf.mxu0 }
 0x26e   : > { %v1878_v18 = vpop.f32.mrf.mxu1  ;;  %6890 = vmatmul.mubr.msk.bf16.vlgmr.msra.gmra.mxu1 %vm575_vm3, %v3458_v43  ;;  %v3946_v12 = vsel %vm3943_vm8, %v3944_v34, %v3945_v56  ;;  %v8756_v28 = vld [vmem:[%s7529_s9 + $0x30] sm:$0xff]  }
 0x26f   : > { %v2372_v59 = vpop.f32.mrf.mxu0  ;;  %6884 = vmatmul.mubr.msk.bf16.gmra.mxu0 %vm575_vm3, %v2983_v48  ;;  %v1936_v39 = vadd.f32 %v1878_v18, %v8416_v22  ;;  %6893 = vmatprep.mubr.msk.bf16.mxu1 %vm7429_vm1, %v10435_v50  ;;  %v3466_v48 = vor.u32 %v3465_v51, %v3462_v20  ;;  %v3478_v34 = vshrl.u32 %v8756_v28, 16  ;;  %v3481_v18 = vshll.u32 %v8756_v28, 16 }
 0x270   : > { %v8739_v44 = vadd.f32 %v2372_v59, %v1934_v4  ;;  %6975 = vmatprep.mubr.msk.bf16.mxu0 %vm7429_vm1, %v10435_v50  ;;  %v6619_v15 = vpop.f32.mrf.mxu1  ;;  %v3475_v59 = vor.u32 %v3474_v41, %v3471_v3 }
 0x271   : > { %v6701_v38 = vpop.f32.mrf.mxu0  ;;  %v3467_v22 = vsel %vm3441_vm7, %v3457_v37, %v3466_v48 }
 0x272   : > { %v1881_v35 = vpop.f32.mrf.mxu1 }
 0x273   : > { %v2375_v4 = vpop.f32.mrf.mxu0  ;;  %v1937_v62 = vadd.f32 %v1881_v35, %v8425_v33  ;;  %v8775_v35 = vld [vmem:[%s7529_s9 + $0x38] sm:$0xff]  }
 0x274   : > { %v8750_v52 = vadd.f32 %v2375_v4, %v1935_v53  ;;  %v6620_v43 = vpop.f32.mrf.mxu1  ;;  %v3947_v53 = vrot.slane %v8716_v36, 3  ;;  %v3476_v4 = vsel %vm3441_vm7, %v3466_v48, %v3475_v59 }
 0x275   : > { %v6702_v2 = vpop.f32.mrf.mxu0  ;;  %v3487_v43 = vshrl.u32 %v8775_v35, 16 }
 0x276   : > { %v1886_v40 = vpop.f32.mrf.mxu1  ;;  %6894 = vmatmul.mubr.msk.bf16.gmra.mxu1 %vm575_vm3, %v3467_v22  ;;  %v3948_v36 = vsel %vm3943_vm8, %v3945_v56, %v3947_v53 }
 0x277   : > { %v2380_v20 = vpop.f32.mrf.mxu0  ;;  %6976 = vmatmul.mubr.msk.bf16.vlgmr.msra.gmra.mxu0 %vm575_vm3, %v3946_v12  ;;  %v1938_v37 = vadd.f32 %v1886_v40, %v8432_v42  ;;  %6897 = vmatprep.mubr.msk.bf16.mxu1 %vm7429_vm1, %v10435_v50  ;;  %v3480_v12 = vrot.slane %v3478_v34, 2  ;;  %v3483_v42 = vrot.slane %v3481_v18, 3 }
 0x278   : > { %v8759_v51 = vadd.f32 %v2380_v20, %v1936_v39  ;;  %6979 = vmatprep.mubr.msk.bf16.mxu0 %vm7429_vm1, %v10435_v50  ;;  %v6623_v38 = vpop.f32.mrf.mxu1  ;;  %v3490_v20 = vshll.u32 %v8775_v35, 16 }
 0x279   : > { %v6705_v33 = vpop.f32.mrf.mxu0  ;;  %v3484_v41 = vor.u32 %v3483_v42, %v3480_v12  ;;  %v3489_v38 = vrot.slane %v3487_v43, 2 }
 0x27a   : > { %v1889_v21 = vpop.f32.mrf.mxu1 }
 0x27b   : > { %v2383_v39 = vpop.f32.mrf.mxu0 }
 0x27c   : > { %v8770_v24 = vadd.f32 %v2383_v39, %v1937_v62  ;;  %v6624_v2 = vpop.f32.mrf.mxu1  ;;  %v3949_v62 = vrot.slane %v8736_v9, 3  ;;  %v3485_v9 = vsel %vm3441_vm7, %v3475_v59, %v3484_v41  ;;  %v3492_v39 = vrot.slane %v3490_v20, 3 }
 0x27d   : > { %v6706_v15 = vpop.f32.mrf.mxu0 }
 0x27e   : > { %v1894_v56 = vpop.f32.mrf.mxu1  ;;  %6898 = vmatmul.mubr.msk.bf16.gmra.mxu1 %vm575_vm3, %v3476_v4  ;;  %v3951_v4 = vrot.slane %v8756_v28, 3  ;;  %v3493_v59 = vor.u32 %v3492_v39, %v3489_v38 }
 0x27f   : > { %v2388_v22 = vpop.f32.mrf.mxu0  ;;  %6980 = vmatmul.mubr.msk.bf16.gmra.mxu0 %vm575_vm3, %v3948_v36  ;;  %6901 = vmatprep.mubr.msk.bf16.mxu1 %vm7429_vm1, %v10435_v50  ;;  %v8791_v36 = vld [vmem:[%s7529_s9 + $0x40] sm:$0xff]  }
 0x280   : > { %v8778_v3 = vadd.f32 %v2388_v22, %v1938_v37  ;;  %6983 = vmatprep.mubr.msk.bf16.mxu0 %vm7429_vm1, %v10435_v50  ;;  %v6627_v40 = vpop.f32.mrf.mxu1  ;;  %v3950_v37 = vsel %vm3943_vm8, %v3947_v53, %v3949_v62  ;;  %v3496_v42 = vshrl.u32 %v8791_v36, 16  ;;  %v3499_v2 = vshll.u32 %v8791_v36, 16 }
 0x281   : > { %v6709_v48 = vpop.f32.mrf.mxu0  ;;  %v3494_v28 = vsel %vm3441_vm7, %v3484_v41, %v3493_v59 }
 0x282   : > { %v1897_v34 = vpop.f32.mrf.mxu1  ;;  %v3952_v48 = vsel %vm3943_vm8, %v3949_v62, %v3951_v4  ;;  %v3498_v40 = vrot.slane %v3496_v42, 2 }
 0x283   : > { %v2391_v33 = vpop.f32.mrf.mxu0 }
 0x284   : > { %v6628_v21 = vpop.f32.mrf.mxu1  ;;  %v3501_v33 = vrot.slane %v3499_v2, 3 }
 0x285   : > { %v6710_v18 = vpop.f32.mrf.mxu0 }
 0x286   : > { %v2591_v12 = vpop.f32.mrf.mxu1  ;;  %6902 = vmatmul.mubr.msk.bf16.gmra.mxu1 %vm575_vm3, %v3485_v9  ;;  %v3953_v9 = vrot.slane %v8775_v35, 3  ;;  %v3502_v39 = vor.u32 %v3501_v33, %v3498_v40 }
 0x287   : > { %v2396_v15 = vpop.f32.mrf.mxu0  ;;  %6984 = vmatmul.mubr.msk.bf16.gmra.mxu0 %vm575_vm3, %v3950_v37  ;;  %6905 = vmatprep.mubr.msk.bf16.mxu1 %vm7429_vm1, %v10435_v50  ;;  %v8805_v37 = vld [vmem:[%s7529_s9 + $0x48] sm:$0xff]  }
 0x288   : > { %6987 = vmatprep.mubr.msk.bf16.mxu0 %vm7429_vm1, %v10435_v50  ;;  %v6719_v22 = vpop.f32.mrf.mxu1  ;;  %v3505_v21 = vshrl.u32 %v8805_v37, 16  ;;  %v3508_v15 = vshll.u32 %v8805_v37, 16  ;;  %v3954_v42 = vsel %vm3943_vm8, %v3951_v4, %v3953_v9  ;;  %v3955_v4 = vrot.slane %v8791_v36, 3 }
 0x289   : > { %v6713_v53 = vpop.f32.mrf.mxu0 }
 0x28a   : > { %v2594_v43 = vpop.f32.mrf.mxu1  ;;  %v3956_v36 = vsel %vm3943_vm8, %v3953_v9, %v3955_v4  ;;  %v3957_v9 = vrot.slane %v8805_v37, 3 }
 0x28b   : > { %v2399_v56 = vpop.f32.mrf.mxu0  ;;  %v8821_v43 = vld [vmem:[%s7529_s9 + $0x50] sm:$0xff]  }
 0x28c   : > { %v6720_v34 = vpop.f32.mrf.mxu1  ;;  %v3503_v56 = vsel %vm3441_vm7, %v3493_v59, %v3502_v39  ;;  %v3958_v37 = vsel %vm3943_vm8, %v3955_v4, %v3957_v9  ;;  %v3959_v4 = vrot.slane %v8821_v43, 3 }
 0x28d   : > { %v6714_v20 = vpop.f32.mrf.mxu0 }
 0x28e   : > { %v2599_v38 = vpop.f32.mrf.mxu1  ;;  %6906 = vmatmul.mubr.msk.bf16.gmra.mxu1 %vm575_vm3, %v3494_v28 }
 0x28f   : > { %v3085_v18 = vpop.f32.mrf.mxu0  ;;  %6988 = vmatmul.mubr.msk.bf16.gmra.mxu0 %vm575_vm3, %v3952_v48  ;;  %v2759_v41 = vadd.f32 %v2599_v38, %v8466_v13  ;;  %6909 = vmatprep.mubr.msk.bf16.mxu1 %vm7429_vm1, %v10435_v50  ;;  %v3507_v48 = vrot.slane %v3505_v21, 2  ;;  %v3510_v13 = vrot.slane %v3508_v15, 3  ;;  %v3517_v38 = vshll.u32 %v8821_v43, 16 }
 0x290   : > { %6991 = vmatprep.mubr.msk.bf16.mxu0 %vm7429_vm1, %v10435_v50  ;;  %v6723_v12 = vpop.f32.mrf.mxu1  ;;  %v3514_v18 = vshrl.u32 %v8821_v43, 16  ;;  %v3960_v43 = vsel %vm3943_vm8, %v3957_v9, %v3959_v4 }
 0x291   : > { %v6805_v62 = vpop.f32.mrf.mxu0  ;;  %v3511_v34 = vor.u32 %v3510_v13, %v3507_v48 }
 0x292   : > { %v2602_v35 = vpop.f32.mrf.mxu1 }
 0x293   : > { %v3088_v53 = vpop.f32.mrf.mxu0  ;;  %v2760_v22 = vadd.f32 %v2602_v35, %v8475_v45  ;;  %v3519_v35 = vrot.slane %v3517_v38, 3 }
 0x294   : > { %v6724_v20 = vpop.f32.mrf.mxu1 }
 0x295   : > { %v6806_v2 = vpop.f32.mrf.mxu0 }
 0x296   : > { %v2607_v33 = vpop.f32.mrf.mxu1  ;;  %6910 = vmatmul.mubr.msk.bf16.gmra.mxu1 %vm575_vm3, %v3503_v56  ;;  %v8841_v2 = vld [vmem:[%s7529_s9 + $0x58] sm:$0xff]  }
 0x297   : > { %v3093_v28 = vpop.f32.mrf.mxu0  ;;  %6992 = vmatmul.mubr.msk.bf16.gmra.mxu0 %vm575_vm3, %v3954_v42  ;;  %v2761_v59 = vadd.f32 %v2607_v33, %v8482_v30  ;;  %6913 = vmatprep.mubr.msk.bf16.mxu1 %vm7429_vm1, %v10435_v50  ;;  %v3512_v30 = vsel %vm3441_vm7, %v3502_v39, %v3511_v34  ;;  %v3516_v42 = vrot.slane %v3514_v18, 2  ;;  %v3526_v33 = vshll.u32 %v8841_v2, 16 }
 0x298   : > { %v8824_v40 = vadd.f32 %v3093_v28, %v2759_v41  ;;  %6995 = vmatprep.mubr.msk.bf16.mxu0 %vm7429_vm1, %v10435_v50  ;;  %v6727_v62 = vpop.f32.mrf.mxu1  ;;  %v3523_v28 = vshrl.u32 %v8841_v2, 16  ;;  %v3961_v9 = vrot.slane %v8841_v2, 3 }
 0x299   : > { %v6809_v45 = vpop.f32.mrf.mxu0  ;;  %v3520_v20 = vor.u32 %v3519_v35, %v3516_v42 }
 0x29a   : > { %v2610_v15 = vpop.f32.mrf.mxu1  ;;  %v3962_v2 = vsel %vm3943_vm8, %v3959_v4, %v3961_v9 }
 0x29b   : > { %v3096_v41 = vpop.f32.mrf.mxu0  ;;  %v2762_v53 = vadd.f32 %v2610_v15, %v8491_v57  ;;  %v3528_v15 = vrot.slane %v3526_v33, 3 }
 0x29c   : > { %v8835_v21 = vadd.f32 %v3096_v41, %v2760_v22  ;;  %v6728_v56 = vpop.f32.mrf.mxu1 }
 0x29d   : > { %v6810_v12 = vpop.f32.mrf.mxu0 }
 0x29e   : > { %v2615_v22 = vpop.f32.mrf.mxu1  ;;  %6914 = vmatmul.mubr.msk.bf16.gmra.mxu1 %vm575_vm3, %v3512_v30  ;;  %v8861_v12 = vld [vmem:[%s7529_s9 + $0x60] sm:$0xff]  }
 0x29f   : > { %v3101_v48 = vpop.f32.mrf.mxu0  ;;  %6996 = vmatmul.mubr.msk.bf16.gmra.mxu0 %vm575_vm3, %v3956_v36  ;;  %v2763_v39 = vadd.f32 %v2615_v22, %v8498_v19  ;;  %6917 = vmatprep.mubr.msk.bf16.mxu1 %vm7429_vm1, %v10435_v50  ;;  %v3521_v19 = vsel %vm3441_vm7, %v3511_v34, %v3520_v20  ;;  %v3525_v36 = vrot.slane %v3523_v28, 2  ;;  %v3535_v22 = vshll.u32 %v8861_v12, 16 }
 0x2a0   : > { %v8844_v13 = vadd.f32 %v3101_v48, %v2761_v59  ;;  %6999 = vmatprep.mubr.msk.bf16.mxu0 %vm7429_vm1, %v10435_v50  ;;  %v6731_v45 = vpop.f32.mrf.mxu1  ;;  %v3532_v48 = vshrl.u32 %v8861_v12, 16  ;;  %v3963_v4 = vrot.slane %v8861_v12, 3 }
 0x2a1   : > { %v6813_v57 = vpop.f32.mrf.mxu0  ;;  %v3529_v56 = vor.u32 %v3528_v15, %v3525_v36 }
 0x2a2   : > { %v2618_v38 = vpop.f32.mrf.mxu1  ;;  %v3964_v12 = vsel %vm3943_vm8, %v3961_v9, %v3963_v4 }
 0x2a3   : > { %v3104_v59 = vpop.f32.mrf.mxu0  ;;  %v2764_v41 = vadd.f32 %v2618_v38, %v8507_v25  ;;  %v3537_v38 = vrot.slane %v3535_v22, 3 }
 0x2a4   : > { %v8855_v18 = vadd.f32 %v3104_v59, %v2762_v53  ;;  %v6732_v30 = vpop.f32.mrf.mxu1 }
 0x2a5   : > { %v6814_v62 = vpop.f32.mrf.mxu0 }
 0x2a6   : > { %v2623_v53 = vpop.f32.mrf.mxu1  ;;  %6918 = vmatmul.mubr.msk.bf16.gmra.mxu1 %vm575_vm3, %v3521_v19  ;;  %v8881_v62 = vld [vmem:[%s7529_s9 + $0x68] sm:$0xff]  }
 0x2a7   : > { %v3109_v42 = vpop.f32.mrf.mxu0  ;;  %7000 = vmatmul.mubr.msk.bf16.gmra.mxu0 %vm575_vm3, %v3958_v37  ;;  %v2765_v34 = vadd.f32 %v2623_v53, %v8514_v14  ;;  %6921 = vmatprep.mubr.msk.bf16.mxu1 %vm7429_vm1, %v10435_v50  ;;  %v3530_v14 = vsel %vm3441_vm7, %v3520_v20, %v3529_v56  ;;  %v3534_v37 = vrot.slane %v3532_v48, 2  ;;  %v3544_v53 = vshll.u32 %v8881_v62, 16 }
 0x2a8   : > { %v8864_v35 = vadd.f32 %v3109_v42, %v2763_v39  ;;  %7003 = vmatprep.mubr.msk.bf16.mxu0 %vm7429_vm1, %v10435_v50  ;;  %v6735_v57 = vpop.f32.mrf.mxu1  ;;  %v3541_v42 = vshrl.u32 %v8881_v62, 16 }
 0x2a9   : > { %v6817_v25 = vpop.f32.mrf.mxu0  ;;  %v3538_v30 = vor.u32 %v3537_v38, %v3534_v37 }
 0x2aa   : > { %v2626_v33 = vpop.f32.mrf.mxu1 }
 0x2ab   : > { %v3112_v39 = vpop.f32.mrf.mxu0  ;;  %v2766_v59 = vadd.f32 %v2626_v33, %v8523_v6  ;;  %v3546_v33 = vrot.slane %v3544_v53, 3 }
 0x2ac   : > { %v8875_v28 = vadd.f32 %v3112_v39, %v2764_v41  ;;  %v6736_v19 = vpop.f32.mrf.mxu1 }
 0x2ad   : > { %v6818_v45 = vpop.f32.mrf.mxu0 }
 0x2ae   : > { %v2631_v41 = vpop.f32.mrf.mxu1  ;;  %6922 = vmatmul.mubr.msk.bf16.gmra.mxu1 %vm575_vm3, %v3530_v14  ;;  %v8901_v45 = vld [vmem:[%s7529_s9 + $0x70] sm:$0xff]  }
 0x2af   : > { %v3117_v36 = vpop.f32.mrf.mxu0  ;;  %7004 = vmatmul.mubr.msk.bf16.gmra.mxu0 %vm575_vm3, %v3960_v43  ;;  %v2767_v20 = vadd.f32 %v2631_v41, %v8530_v29  ;;  %6925 = vmatprep.mubr.msk.bf16.mxu1 %vm7429_vm1, %v10435_v50  ;;  %v3539_v29 = vsel %vm3441_vm7, %v3529_v56, %v3538_v30  ;;  %v3543_v43 = vrot.slane %v3541_v42, 2  ;;  %v3553_v41 = vshll.u32 %v8901_v45, 16 }
 0x2b0   : > { %v8884_v15 = vadd.f32 %v3117_v36, %v2765_v34  ;;  %7007 = vmatprep.mubr.msk.bf16.mxu0 %vm7429_vm1, %v10435_v50  ;;  %v6739_v25 = vpop.f32.mrf.mxu1  ;;  %v3550_v36 = vshrl.u32 %v8901_v45, 16 }
 0x2b1   : > { %v6821_v6 = vpop.f32.mrf.mxu0  ;;  %v3547_v19 = vor.u32 %v3546_v33, %v3543_v43 }
 0x2b2   : > { %v2634_v22 = vpop.f32.mrf.mxu1 }
 0x2b3   : > { %v3120_v34 = vpop.f32.mrf.mxu0  ;;  %v2768_v39 = vadd.f32 %v2634_v22, %v8539_v0  ;;  %v3555_v22 = vrot.slane %v3553_v41, 3 }
 0x2b4   : > { %v8895_v48 = vadd.f32 %v3120_v34, %v2766_v59  ;;  %v6740_v14 = vpop.f32.mrf.mxu1 }
 0x2b5   : > { %v6822_v57 = vpop.f32.mrf.mxu0 }
 0x2b6   : > { %v2639_v59 = vpop.f32.mrf.mxu1  ;;  %6926 = vmatmul.mubr.msk.bf16.gmra.mxu1 %vm575_vm3, %v3539_v29  ;;  %v8921_v57 = vld [vmem:[%s7529_s9 + $0x78] sm:$0xff]  }
 0x2b7   : > { %v3125_v37 = vpop.f32.mrf.mxu0  ;;  %7008 = vmatmul.mubr.msk.bf16.gmra.mxu0 %vm575_vm3, %v3962_v2  ;;  %v2769_v56 = vadd.f32 %v2639_v59, %v8546_v54  ;;  %6929 = vmatprep.mubr.msk.bf16.mxu1 %vm7429_vm1, %v10435_v50  ;;  %v3548_v54 = vsel %vm3441_vm7, %v3538_v30, %v3547_v19  ;;  %v3552_v2 = vrot.slane %v3550_v36, 2  ;;  %v3559_v59 = vshrl.u32 %v8921_v57, 16 }
 0x2b8   : > { %v8904_v38 = vadd.f32 %v3125_v37, %v2767_v20  ;;  %7011 = vmatprep.mubr.msk.bf16.mxu0 %vm7429_vm1, %v10435_v50  ;;  %v6743_v6 = vpop.f32.mrf.mxu1 }
 0x2b9   : > { %v6825_v0 = vpop.f32.mrf.mxu0  ;;  %v3556_v37 = vor.u32 %v3555_v22, %v3552_v2 }
 0x2ba   : > { %v2642_v53 = vpop.f32.mrf.mxu1  ;;  %v3562_v0 = vshll.u32 %v8921_v57, 16 }
 0x2bb   : > { %v3128_v20 = vpop.f32.mrf.mxu0  ;;  %v2770_v34 = vadd.f32 %v2642_v53, %v8555_v8  ;;  %v3965_v8 = vrot.slane %v8881_v62, 3  ;;  %v3561_v53 = vrot.slane %v3559_v59, 2 }
 0x2bc   : > { %v8915_v42 = vadd.f32 %v3128_v20, %v2768_v39  ;;  %v6744_v29 = vpop.f32.mrf.mxu1  ;;  %v5544_v39 = vld [vmem:[%s10418_s2 + $0x58] sm:$0xff] }
 0x2bd   : > { %v6826_v25 = vpop.f32.mrf.mxu0  ;;  %7060 = vmatpush3.msra.mxu1 %v5544_v39  ;;  %v3966_v41 = vsel %vm3943_vm8, %v3963_v4, %v3965_v8  ;;  %v3967_v4 = vrot.slane %v8901_v45, 3 }
 0x2be   : > { %v2647_v9 = vpop.f32.mrf.mxu1  ;;  %6930 = vmatmul.mubr.msk.bf16.gmra.mxu1 %vm575_vm3, %v3548_v54  ;;  %7061 = vmatprep.subr.mxu1 %v10435_v50  ;;  %v3564_v25 = vrot.slane %v3562_v0, 3  ;;  %v8945_v54 = vld [vmem:[%s7529_s9 + $0x80] sm:$0xff]  }
 0x2bf   : > { %v3133_v43 = vpop.f32.mrf.mxu0  ;;  %7012 = vmatmul.mubr.msk.bf16.gmra.mxu0 %vm575_vm3, %v3964_v12  ;;  %v2771_v14 = vadd.f32 %v2647_v9, %v8562_v61  ;;  %6933 = vmatprep.mubr.msk.bf16.mxu1 %vm7429_vm1, %v10435_v50  ;;  %v3557_v61 = vsel %vm3441_vm7, %v3547_v19, %v3556_v37  ;;  %v3568_v39 = vshrl.u32 %v8945_v54, 16  ;;  %v3571_v9 = vshll.u32 %v8945_v54, 16 }
 0x2c0   : > { %v8927_v33 = vadd.f32 %v3133_v43, %v2769_v56  ;;  %7015 = vmatprep.mubr.msk.bf16.mxu0 %vm7429_vm1, %v10435_v50  ;;  %v6747_v56 = vpop.f32.mrf.mxu1  ;;  %v3565_v43 = vor.u32 %v3564_v25, %v3561_v53  ;;  %v3968_v45 = vsel %vm3943_vm8, %v3965_v8, %v3967_v4  ;;  %v3969_v8 = vrot.slane %v8921_v57, 3 }
 0x2c1   : > { %v6829_v30 = vpop.f32.mrf.mxu0 }
 0x2c2   : > { %v2650_v6 = vpop.f32.mrf.mxu1 }
 0x2c3   : > { %v3136_v62 = vpop.f32.mrf.mxu0  ;;  %v2772_v12 = vadd.f32 %v2650_v6, %v8571_v60  ;;  %v3573_v6 = vrot.slane %v3571_v9, 3 }
 0x2c4   : > { %v8939_v36 = vadd.f32 %v3136_v62, %v2770_v34  ;;  %v6748_v2 = vpop.f32.mrf.mxu1 }
 0x2c5   : > { %v6830_v20 = vpop.f32.mrf.mxu0 }
 0x2c6   : > { %v2655_v34 = vpop.f32.mrf.mxu1  ;;  %6934 = vmatmul.mubr.msk.bf16.gmra.mxu1 %vm575_vm3, %v3557_v61  ;;  %v8965_v20 = vld [vmem:[%s7529_s9 + $0x88] sm:$0xff]  }
 0x2c7   : > { %v3141_v22 = vpop.f32.mrf.mxu0  ;;  %7016 = vmatmul.mubr.msk.bf16.gmra.mxu0 %vm575_vm3, %v3966_v41  ;;  %v2773_v19 = vadd.f32 %v2655_v34, %v8578_v63  ;;  %6937 = vmatprep.mubr.msk.bf16.mxu1 %vm7429_vm1, %v10435_v50  ;;  %v3566_v63 = vsel %vm3441_vm7, %v3556_v37, %v3565_v43  ;;  %v3570_v41 = vrot.slane %v3568_v39, 2  ;;  %v3580_v34 = vshll.u32 %v8965_v20, 16 }
 0x2c8   : > { %v8948_v29 = vadd.f32 %v3141_v22, %v2771_v14  ;;  %7019 = vmatprep.mubr.msk.bf16.mxu0 %vm7429_vm1, %v10435_v50  ;;  %v6751_v30 = vpop.f32.mrf.mxu1  ;;  %v3577_v22 = vshrl.u32 %v8965_v20, 16 }
 0x2c9   : > { %v6833_v60 = vpop.f32.mrf.mxu0  ;;  %v3574_v2 = vor.u32 %v3573_v6, %v3570_v41 }
 0x2ca   : > { %v2658_v0 = vpop.f32.mrf.mxu1  ;;  %v5543_v60 = vld [vmem:[%s10418_s2 + $0x50] sm:$0xff] }
 0x2cb   : > { %v3144_v14 = vpop.f32.mrf.mxu0  ;;  %v2774_v62 = vadd.f32 %v2658_v0, %v8587_v26  ;;  %7062 = vmatpush3.msra.mxu1 %v5543_v60  ;;  %v3579_v0 = vrot.slane %v3577_v22, 2 }
 0x2cc   : > { %v8959_v59 = vadd.f32 %v3144_v14, %v2772_v12  ;;  %v6752_v61 = vpop.f32.mrf.mxu1  ;;  %7063 = vmatprep.subr.mxu1 %v10435_v50 }
 0x2cd   : > { %v6834_v56 = vpop.f32.mrf.mxu0 }
 0x2ce   : > { %v2663_v12 = vpop.f32.mrf.mxu1  ;;  %6938 = vmatmul.mubr.msk.bf16.gmra.mxu1 %vm575_vm3, %v3566_v63  ;;  %v3582_v56 = vrot.slane %v3580_v34, 3  ;;  %v8989_v63 = vld [vmem:[%s7529_s9 + $0x90] sm:$0xff]  }
 0x2cf   : > { %v3149_v53 = vpop.f32.mrf.mxu0  ;;  %7020 = vmatmul.mubr.msk.bf16.gmra.mxu0 %vm575_vm3, %v3968_v45  ;;  %v2775_v37 = vadd.f32 %v2663_v12, %v8594_v49  ;;  %6941 = vmatprep.mubr.msk.bf16.mxu1 %vm7429_vm1, %v10435_v50  ;;  %v3970_v49 = vsel %vm3943_vm8, %v3967_v4, %v3969_v8  ;;  %v3575_v45 = vsel %vm3441_vm7, %v3565_v43, %v3574_v2  ;;  %v3971_v4 = vrot.slane %v8945_v54, 3 }
 0x2d0   : > { %v8968_v25 = vadd.f32 %v3149_v53, %v2773_v19  ;;  %7023 = vmatprep.mubr.msk.bf16.mxu0 %vm7429_vm1, %v10435_v50  ;;  %v6755_v57 = vpop.f32.mrf.mxu1  ;;  %v3583_v53 = vor.u32 %v3582_v56, %v3579_v0  ;;  %v3586_v12 = vshrl.u32 %v8989_v63, 16 }
 0x2d1   : > { %v6837_v26 = vpop.f32.mrf.mxu0  ;;  %v3972_v54 = vsel %vm3943_vm8, %v3969_v8, %v3971_v4 }
 0x2d2   : > { %v2666_v9 = vpop.f32.mrf.mxu1  ;;  %v3589_v26 = vshll.u32 %v8989_v63, 16 }
 0x2d3   : > { %v3152_v19 = vpop.f32.mrf.mxu0  ;;  %v2776_v14 = vadd.f32 %v2666_v9, %v8603_v11 }
 0x2d4   : > { %v8982_v39 = vadd.f32 %v3152_v19, %v2774_v62  ;;  %v6756_v41 = vpop.f32.mrf.mxu1  ;;  %v3591_v9 = vrot.slane %v3589_v26, 3 }
 0x2d5   : > { %v6838_v30 = vpop.f32.mrf.mxu0 }
 0x2d6   : > { %v2671_v61 = vpop.f32.mrf.mxu1  ;;  %6942 = vmatmul.mubr.msk.bf16.gmra.mxu1 %vm575_vm3, %v3575_v45  ;;  %v9009_v30 = vld [vmem:[%s7529_s9 + $0x98] sm:$0xff]   ;;  %v5542_v45 = vld [vmem:[%s10418_s2 + $0x48] sm:$0xff] }
 0x2d7   : > { %v3157_v6 = vpop.f32.mrf.mxu0  ;;  %7024 = vmatmul.mubr.msk.bf16.gmra.mxu0 %vm575_vm3, %v3970_v49  ;;  %v2777_v43 = vadd.f32 %v2671_v61, %v8610_v23  ;;  %6945 = vmatprep.mubr.msk.bf16.mxu1 %vm7429_vm1, %v10435_v50  ;;  %v3584_v23 = vsel %vm3441_vm7, %v3574_v2, %v3583_v53  ;;  %v3588_v49 = vrot.slane %v3586_v12, 2  ;;  %v3595_v61 = vshrl.u32 %v9009_v30, 16 }
 0x2d8   : > { %v8992_v62 = vadd.f32 %v3157_v6, %v2775_v37  ;;  %7027 = vmatprep.mubr.msk.bf16.mxu0 %vm7429_vm1, %v10435_v50  ;;  %v6759_v37 = vpop.f32.mrf.mxu1  ;;  %7064 = vmatpush3.msra.mxu1 %v5542_v45 }
 0x2d9   : > { %v6841_v11 = vpop.f32.mrf.mxu0  ;;  %7065 = vmatprep.subr.mxu1 %v10435_v50  ;;  %v3592_v6 = vor.u32 %v3591_v9, %v3588_v49 }
 0x2da   : > { %v2674_v60 = vpop.f32.mrf.mxu1  ;;  %v3598_v11 = vshll.u32 %v9009_v30, 16 }
 0x2db   : > { %v3160_v22 = vpop.f32.mrf.mxu0  ;;  %v2778_v19 = vadd.f32 %v2674_v60, %v8619_v27  ;;  %v3973_v27 = vrot.slane %v8965_v20, 3  ;;  %v3597_v60 = vrot.slane %v3595_v61, 2 }
 0x2dc   : > { %v9003_v34 = vadd.f32 %v3160_v22, %v2776_v14  ;;  %v6760_v0 = vpop.f32.mrf.mxu1 }
 0x2dd   : > { %v6842_v57 = vpop.f32.mrf.mxu0  ;;  %v3974_v26 = vsel %vm3943_vm8, %v3971_v4, %v3973_v27  ;;  %v3975_v4 = vrot.slane %v8989_v63, 3 }
 0x2de   : > { %v2679_v2 = vpop.f32.mrf.mxu1  ;;  %6946 = vmatmul.mubr.msk.bf16.gmra.mxu1 %vm575_vm3, %v3584_v23  ;;  %v3600_v57 = vrot.slane %v3598_v11, 3  ;;  %v9033_v23 = vld [vmem:[%s7529_s9 + $0xa0] sm:$0xff]  }
 0x2df   : > { %v3165_v56 = vpop.f32.mrf.mxu0  ;;  %7028 = vmatmul.mubr.msk.bf16.gmra.mxu0 %vm575_vm3, %v3972_v54  ;;  %v2779_v41 = vadd.f32 %v2679_v2, %v8626_v55  ;;  %6949 = vmatprep.mubr.msk.bf16.mxu1 %vm7429_vm1, %v10435_v50  ;;  %v3593_v55 = vsel %vm3441_vm7, %v3583_v53, %v3592_v6  ;;  %v3607_v2 = vshll.u32 %v9033_v23, 16  ;;  %v3976_v63 = vsel %vm3943_vm8, %v3973_v27, %v3975_v4 }
 0x2e0   : > { %v9015_v8 = vadd.f32 %v3165_v56, %v2777_v43  ;;  %7031 = vmatprep.mubr.msk.bf16.mxu0 %vm7429_vm1, %v10435_v50  ;;  %v6763_v43 = vpop.f32.mrf.mxu1  ;;  %v3601_v0 = vor.u32 %v3600_v57, %v3597_v60  ;;  %v3604_v56 = vshrl.u32 %v9033_v23, 16 }
 0x2e1   : > { %v6845_v14 = vpop.f32.mrf.mxu0 }
 0x2e2   : > { %v2682_v37 = vpop.f32.mrf.mxu1 }
 0x2e3   : > { %v3168_v12 = vpop.f32.mrf.mxu0  ;;  %v2780_v54 = vadd.f32 %v2682_v37, %v8635_v16  ;;  %v3609_v37 = vrot.slane %v3607_v2, 3 }
 0x2e4   : > { %v9027_v20 = vadd.f32 %v3168_v12, %v2778_v19  ;;  %v6764_v49 = vpop.f32.mrf.mxu1 }
 0x2e5   : > { %v6846_v22 = vpop.f32.mrf.mxu0 }
 0x2e6   : > { %v2687_v19 = vpop.f32.mrf.mxu1  ;;  %6950 = vmatmul.mubr.msk.bf16.gmra.mxu1 %vm575_vm3, %v3593_v55  ;;  %v9053_v22 = vld [vmem:[%s7529_s9 + $0xa8] sm:$0xff]   ;;  %v5541_v55 = vld [vmem:[%s10418_s2 + $0x40] sm:$0xff] }
 0x2e7   : > { %v3173_v9 = vpop.f32.mrf.mxu0  ;;  %7032 = vmatmul.mubr.msk.bf16.gmra.mxu0 %vm575_vm3, %v3974_v26  ;;  %v2781_v53 = vadd.f32 %v2687_v19, %v8642_v10  ;;  %6953 = vmatprep.mubr.msk.bf16.mxu1 %vm7429_vm1, %v10435_v50  ;;  %v3602_v10 = vsel %vm3441_vm7, %v3592_v6, %v3601_v0  ;;  %v3606_v26 = vrot.slane %v3604_v56, 2  ;;  %v3613_v19 = vshrl.u32 %v9053_v22, 16 }
 0x2e8   : > { %v9036_v45 = vadd.f32 %v3173_v9, %v2779_v41  ;;  %7035 = vmatprep.mubr.msk.bf16.mxu0 %vm7429_vm1, %v10435_v50  ;;  %v6767_v14 = vpop.f32.mrf.mxu1  ;;  %7066 = vmatpush3.msra.mxu1 %v5541_v55 }
 0x2e9   : > { %v6849_v16 = vpop.f32.mrf.mxu0  ;;  %7067 = vmatprep.subr.mxu1 %v10435_v50  ;;  %v3610_v9 = vor.u32 %v3609_v37, %v3606_v26 }
 0x2ea   : > { %v2690_v11 = vpop.f32.mrf.mxu1  ;;  %v3616_v16 = vshll.u32 %v9053_v22, 16 }
 0x2eb   : > { %v3176_v41 = vpop.f32.mrf.mxu0  ;;  %v2782_v12 = vadd.f32 %v2690_v11, %v8651_v58  ;;  %v3977_v58 = vrot.slane %v9009_v30, 3  ;;  %v3615_v11 = vrot.slane %v3613_v19, 2 }
 0x2ec   : > { %v9047_v61 = vadd.f32 %v3176_v41, %v2780_v54  ;;  %v6768_v60 = vpop.f32.mrf.mxu1 }
 0x2ed   : > { %v6850_v43 = vpop.f32.mrf.mxu0  ;;  %v3978_v2 = vsel %vm3943_vm8, %v3975_v4, %v3977_v58  ;;  %v3979_v4 = vrot.slane %v9033_v23, 3 }
 0x2ee   : > { %v2695_v6 = vpop.f32.mrf.mxu1  ;;  %6954 = vmatmul.mubr.msk.bf16.gmra.mxu1 %vm575_vm3, %v3602_v10  ;;  %v3618_v43 = vrot.slane %v3616_v16, 3  ;;  %v9077_v10 = vld [vmem:[%s7529_s9 + $0xb0] sm:$0x1f]   ;;  %s10340_s9 = sand.u32 1, %s7410_s16  }
 0x2ef   : > { %v3181_v57 = vpop.f32.mrf.mxu0  ;;  %7036 = vmatmul.mubr.msk.bf16.gmra.mxu0 %vm575_vm3, %v3976_v63  ;;  %v2783_v49 = vadd.f32 %v2695_v6, %v8658_v32  ;;  %6957 = vmatprep.mubr.msk.bf16.mxu1 %vm7429_vm1, %v10435_v50  ;;  %v3611_v32 = vsel %vm3441_vm7, %v3601_v0, %v3610_v9  ;;  %v3625_v6 = vshll.u32 %v9077_v10, 16  ;;  %v3980_v16 = vsel %vm3943_vm8, %v3977_v58, %v3979_v4  ;;  %s237_s29 = scalar_lea.vmem [#allocation2], %s10340_s9  ;;  %s5621_s10 = scalar_lea.sflag [#allocation3], %s10340_s9 }
 0x2f0   : > { %v9059_v27 = vadd.f32 %v3181_v57, %v2781_v53  ;;  %7039 = vmatprep.mubr.msk.bf16.mxu0 %vm7429_vm1, %v10435_v50  ;;  %v6771_v53 = vpop.f32.mrf.mxu1  ;;  %v3619_v60 = vor.u32 %v3618_v43, %v3615_v11  ;;  %v3622_v57 = vshrl.u32 %v9077_v10, 16  ;;  %v3981_v58 = vrot.slane %v9053_v22, 3  ;;  %s5638_s8 = sshll.u32 %s237_s29, 4  ;;  %s5639_s8 = int_to_ptr.vmem [resolvable:$true] %s5638_s8 }
 0x2f1   : > { %v6853_v54 = vpop.f32.mrf.mxu0  ;;  %s7320_s11 = scalar_lea.vmem %s5639_s8, 16  ;;  %p7327_p1 = scmp.lt.s32.totalorder %s5639_s8, %s7325_s13 }
 0x2f2   : > { %v2698_v14 = vpop.f32.mrf.mxu1  ;;  %v5540_v54 = vld [vmem:[%s10418_s2 + $0x38] sm:$0xff]  ;;  %p7321_p12 = scmp.ne.s32.totalorder %s5639_s8, %s7320_s11  ;;  %p7328_p2 = scmp.lt.s32.totalorder %s7326_s14, %s7320_s11 }
 0x2f3   : > { %v3184_v56 = vpop.f32.mrf.mxu0  ;;  %v2784_v63 = vadd.f32 %v2698_v14, %v8667_v1  ;;  %7068 = vmatpush3.msra.mxu1 %v5540_v54  ;;  %v3624_v14 = vrot.slane %v3622_v57, 2 }
 0x2f4   : > { %v9071_v30 = vadd.f32 %v3184_v56, %v2782_v12  ;;  %v6772_v26 = vpop.f32.mrf.mxu1  ;;  %7069 = vmatprep.subr.mxu1 %v10435_v50  ;;  %p7322_p13 = pnand %p7321_p12, %p7497_p4  ;;  %p7329_p3 = por %p7328_p2, %p7327_p1 }
 0x2f5   : > { %v6854_v41 = vpop.f32.mrf.mxu0 }
 0x2f6   : > { %v2703_v12 = vpop.f32.mrf.mxu1  ;;  %6958 = vmatmul.mubr.msk.bf16.gmra.mxu1 %vm575_vm3, %v3611_v32  ;;  %v3627_v41 = vrot.slane %v3625_v6, 3  ;;  %p7323_p0 = pneg %p7322_p13 }
 0x2f7   : > { %v3189_v37 = vpop.f32.mrf.mxu0  ;;  %7040 = vmatmul.mubr.msk.bf16.gmra.mxu0 %vm575_vm3, %v3978_v2  ;;  %v2785_v0 = vadd.f32 %v2703_v12, %v8674_v31  ;;  %6961 = vmatprep.mubr.msk.bf16.mxu1 %vm7429_vm1, %v10435_v50  ;;  %v3620_v2 = vsel %vm3441_vm7, %v3610_v9, %v3619_v60 }
 0x2f8   : > { %v9080_v55 = vadd.f32 %v3189_v37, %v2783_v49  ;;  %7043 = vmatprep.mubr.msk.bf16.mxu0 %vm7429_vm1, %v10435_v50  ;;  %v6775_v49 = vpop.f32.mrf.mxu1  ;;  %v3628_v9 = vor.u32 %v3627_v41, %v3624_v14  ;;  %p7330_p5 = pnand %p7329_p3, %p7323_p0 }
 0x2f9   : > { %v6857_v1 = vpop.f32.mrf.mxu0 }
 0x2fa   : > { %v2706_v31 = vpop.f32.mrf.mxu1  ;;  %v3629_v54 = vsel %vm3441_vm7, %v3619_v60, %v3628_v9 }
 0x2fb   : > { %v3192_v23 = vpop.f32.mrf.mxu0  ;;  %v2786_v56 = vadd.f32 %v2706_v31, %v8687_v5 }
 0x2fc   : > { %v9094_v19 = vadd.f32 %v3192_v23, %v2784_v63  ;;  %v6776_v32 = vpop.f32.mrf.mxu1 }
 0x2fd   : > { %v6858_v53 = vpop.f32.mrf.mxu0 }
 0x2fe   : > { %v2711_v63 = vpop.f32.mrf.mxu1  ;;  %6962 = vmatmul.mubr.msk.bf16.gmra.mxu1 %vm575_vm3, %v3620_v2 }
 0x2ff   : > { %v3197_v11 = vpop.f32.mrf.mxu0  ;;  %7044 = vmatmul.mubr.msk.bf16.gmra.mxu0 %vm575_vm3, %v3980_v16  ;;  %v2787_v5 = vadd.f32 %v2711_v63, %v8700_v17  ;;  %6965 = vmatprep.mubr.msk.bf16.mxu1 %vm7429_vm1, %v10435_v50  ;;  %v3983_v16 = vrot.slane %v9077_v10, 3  ;;  %v4333_v63 = vlaneseq }
 0x300   : > { %v9101_v43 = vadd.f32 %v3197_v11, %v2785_v0  ;;  %7047 = vmatprep.mubr.msk.bf16.mxu0 %vm7429_vm1, %v10435_v50  ;;  %v6779_v37 = vpop.f32.mrf.mxu1  ;;  %v3982_v0 = vsel %vm3943_vm8, %v3979_v4, %v3981_v58 }
 0x301   : > { %v6861_v26 = vpop.f32.mrf.mxu0  ;;  %v3984_v10 = vsel %vm3943_vm8, %v3981_v58, %v3983_v16 }
 0x302   : > { %v2714_v57 = vpop.f32.mrf.mxu1 }
 0x303   : > { %v3200_v12 = vpop.f32.mrf.mxu0  ;;  %v2788_v22 = vadd.f32 %v2714_v57, %v8711_v46  ;;  %v5539_v46 = vld [vmem:[%s10418_s2 + $0x30] sm:$0xff] }
 0x304   : > { %v9110_v1 = vadd.f32 %v3200_v12, %v2786_v56  ;;  %v6780_v49 = vpop.f32.mrf.mxu1  ;;  %7070 = vmatpush3.msra.mxu1 %v5539_v46 }
 0x305   : > { %v6862_v6 = vpop.f32.mrf.mxu0  ;;  %7071 = vmatprep.subr.mxu1 %v10435_v50  ;;  %v5538_v49 = vld [vmem:[%s10418_s2 + $0x28] sm:$0xff] }
 0x306   : > { %v2719_v31 = vpop.f32.mrf.mxu1  ;;  %6966 = vmatmul.mubr.msk.bf16.gmra.mxu1 %vm575_vm3, %v3629_v54 }
 0x307   : > { %v3205_v23 = vpop.f32.mrf.mxu0  ;;  %7048 = vmatmul.mubr.msk.bf16.gmra.mxu0 %vm575_vm3, %v3982_v0  ;;  %v2789_v53 = vadd.f32 %v2719_v31, %v8719_v7  ;;  %6969 = vmatprep.mubr.msk.bf16.mxu1 %vm7429_vm1, %v10435_v50  ;;  %v9142_v0 = vshrl.u32 %v4333_v63, 7 }
 0x308   : > { %v9116_v17 = vadd.f32 %v3205_v23, %v2787_v5  ;;  %7051 = vmatprep.mubr.msk.bf16.mxu0 %vm7429_vm1, %v10435_v50  ;;  %v6783_v60 = vpop.f32.mrf.mxu1  ;;  %7072 = vmatpush3.msra.mxu1 %v5538_v49 }
 0x309   : > { %v6865_v4 = vpop.f32.mrf.mxu0  ;;  %7073 = vmatprep.subr.mxu1 %v10435_v50  ;;  %v9168_v63 = vadd.s32 40, %v9142_v0 }
 0x30a   : > { %v2722_v14 = vpop.f32.mrf.mxu1 }
 0x30b   : > { %v3208_v56 = vpop.f32.mrf.mxu0  ;;  %v2790_v7 = vadd.f32 %v2722_v14, %v8730_v47  ;;  %v4337_v14 = vadd.s32 24, %v9142_v0 }
 0x30c   : > { %v9128_v2 = vadd.f32 %v3208_v56, %v2788_v22  ;;  %v6784_v32 = vpop.f32.mrf.mxu1 }
 0x30d   : > { %v6866_v41 = vpop.f32.mrf.mxu0 }
 0x30e   : > { %v2727_v5 = vpop.f32.mrf.mxu1  ;;  %6970 = vmatmul.mubr.msk.bf16.gmra.mxu1 %vm575_vm3, %v3628_v9 }
 0x30f   : > { %v3213_v11 = vpop.f32.mrf.mxu0  ;;  %7052 = vmatmul.mubr.msk.bf16.gmra.mxu0 %vm575_vm3, %v3984_v10  ;;  %v2791_v58 = vadd.f32 %v2727_v5, %v8739_v44  ;;  %7083 = vmatprep.mubr.msk.f32.mxu1 %vm7429_vm1, %v10435_v50  ;;  %v9151_v44 = vadd.s32 16, %v9142_v0 }
 0x310   : > { %v9134_v26 = vadd.f32 %v3213_v11, %v2789_v53  ;;  %7055 = vmatprep.mubr.msk.bf16.mxu0 %vm7429_vm1, %v10435_v50  ;;  %v6787_v47 = vpop.f32.mrf.mxu1 }
 0x311   : > { %v6869_v37 = vpop.f32.mrf.mxu0  ;;  %v9159_v56 = vmul.u32.u64.low 3817748708, %v9151_v44  ;;  %v9160_v10 = vmul.u32.u64.high 3817748708, %v9151_v44, %v9159_v56  ;;  %vm5033_vm4 = vcmp.ge.s32.totalorder %v9151_v44, 18 }
 0x312   : > { %10451 = vst [vmem:[#allocation10_spill] sm:$0xff] %v9134_v26  ;;  %v2730_v6 = vpop.f32.mrf.mxu1 }
 0x313   : > { %v3216_v12 = vpop.f32.mrf.mxu0  ;;  %v2792_v54 = vadd.f32 %v2730_v6, %v8750_v52 }
 0x314   : > { %v9144_v57 = vadd.f32 %v3216_v12, %v2790_v7  ;;  %v6788_v9 = vpop.f32.mrf.mxu1 }
 0x315   : > { %v6870_v22 = vpop.f32.mrf.mxu0 }
 0x316   : > { %10452 = vst [vmem:[#allocation8_spill] sm:$0xff] %v9144_v57  ;;  %v2735_v4 = vpop.f32.mrf.mxu1 }
 0x317   : > { %v3221_v23 = vpop.f32.mrf.mxu0  ;;  %7056 = vmatmul.mubr.msk.bf16.gmra.mxu0 %vm575_vm3, %v3983_v16  ;;  %v2793_v52 = vadd.f32 %v2735_v4, %v8759_v51  ;;  %v4338_v16 = vadd.s32 32, %v9142_v0 }
 0x318   : > { %v9154_v31 = vadd.f32 %v3221_v23, %v2791_v58  ;;  %v6791_v46 = vpop.f32.mrf.mxu1  ;;  %v9170_v37 = vmul.u32.u64.low 3817748708, %v4337_v14  ;;  %v9171_v58 = vmul.u32.u64.high 3817748708, %v4337_v14, %v9170_v37 }
 0x319   : > { %v6873_v53 = vpop.f32.mrf.mxu0  ;;  %v9175_v12 = vmul.u32.u64.low 3817748708, %v4338_v16  ;;  %v9176_v6 = vmul.u32.u64.high 3817748708, %v4338_v16, %v9175_v12  ;;  %v9185_v46 = vadd.s32 48, %v9142_v0 }
 0x31a   : > { %10453 = vst [vmem:[#allocation9_spill] sm:$0xff] %v9154_v31  ;;  %v2738_v7 = vpop.f32.mrf.mxu1  ;;  %v4403_v53 = vshrl.u32 %v9160_v10, 4  ;;  %v4414_v37 = vshrl.u32 %v9171_v58, 4 }
 0x31b   : > { %v3224_v60 = vpop.f32.mrf.mxu0  ;;  %v2794_v11 = vadd.f32 %v2738_v7, %v8770_v24  ;;  %v9180_v9 = vmul.u32.u64.low 3817748708, %v9168_v63  ;;  %v9181_v24 = vmul.u32.u64.high 3817748708, %v9168_v63, %v9180_v9 }
 0x31c   : > { %v9163_v41 = vadd.f32 %v3224_v60, %v2792_v54  ;;  %v6792_v51 = vpop.f32.mrf.mxu1  ;;  %v9190_v60 = vadd.s32 56, %v9142_v0  ;;  %v4404_v10 = vmul.u32 18, %v4403_v53 }
 0x31d   : > { %v6874_v32 = vpop.f32.mrf.mxu0  ;;  %v4436_v53 = vshrl.u32 %v9181_v24, 4 }
 0x31e   : > { %10454 = vst [vmem:[#allocation11_spill] sm:$0xff] %v9163_v41  ;;  %v2743_v22 = vpop.f32.mrf.mxu1  ;;  %v5537_v32 = vld [vmem:[%s10418_s2 + $0x20] sm:$0xff] }
 0x31f   : > { %v3229_v5 = vpop.f32.mrf.mxu0  ;;  %v2795_v49 = vadd.f32 %v2743_v22, %v8778_v3  ;;  %v9193_v3 = vadd.s32 64, %v9142_v0  ;;  %7074 = vmatpush3.msra.mxu1 %v5537_v32 }
 0x320   : > { %v9173_v47 = vadd.f32 %v3229_v5, %v2793_v52  ;;  %v6795_v23 = vpop.f32.mrf.mxu1  ;;  %7075 = vmatprep.subr.mxu1 %v10435_v50 }
 0x321   : > { %v6877_v54 = vpop.f32.mrf.mxu0  ;;  %v9207_v9 = vmul.u32.u64.low 3817748708, %v9190_v60  ;;  %v9208_v23 = vmul.u32.u64.high 3817748708, %v9190_v60, %v9207_v9 }
 0x322   : > { %10455 = vst [vmem:[#allocation12_spill] sm:$0xff] %v9173_v47  ;;  %v2746_v56 = vpop.f32.mrf.mxu1  ;;  %v4425_v54 = vshrl.u32 %v9176_v6, 4  ;;  %v9218_v9 = vadd.s32 72, %v9142_v0 }
 0x323   : > { %v3232_v4 = vpop.f32.mrf.mxu0 }
 0x324   : > { %v9187_v52 = vadd.f32 %v3232_v4, %v2794_v11  ;;  %v6796_v51 = vpop.f32.mrf.mxu1  ;;  %v9200_v11 = vmul.u32.u64.low 3817748708, %v9185_v46  ;;  %v9201_v12 = vmul.u32.u64.high 3817748708, %v9185_v46, %v9200_v11  ;;  %v4426_v6 = vmul.u32 18, %v4425_v54 }
 0x325   : > { %v6878_v7 = vpop.f32.mrf.mxu0  ;;  %v9229_v47 = vmul.u32.u64.low 3817748708, %v9218_v9  ;;  %v9230_v41 = vmul.u32.u64.high 3817748708, %v9218_v9, %v9229_v47 }
 0x326   : > { %10456 = vst [vmem:[#allocation13_spill] sm:$0xff] %v9187_v52  ;;  %v2751_v4 = vpop.f32.mrf.mxu1  ;;  %v9213_v58 = vmul.u32.u64.low 3817748708, %v9193_v3  ;;  %v9214_v7 = vmul.u32.u64.high 3817748708, %v9193_v3, %v9213_v58  ;;  %v4447_v54 = vshrl.u32 %v9201_v12, 4 }
 0x327   : > { %v3237_v5 = vpop.f32.mrf.mxu0  ;;  %v9221_v4 = vadd.s32 80, %v9142_v0 }
 0x328   : > { %v9203_v22 = vadd.f32 %v3237_v5, %v2795_v49  ;;  %v6799_v51 = vpop.f32.mrf.mxu1  ;;  %v4405_v49 = vsub.s32 %v9151_v44, %v4404_v10  ;;  %v4415_v5 = vmul.u32 18, %v4414_v37  ;;  %v4427_v37 = vsub.s32 %v4338_v16, %v4426_v6 }
 0x329   : > { %v6881_v56 = vpop.f32.mrf.mxu0  ;;  %v9224_v51 = vadd.s32 88, %v9142_v0  ;;  %v4469_v12 = vshrl.u32 %v9214_v7, 4 }
 0x32a   : > { %10457 = vst [vmem:[#allocation14_spill] sm:$0xff] %v9203_v22  ;;  %v2754_v11 = vpop.f32.mrf.mxu1  ;;  %v4437_v56 = vmul.u32 18, %v4436_v53  ;;  %vm4828_vm9 = vcmp.ne.s32.totalorder %v4405_v49, 0  ;;  %vm4869_vm10 = vcmp.lt.s32.totalorder %v4405_v49, 0  ;;  %v4416_v58 = vsub.s32 %v4337_v14, %v4415_v5 }
 0x32b   : > { %v3240_v32 = vpop.f32.mrf.mxu0  ;;  %v4951_v10 = vadd.s32 18, %v4405_v49  ;;  %vm9236_vm11 = vmand %vm4869_vm10, %vm4828_vm9  ;;  %vm4830_vm14 = vcmp.ne.s32.totalorder %v4427_v37, 0  ;;  %vm4871_vm15 = vcmp.lt.s32.totalorder %v4427_v37, 0 }
 0x32c   : > { %v6800_v24 = vpop.f32.mrf.mxu1  ;;  %v4438_v16 = vsub.s32 %v9168_v63, %v4437_v56  ;;  %vm4829_vm12 = vcmp.ne.s32.totalorder %v4416_v58, 0  ;;  %vm4870_vm13 = vcmp.lt.s32.totalorder %v4416_v58, 0  ;;  %vm9261_vm3 = vmand %vm4871_vm15, %vm4830_vm14 }
 0x32d   : > { %v6882_v22 = vpop.f32.mrf.mxu0  ;;  %v9246_v47 = vmul.u32.u64.low 3817748708, %v9224_v51  ;;  %v9247_v24 = vmul.u32.u64.high 3817748708, %v9224_v51, %v9246_v47  ;;  %v9252_v56 = vsel %vm9236_vm11, %v4951_v10, %v4405_v49  ;;  %vm9255_vm0 = vmand %vm4870_vm13, %vm4829_vm12  ;;  %v9266_v49 = vadd.s32 96, %v9142_v0 }
 0x32e   : > { %v4458_v22 = vshrl.u32 %v9208_v23, 4  ;;  %v3730_v32 = vpop.f32.mrf.mxu1  ;;  %v5536_v23 = vld [vmem:[%s10418_s2 + $0x18] sm:$0xff]  ;;  %vm4831_vm1 = vcmp.ne.s32.totalorder %v4438_v16, 0  ;;  %vm4872_vm2 = vcmp.lt.s32.totalorder %v4438_v16, 0  ;;  %vm5156_vm5 = vcmp.ge.s32.totalorder %v9252_v56, 1 }
 0x32f   : > { %v3245_v52 = vpop.f32.mrf.mxu0  ;;  %7076 = vmatpush3.msra.mxu1 %v5536_v23  ;;  %v4448_v32 = vmul.u32 18, %v4447_v54  ;;  %v4470_v23 = vmul.u32 18, %v4469_v12  ;;  %v4954_v10 = vadd.s32 18, %v4438_v16  ;;  %vm5238_vm6 = vcmp.le.s32.totalorder %v9252_v56, 16  ;;  %vm4913_vm7 = vmand %vm4872_vm2, %vm4831_vm1 }
 0x330   : > { %v9233_v52 = vmul.u32.u64.low 3817748708, %v9221_v4  ;;  %v9234_v53 = vmul.u32.u64.high 3817748708, %v9221_v4, %v9233_v52  ;;  %v6891_v5 = vpop.f32.mrf.mxu1  ;;  %7077 = vmatprep.subr.mxu1 %v10435_v50  ;;  %vm9304_vm12 = vmand %vm5033_vm4, %vm5156_vm5  ;;  %vm5441_vm13 = vcmask 785408  }
 0x331   : > { %v6885_v11 = vpop.f32.mrf.mxu0  ;;  %v4459_v52 = vmul.u32 18, %v4458_v22  ;;  %v4449_v22 = vsub.s32 %v9185_v46, %v4448_v32  ;;  %v4471_v32 = vsub.s32 %v9193_v3, %v4470_v23 }
 0x332   : > { %v3733_v63 = vpop.f32.mrf.mxu1  ;;  %v4952_v11 = vadd.s32 18, %v4416_v58 }
 0x333   : > { %v3248_v6 = vpop.f32.mrf.mxu0  ;;  %vm4832_vm8 = vcmp.ne.s32.totalorder %v4449_v22, 0  ;;  %vm4873_vm9 = vcmp.lt.s32.totalorder %v4449_v22, 0  ;;  %v4955_v5 = vadd.s32 18, %v4449_v22  ;;  %vm4834_vm14 = vcmp.ne.s32.totalorder %v4471_v32, 0 }
 0x334   : > { %v4953_v6 = vadd.s32 18, %v4427_v37  ;;  %v6892_v54 = vpop.f32.mrf.mxu1  ;;  %v9279_v57 = vsel %vm9255_vm0, %v4952_v11, %v4416_v58  ;;  %v9297_v58 = vadd.s32 112, %v9142_v0  ;;  %vm4875_vm15 = vcmp.lt.s32.totalorder %v4471_v32, 0  ;;  %vm9310_vm0 = vmand %vm4873_vm9, %vm4832_vm8 }
 0x335   : > { %v6886_v7 = vpop.f32.mrf.mxu0  ;;  %v4480_v54 = vshrl.u32 %v9230_v41, 4  ;;  %vm5157_vm2 = vcmp.ge.s32.totalorder %v9279_v57, 1  ;;  %vm9332_vm4 = vmand %vm4875_vm15, %vm4834_vm14 }
 0x336   : > { %v3738_v14 = vpop.f32.mrf.mxu1  ;;  %v4460_v7 = vsub.s32 %v9190_v60, %v4459_v52  ;;  %v9283_v46 = vsel %vm9261_vm3, %v4953_v6, %v4427_v37  ;;  %v4502_v60 = vshrl.u32 %v9247_v24, 4  ;;  %vm5239_vm3 = vcmp.le.s32.totalorder %v9279_v57, 16  ;;  %vm9352_vm8 = vmand %vm9304_vm12, %vm5238_vm6 }
 0x337   : > { %v4085_v47 = vpop.f32.mrf.mxu0  ;;  %v3898_v31 = vadd.f32 %v3738_v14, %v8824_v40  ;;  %v9288_v41 = vmul.u32.u64.low 3817748708, %v9266_v49  ;;  %v9289_v52 = vmul.u32.u64.high 3817748708, %v9266_v49, %v9288_v41  ;;  %v9292_v40 = vadd.s32 104, %v9142_v0 }
 0x338   : > { %v4491_v47 = vshrl.u32 %v9234_v53, 4  ;;  %v9294_v53 = vsel %vm4913_vm7, %v4954_v10, %v4438_v16  ;;  %vm4833_vm10 = vcmp.ne.s32.totalorder %v4460_v7, 0  ;;  %vm4874_vm11 = vcmp.lt.s32.totalorder %v4460_v7, 0 }
 0x339   : > { %v6977_v12 = vpop.f32.mrf.mxu0  ;;  %v4503_v10 = vmul.u32 18, %v4502_v60  ;;  %v9315_v44 = vmul.u32.u64.low 3817748708, %v9292_v40  ;;  %v9316_v14 = vmul.u32.u64.high 3817748708, %v9292_v40, %v9315_v44  ;;  %vm9320_vm1 = vmand %vm4874_vm11, %vm4833_vm10  ;;  %vm5158_vm5 = vcmp.ge.s32.totalorder %v9283_v46, 1 }
 0x33a   : > { %v6895_v12 = vpop.f32.mrf.mxu1  ;;  %v4492_v24 = vmul.u32 18, %v4491_v47  ;;  %vm5240_vm7 = vcmp.le.s32.totalorder %v9283_v46, 16  ;;  %vm5159_vm9 = vcmp.ge.s32.totalorder %v9294_v53, 1  ;;  %vm5241_vm6 = vcmp.le.s32.totalorder %v9294_v53, 16  ;;  %vm9379_vm10 = vmand %vm5157_vm2, %vm5239_vm3  ;;  %v5534_v53 = vld [vmem:[%s10418_s2 + $0x8] sm:$0xff] }
 0x33b   : > { %v4088_v26 = vpop.f32.mrf.mxu0  ;;  %v4957_v12 = vadd.s32 18, %v4471_v32 }
 0x33c   : > { %v3741_v37 = vpop.f32.mrf.mxu1  ;;  %v4481_v26 = vmul.u32 18, %v4480_v54 }
 0x33d   : > { %v6978_v3 = vpop.f32.mrf.mxu0  ;;  %v3899_v11 = vadd.f32 %v3741_v37, %v8835_v21  ;;  %v4956_v21 = vadd.s32 18, %v4460_v7  ;;  %v9325_v41 = vmul.u32.u64.low 3817748708, %v9297_v58  ;;  %v9326_v37 = vmul.u32.u64.high 3817748708, %v9297_v58, %v9325_v41 }
 0x33e   : > { %v6896_v6 = vpop.f32.mrf.mxu1  ;;  %v9337_v60 = vsub.s32 %v9218_v9, %v4481_v26 }
 0x33f   : > { %v4093_v23 = vpop.f32.mrf.mxu0  ;;  %v9368_v16 = vsel %vm9320_vm1, %v4956_v21, %v4460_v7  ;;  %v9387_v7 = vadd.s32 120, %v9142_v0 }
 0x340   : > { %v4253_v54 = vadd.f32 %v4093_v23, %v3898_v31  ;;  %v3746_v3 = vpop.f32.mrf.mxu1  ;;  %v9340_v23 = vsub.s32 %v9221_v4, %v4492_v24  ;;  %v9362_v24 = vsub.s32 %v9224_v51, %v4503_v10  ;;  %vm4835_vm11 = vcmp.ne.s32.totalorder %v9337_v60, 0 }
 0x341   : > { %v6981_v6 = vpop.f32.mrf.mxu0  ;;  %v3900_v44 = vadd.f32 %v3746_v3, %v8844_v13  ;;  %v9359_v13 = vsel %vm9310_vm0, %v4955_v5, %v4449_v22  ;;  %v9372_v3 = vsel %vm9332_vm4, %v4957_v12, %v4471_v32  ;;  %vm4876_vm12 = vcmp.lt.s32.totalorder %v9337_v60, 0  ;;  %vm5281_vm4 = vmand %vm5158_vm5, %vm5240_vm7 }
 0x342   : > { %v4294_v41 = vmax.f32 %v4253_v54, 0.0  ;;  %v5535_v6 = vld [vmem:[%s10418_s2 + $0x10] sm:$0xff]  ;;  %v6899_v4 = vpop.f32.mrf.mxu1  ;;  %v4513_v54 = vshrl.u32 %v9289_v52, 4  ;;  %vm4836_vm14 = vcmp.ne.s32.totalorder %v9340_v23, 0  ;;  %vm5160_vm15 = vcmp.ge.s32.totalorder %v9359_v13, 1 }
 0x343   : > { %v4096_v26 = vpop.f32.mrf.mxu0  ;;  %7078 = vmatpush3.msra.mxu1 %v5535_v6  ;;  %vm5242_vm0 = vcmp.le.s32.totalorder %v9359_v13, 16  ;;  %vm4877_vm1 = vcmp.lt.s32.totalorder %v9340_v23, 0  ;;  %vm4837_vm2 = vcmp.ne.s32.totalorder %v9362_v24, 0  ;;  %vm4878_vm3 = vcmp.lt.s32.totalorder %v9362_v24, 0 }
 0x344   : > { %v4254_v56 = vadd.f32 %v4096_v26, %v3899_v11  ;;  %7079 = vmatprep.subr.mxu1 %v10435_v50  ;;  %v3749_v22 = vpop.f32.mrf.mxu1  ;;  %v5402_v32 = vsel %vm9352_vm8, %v4294_v41, 0.0  ;;  %v4514_v21 = vmul.u32 18, %v4513_v54  ;;  %v9398_v10 = vadd.s32 128, %v9142_v0  ;;  %vm9429_vm5 = vmand %vm4877_vm1, %vm4836_vm14 }
 0x345   : > { %v6982_v52 = vpop.f32.mrf.mxu0  ;;  %v3901_v11 = vadd.f32 %v3749_v22, %v8855_v18  ;;  %v4524_v12 = vshrl.u32 %v9316_v14, 4  ;;  %v4535_v31 = vshrl.u32 %v9326_v37, 4  ;;  %v5445_v41 = vsel %vm5441_vm13, %v5402_v32, 0.0  ;;  %vm9443_vm7 = vmand %vm4878_vm3, %vm4837_vm2  ;;  %7080 = vmatpush3.msra.mxu1 %v5534_v53 }
 0x346   : > { %v4295_v57 = vmax.f32 %v4254_v56, 0.0  ;;  %v6900_v5 = vpop.f32.mrf.mxu1  ;;  %v9411_v26 = vmul.u32.u64.low 3817748708, %v9387_v7  ;;  %v9412_v54 = vmul.u32.u64.high 3817748708, %v9387_v7, %v9411_v26  ;;  %vm5161_vm8 = vcmp.ge.s32.totalorder %v9368_v16, 1  ;;  %7081 = vmatprep.subr.mxu1 %v10435_v50 }
 0x347   : > { %v4101_v63 = vpop.f32.mrf.mxu0  ;;  %v4958_v46 = vadd.s32 18, %v9337_v60  ;;  %v4959_v52 = vadd.s32 18, %v9340_v23  ;;  %v4960_v32 = vadd.s32 18, %v9362_v24  ;;  %vm5162_vm14 = vcmp.ge.s32.totalorder %v9372_v3, 1 }
 0x348   : > { %v5403_v18 = vsel %vm9379_vm10, %v4295_v57, 0.0  ;;  %v4255_v47 = vadd.f32 %v4101_v63, %v3900_v44  ;;  %v3754_v9 = vpop.f32.mrf.mxu1  ;;  %vm9420_vm10 = vmand %vm4876_vm12, %vm4835_vm11  ;;  %v9436_v57 = vmul.u32.u64.low 3817748708, %v9398_v10  ;;  %v9437_v5 = vmul.u32.u64.high 3817748708, %v9398_v10, %v9436_v57 }
 0x349   : > { %v5447_v6 = vsel %vm5441_vm13, %v5403_v18, 0.0  ;;  %v6985_v4 = vpop.f32.mrf.mxu0  ;;  %v3902_v14 = vadd.f32 %v3754_v9, %v8864_v35  ;;  %vm9455_vm11 = vmand %vm5159_vm9, %vm5241_vm6  ;;  %vm5243_vm12 = vcmp.le.s32.totalorder %v9368_v16, 16  ;;  %vm5244_vm1 = vcmp.le.s32.totalorder %v9372_v3, 16 }
 0x34a   : > { %v5448_v44 = vadd.f32 %v5447_v6, %v5445_v41  ;;  %v4296_v56 = vmax.f32 %v4255_v47, 0.0  ;;  %v6903_v22 = vpop.f32.mrf.mxu1  ;;  %v9448_v41 = vsub.s32 %v9266_v49, %v4514_v21  ;;  %v4525_v6 = vmul.u32 18, %v4524_v12  ;;  %vm9496_vm6 = vmand %vm5160_vm15, %vm5242_vm0 }
 0x34b   : > { %v4104_v51 = vpop.f32.mrf.mxu0  ;;  %v9469_v57 = vsel %vm9420_vm10, %v4958_v46, %v9337_v60  ;;  %v9509_v13 = vadd.s32 144, %v9142_v0  ;;  %vm5284_vm0 = vmand %vm5161_vm8, %vm5243_vm12 }
 0x34c   : > { %v5404_v63 = vsel %vm5281_vm4, %v4296_v56, 0.0  ;;  %v4256_v18 = vadd.f32 %v4104_v51, %v3901_v11  ;;  %v3757_v4 = vpop.f32.mrf.mxu1  ;;  %v4536_v56 = vmul.u32 18, %v4535_v31  ;;  %v9474_v31 = vsel %vm9429_vm5, %v4959_v52, %v9340_v23 }
 0x34d   : > { %v5449_v9 = vsel %vm5441_vm13, %v5404_v63, 0.0  ;;  %v6986_v26 = vpop.f32.mrf.mxu0  ;;  %v3903_v21 = vadd.f32 %v3757_v4, %v8875_v28  ;;  %v9479_v28 = vsel %vm9443_vm7, %v4960_v32, %v9362_v24  ;;  %vm4838_vm9 = vcmp.ne.s32.totalorder %v9448_v41, 0  ;;  %vm9538_vm7 = vmand %vm5162_vm14, %vm5244_vm1 }
 0x34e   : > { %v5450_v49 = vadd.f32 %v5449_v9, %v5448_v44  ;;  %v4297_v12 = vmax.f32 %v4256_v18, 0.0  ;;  %v6904_v22 = vpop.f32.mrf.mxu1  ;;  %v9482_v44 = vadd.s32 136, %v9142_v0  ;;  %v9488_v60 = vsub.s32 %v9292_v40, %v4525_v6 }
 0x34f   : > { %v4109_v51 = vpop.f32.mrf.mxu0  ;;  %vm4879_vm2 = vcmp.lt.s32.totalorder %v9448_v41, 0  ;;  %v4546_v40 = vshrl.u32 %v9412_v54, 4  ;;  %vm5163_vm3 = vcmp.ge.s32.totalorder %v9469_v57, 1  ;;  %vm5245_vm4 = vcmp.le.s32.totalorder %v9469_v57, 16 }
 0x350   : > { %v5405_v63 = vsel %vm9455_vm11, %v4297_v12, 0.0  ;;  %v4257_v37 = vadd.f32 %v4109_v51, %v3902_v14  ;;  %v3762_v46 = vpop.f32.mrf.mxu1  ;;  %v9502_v14 = vsub.s32 %v9297_v58, %v4536_v56  ;;  %v4557_v6 = vshrl.u32 %v9437_v5, 4  ;;  %vm9552_vm12 = vmand %vm4879_vm2, %vm4838_vm9 }
 0x351   : > { %v5451_v23 = vsel %vm5441_vm13, %v5405_v63, 0.0  ;;  %v6989_v35 = vpop.f32.mrf.mxu0  ;;  %v3904_v52 = vadd.f32 %v3762_v46, %v8884_v15  ;;  %v9513_v58 = vmul.u32.u64.low 3817748708, %v9482_v44  ;;  %v9514_v9 = vmul.u32.u64.high 3817748708, %v9482_v44, %v9513_v58 }
 0x352   : > { %v5452_v50 = vadd.f32 %v5451_v23, %v5450_v49  ;;  %v4298_v32 = vmax.f32 %v4257_v37, 0.0  ;;  %v6907_v18 = vpop.f32.mrf.mxu1  ;;  %v9517_v54 = vadd.s32 152, %v9142_v0  ;;  %v4961_v11 = vadd.s32 18, %v9448_v41 }
 0x353   : > { %v4112_v47 = vpop.f32.mrf.mxu0  ;;  %vm4839_vm15 = vcmp.ne.s32.totalorder %v9488_v60, 0  ;;  %vm4880_vm10 = vcmp.lt.s32.totalorder %v9488_v60, 0  ;;  %vm4840_vm5 = vcmp.ne.s32.totalorder %v9502_v14, 0  ;;  %v4547_v49 = vmul.u32 18, %v4546_v40 }
 0x354   : > { %v5406_v15 = vsel %vm9496_vm6, %v4298_v32, 0.0  ;;  %v4258_v4 = vadd.f32 %v4112_v47, %v3903_v21  ;;  %v3765_v56 = vpop.f32.mrf.mxu1  ;;  %v9531_v53 = vmul.u32.u64.low 3817748708, %v9509_v13  ;;  %v9532_v22 = vmul.u32.u64.high 3817748708, %v9509_v13, %v9531_v53  ;;  %vm9565_vm1 = vmand %vm4880_vm10, %vm4839_vm15 }
 0x355   : > { %v5453_v26 = vsel %vm5441_vm13, %v5406_v15, 0.0  ;;  %v6990_v5 = vpop.f32.mrf.mxu0  ;;  %vm4881_vm8 = vcmp.lt.s32.totalorder %v9502_v14, 0  ;;  %v4558_v37 = vmul.u32 18, %v4557_v6  ;;  %vm5164_vm11 = vcmp.ge.s32.totalorder %v9474_v31, 1  ;;  %vm9605_vm15 = vmand %vm5163_vm3, %vm5245_vm4 }
 0x356   : > { %v5454_v12 = vadd.f32 %v5453_v26, %v5452_v50  ;;  %v4299_v21 = vmax.f32 %v4258_v4, 0.0  ;;  %v6908_v51 = vpop.f32.mrf.mxu1  ;;  %v9544_v23 = vmul.u32.u64.low 3817748708, %v9517_v54  ;;  %v9545_v46 = vmul.u32.u64.high 3817748708, %v9517_v54, %v9544_v23  ;;  %vm9578_vm2 = vmand %vm4881_vm8, %vm4840_vm5 }
 0x357   : > { %v4117_v63 = vpop.f32.mrf.mxu0  ;;  %v9557_v40 = vadd.s32 160, %v9142_v0  ;;  %vm5246_vm14 = vcmp.le.s32.totalorder %v9474_v31, 16  ;;  %v4962_v47 = vadd.s32 18, %v9488_v60  ;;  %v4963_v6 = vadd.s32 18, %v9502_v14 }
 0x358   : > { %v5407_v24 = vsel %vm5284_vm0, %v4299_v21, 0.0  ;;  %v4259_v35 = vadd.f32 %v4117_v63, %v3904_v52  ;;  %v3770_v32 = vpop.f32.mrf.mxu1  ;;  %v3905_v58 = vadd.f32 %v3765_v56, %v8895_v48  ;;  %vm5165_vm9 = vcmp.ge.s32.totalorder %v9479_v28, 1  ;;  %vm9638_vm8 = vmand %vm5164_vm11, %vm5246_vm14 }
 0x359   : > { %v5455_v50 = vsel %vm5441_vm13, %v5407_v24, 0.0  ;;  %v6993_v18 = vpop.f32.mrf.mxu0  ;;  %vm5247_vm6 = vcmp.le.s32.totalorder %v9479_v28, 16  ;;  %v9585_v48 = vsel %vm9552_vm12, %v4961_v11, %v9448_v41  ;;  %v9588_v56 = vsub.s32 %v9387_v7, %v4547_v49 }
 0x35a   : > { %v5456_v15 = vadd.f32 %v5455_v50, %v5454_v12  ;;  %v4300_v4 = vmax.f32 %v4259_v35, 0.0  ;;  %v6911_v5 = vpop.f32.mrf.mxu1  ;;  %v9591_v12 = vsub.s32 %v9398_v10, %v4558_v37  ;;  %v4568_v53 = vshrl.u32 %v9514_v9, 4 }
 0x35b   : > { %v4120_v21 = vpop.f32.mrf.mxu0  ;;  %v9597_v23 = vmul.u32.u64.low 3817748708, %v9557_v40  ;;  %v9598_v24 = vmul.u32.u64.high 3817748708, %v9557_v40, %v9597_v23  ;;  %v9612_v9 = vsel %vm9565_vm1, %v4962_v47, %v9488_v60  ;;  %v9617_v11 = vsel %vm9578_vm2, %v4963_v6, %v9502_v14  ;;  %vm9684_vm2 = vmand %vm5165_vm9, %vm5247_vm6 }
 0x35c   : > { %v5408_v51 = vsel %vm9538_vm7, %v4300_v4, 0.0  ;;  %v4260_v63 = vadd.f32 %v4120_v21, %v3905_v58  ;;  %v3773_v41 = vpop.f32.mrf.mxu1  ;;  %v9620_v49 = vadd.s32 168, %v9142_v0  ;;  %v3906_v57 = vadd.f32 %v3770_v32, %v8904_v38 }
 0x35d   : > { %v5457_v35 = vsel %vm5441_vm13, %v5408_v51, 0.0  ;;  %v6994_v10 = vpop.f32.mrf.mxu0  ;;  %vm5166_vm3 = vcmp.ge.s32.totalorder %v9585_v48, 1  ;;  %vm5248_vm4 = vcmp.le.s32.totalorder %v9585_v48, 16  ;;  %v4579_v3 = vshrl.u32 %v9532_v22, 4 }
 0x35e   : > { %v5458_v16 = vadd.f32 %v5457_v35, %v5456_v15  ;;  %v4301_v37 = vmax.f32 %v4260_v63, 0.0  ;;  %v6912_v60 = vpop.f32.mrf.mxu1  ;;  %vm4841_vm0 = vcmp.ne.s32.totalorder %v9588_v56, 0  ;;  %vm4882_vm10 = vcmp.lt.s32.totalorder %v9588_v56, 0 }
 0x35f   : > { %v4125_v50 = vpop.f32.mrf.mxu0  ;;  %v4569_v14 = vmul.u32 18, %v4568_v53  ;;  %v4590_v18 = vshrl.u32 %v9545_v46, 4  ;;  %vm4842_vm5 = vcmp.ne.s32.totalorder %v9591_v12, 0  ;;  %vm4883_vm7 = vcmp.lt.s32.totalorder %v9591_v12, 0  ;;  %vm9655_vm11 = vmand %vm4882_vm10, %vm4841_vm0 }
 0x360   : > { %v5409_v38 = vsel %vm9605_vm15, %v4301_v37, 0.0  ;;  %v4261_v32 = vadd.f32 %v4125_v50, %v3906_v57  ;;  %v3778_v22 = vpop.f32.mrf.mxu1  ;;  %v9643_v6 = vmul.u32.u64.low 3817748708, %v9620_v49  ;;  %v9644_v58 = vmul.u32.u64.high 3817748708, %v9620_v49, %v9643_v6  ;;  %vm9671_vm1 = vmand %vm4883_vm7, %vm4842_vm5 }
 0x361   : > { %v5459_v52 = vsel %vm5441_vm13, %v5409_v38, 0.0  ;;  %v6997_v46 = vpop.f32.mrf.mxu0  ;;  %v9647_v15 = vadd.s32 176, %v9142_v0  ;;  %v3907_v4 = vadd.f32 %v3773_v41, %v8915_v42  ;;  %vm5167_vm12 = vcmp.ge.s32.totalorder %v9612_v9, 1  ;;  %vm9718_vm10 = vmand %vm5166_vm3, %vm5248_vm4 }
 0x362   : > { %v5460_v26 = vadd.f32 %v5459_v52, %v5458_v16  ;;  %v4302_v5 = vmax.f32 %v4261_v32, 0.0  ;;  %v4580_v21 = vmul.u32 18, %v4579_v3  ;;  %v6915_v31 = vpop.f32.mrf.mxu1  ;;  %v4964_v63 = vadd.s32 18, %v9588_v56 }
 0x363   : > { %v4128_v53 = vpop.f32.mrf.mxu0  ;;  %v4965_v23 = vadd.s32 18, %v9591_v12  ;;  %v9662_v42 = vsub.s32 %v9482_v44, %v4569_v14  ;;  %v4591_v35 = vmul.u32 18, %v4590_v18  ;;  %vm5249_vm14 = vcmp.le.s32.totalorder %v9612_v9, 16  ;;  %v5533_v44 = vld [vmem:[%s10418_s2] sm:$0xff] }
 0x364   : > { %v5410_v41 = vsel %vm9638_vm8, %v4302_v5, 0.0  ;;  %v4262_v7 = vadd.f32 %v4128_v53, %v3907_v4  ;;  %v4601_v57 = vshrl.u32 %v9598_v24, 4  ;;  %v3781_v37 = vpop.f32.mrf.mxu1  ;;  %vm5168_vm15 = vcmp.ge.s32.totalorder %v9617_v11, 1  ;;  %7082 = vmatpush3.msra.mxu1 %v5533_v44 }
 0x365   : > { %v5461_v16 = vsel %vm5441_vm13, %v5410_v41, 0.0  ;;  %v6998_v60 = vpop.f32.mrf.mxu0  ;;  %vm5250_vm0 = vcmp.le.s32.totalorder %v9617_v11, 16  ;;  %v9691_v24 = vmul.u32.u64.low 3817748708, %v9647_v15  ;;  %v9692_v50 = vmul.u32.u64.high 3817748708, %v9647_v15, %v9691_v24 }
 0x366   : > { %v3908_v14 = vadd.f32 %v3778_v22, %v8927_v33  ;;  %v5462_v18 = vadd.f32 %v5461_v16, %v5460_v26  ;;  %v4303_v38 = vmax.f32 %v4262_v7, 0.0  ;;  %v4581_v28 = vsub.s32 %v9509_v13, %v4580_v21  ;;  %v6916_v32 = vpop.f32.mrf.mxu1 }
 0x367   : > { %v4133_v52 = vpop.f32.mrf.mxu0  ;;  %v9699_v47 = vsel %vm9655_vm11, %v4964_v63, %v9588_v56  ;;  %v9704_v46 = vsel %vm9671_vm1, %v4965_v23, %v9591_v12  ;;  %vm4843_vm9 = vcmp.ne.s32.totalorder %v9662_v42, 0  ;;  %v9708_v33 = vsub.s32 %v9517_v54, %v4591_v35 }
 0x368   : > { %v5411_v13 = vsel %vm9684_vm2, %v4303_v38, 0.0  ;;  %v4263_v22 = vadd.f32 %v4133_v52, %v3908_v14  ;;  %vm4884_vm6 = vcmp.lt.s32.totalorder %v9662_v42, 0  ;;  %v4602_v6 = vmul.u32 18, %v4601_v57  ;;  %v3786_v4 = vpop.f32.mrf.mxu1  ;;  %vm5290_vm2 = vmand %vm5167_vm12, %vm5249_vm14 }
 0x369   : > { %v5463_v56 = vsel %vm5441_vm13, %v5411_v13, 0.0  ;;  %v7001_v54 = vpop.f32.mrf.mxu0  ;;  %v4966_v26 = vadd.s32 18, %v9662_v42  ;;  %v4612_v5 = vshrl.u32 %v9644_v58, 4  ;;  %v9725_v21 = vadd.s32 184, %v9142_v0  ;;  %vm9740_vm11 = vmand %vm4884_vm6, %vm4843_vm9 }
 0x36a   : > { %v3909_v31 = vadd.f32 %v3781_v37, %v8939_v36  ;;  %v5464_v53 = vadd.f32 %v5463_v56, %v5462_v18  ;;  %v4304_v51 = vmax.f32 %v4263_v22, 0.0  ;;  %vm5169_vm5 = vcmp.ge.s32.totalorder %v9699_v47, 1  ;;  %v6919_v48 = vpop.f32.mrf.mxu1  ;;  %vm9778_vm12 = vmand %vm5168_vm15, %vm5250_vm0 }
 0x36b   : > { %vm5251_vm7 = vcmp.le.s32.totalorder %v9699_v47, 16  ;;  %vm4844_vm3 = vcmp.ne.s32.totalorder %v4581_v28, 0  ;;  %v4136_v63 = vpop.f32.mrf.mxu0  ;;  %vm4885_vm4 = vcmp.lt.s32.totalorder %v4581_v28, 0  ;;  %v4967_v23 = vadd.s32 18, %v4581_v28 }
 0x36c   : > { %vm4845_vm8 = vcmp.ne.s32.totalorder %v9708_v33, 0  ;;  %v9732_v58 = vadd.s32 192, %v9142_v0  ;;  %v5412_v35 = vsel %vm9718_vm10, %v4304_v51, 0.0  ;;  %v4264_v36 = vadd.f32 %v4136_v63, %v3909_v31  ;;  %v3789_v57 = vpop.f32.mrf.mxu1  ;;  %vm4926_vm6 = vmand %vm4885_vm4, %vm4844_vm3 }
 0x36d   : > { %vm4886_vm1 = vcmp.lt.s32.totalorder %v9708_v33, 0  ;;  %v9746_v7 = vsub.s32 %v9557_v40, %v4602_v6  ;;  %v5465_v10 = vsel %vm5441_vm13, %v5412_v35, 0.0  ;;  %v7002_v44 = vpop.f32.mrf.mxu0  ;;  %v4613_v16 = vmul.u32 18, %v4612_v5 }
 0x36e   : > { %v9754_v37 = vmul.u32.u64.low 3817748708, %v9725_v21  ;;  %v9755_v3 = vmul.u32.u64.high 3817748708, %v9725_v21, %v9754_v37  ;;  %v3910_v60 = vadd.f32 %v3786_v4, %v8948_v29  ;;  %v5466_v24 = vadd.f32 %v5465_v10, %v5464_v53  ;;  %v6920_v18 = vpop.f32.mrf.mxu1  ;;  %vm9791_vm10 = vmand %vm4886_vm1, %vm4845_vm8 }
 0x36f   : > { %v4305_v14 = vmax.f32 %v4264_v36, 0.0  ;;  %vm5170_vm9 = vcmp.ge.s32.totalorder %v9704_v46, 1  ;;  %v4623_v40 = vshrl.u32 %v9692_v50, 4  ;;  %v4141_v9 = vpop.f32.mrf.mxu0  ;;  %v9765_v38 = vsel %vm9740_vm11, %v4966_v26, %v9662_v42  ;;  %vm9822_vm8 = vmand %vm5169_vm5, %vm5251_vm7 }
 0x370   : > { %v9768_v32 = vmul.u32.u64.low 3817748708, %v9732_v58  ;;  %v9769_v52 = vmul.u32.u64.high 3817748708, %v9732_v58, %v9768_v32  ;;  %v9772_v29 = vadd.s32 200, %v9142_v0  ;;  %v4265_v22 = vadd.f32 %v4141_v9, %v3910_v60  ;;  %v3794_v56 = vpop.f32.mrf.mxu1 }
 0x371   : > { %v5413_v13 = vsel %vm5290_vm2, %v4305_v14, 0.0  ;;  %vm5252_vm14 = vcmp.le.s32.totalorder %v9704_v46, 16  ;;  %v4968_v42 = vadd.s32 18, %v9708_v33  ;;  %v7005_v4 = vpop.f32.mrf.mxu0  ;;  %v9785_v12 = vsel %vm4926_vm6, %v4967_v23, %v4581_v28 }
 0x372   : > { %v5467_v6 = vsel %vm5441_vm13, %v5413_v13, 0.0  ;;  %vm4846_vm15 = vcmp.ne.s32.totalorder %v9746_v7, 0  ;;  %v9797_v54 = vsub.s32 %v9620_v49, %v4613_v16  ;;  %v3911_v26 = vadd.f32 %v3789_v57, %v8959_v59  ;;  %v6923_v53 = vpop.f32.mrf.mxu1  ;;  %vm9859_vm6 = vmand %vm5170_vm9, %vm5252_vm14 }
 0x373   : > { %v5468_v5 = vadd.f32 %v5467_v6, %v5466_v24  ;;  %v4306_v31 = vmax.f32 %v4265_v22, 0.0  ;;  %vm5171_vm0 = vcmp.ge.s32.totalorder %v9765_v38, 1  ;;  %v4624_v28 = vmul.u32 18, %v4623_v40  ;;  %v4144_v51 = vpop.f32.mrf.mxu0 }
 0x374   : > { %vm4887_vm3 = vcmp.lt.s32.totalorder %v9746_v7, 0  ;;  %v9803_v48 = vmul.u32.u64.low 3817748708, %v9772_v29  ;;  %v9804_v63 = vmul.u32.u64.high 3817748708, %v9772_v29, %v9803_v48  ;;  %v9807_v23 = vadd.s32 208, %v9142_v0  ;;  %v3797_v41 = vpop.f32.mrf.mxu1 }
 0x375   : > { %v5414_v49 = vsel %vm9778_vm12, %v4306_v31, 0.0  ;;  %v4266_v59 = vadd.f32 %v4144_v51, %v3911_v26  ;;  %vm5253_vm4 = vcmp.le.s32.totalorder %v9765_v38, 16  ;;  %v9815_v35 = vsel %vm9791_vm10, %v4968_v42, %v9708_v33  ;;  %v7006_v57 = vpop.f32.mrf.mxu0  ;;  %vm9835_vm5 = vmand %vm4887_vm3, %vm4846_vm15 }
 0x376   : > { %v5469_v36 = vsel %vm5441_vm13, %v5414_v49, 0.0  ;;  %v4969_v44 = vadd.s32 18, %v9746_v7  ;;  %vm4847_vm11 = vcmp.ne.s32.totalorder %v9797_v54, 0  ;;  %v4634_v16 = vshrl.u32 %v9755_v3, 4  ;;  %v6924_v14 = vpop.f32.mrf.mxu1  ;;  %vm9896_vm15 = vmand %vm5171_vm0, %vm5253_vm4 }
 0x377   : > { %v3912_v33 = vadd.f32 %v3794_v56, %v8968_v25  ;;  %v5470_v37 = vadd.f32 %v5469_v36, %v5468_v5  ;;  %v4307_v60 = vmax.f32 %v4266_v59, 0.0  ;;  %vm5172_vm1 = vcmp.ge.s32.totalorder %v9785_v12, 1  ;;  %v4149_v40 = vpop.f32.mrf.mxu0 }
 0x378   : > { %v9840_v24 = vsub.s32 %v9647_v15, %v4624_v28  ;;  %vm4888_vm7 = vcmp.lt.s32.totalorder %v9797_v54, 0  ;;  %v4645_v25 = vshrl.u32 %v9769_v52, 4  ;;  %vm5254_vm2 = vcmp.le.s32.totalorder %v9785_v12, 16  ;;  %v3802_v22 = vpop.f32.mrf.mxu1 }
 0x379   : > { %v9845_v3 = vmul.u32.u64.low 3817748708, %v9807_v23  ;;  %v9846_v18 = vmul.u32.u64.high 3817748708, %v9807_v23, %v9845_v3  ;;  %v5415_v9 = vsel %vm9822_vm8, %v4307_v60, 0.0  ;;  %v4267_v32 = vadd.f32 %v4149_v40, %v3912_v33  ;;  %v7009_v50 = vpop.f32.mrf.mxu0  ;;  %vm9875_vm9 = vmand %vm4888_vm7, %vm4847_vm11 }
 0x37a   : > { %v9852_v13 = vadd.s32 216, %v9142_v0  ;;  %v5471_v15 = vsel %vm5441_vm13, %v5415_v9, 0.0  ;;  %v9866_v42 = vsel %vm9835_vm5, %v4969_v44, %v9746_v7  ;;  %v4970_v6 = vadd.s32 18, %v9797_v54  ;;  %v6927_v7 = vpop.f32.mrf.mxu1  ;;  %vm9934_vm11 = vmand %vm5172_vm1, %vm5254_vm2 }
 0x37b   : > { %v4635_v56 = vmul.u32 18, %v4634_v16  ;;  %v3913_v4 = vadd.f32 %v3797_v41, %v8982_v39  ;;  %v5472_v11 = vadd.f32 %v5471_v15, %v5470_v37  ;;  %v4308_v26 = vmax.f32 %v4267_v32, 0.0  ;;  %v4152_v5 = vpop.f32.mrf.mxu0 }
 0x37c   : > { %vm5173_vm12 = vcmp.ge.s32.totalorder %v9815_v35, 1  ;;  %vm4848_vm14 = vcmp.ne.s32.totalorder %v9840_v24, 0  ;;  %vm4889_vm10 = vcmp.lt.s32.totalorder %v9840_v24, 0  ;;  %v4646_v31 = vmul.u32 18, %v4645_v25  ;;  %v3805_v36 = vpop.f32.mrf.mxu1 }
 0x37d   : > { %v4656_v39 = vshrl.u32 %v9804_v63, 4  ;;  %v9883_v28 = vadd.s32 224, %v9142_v0  ;;  %v5416_v53 = vsel %vm9859_vm6, %v4308_v26, 0.0  ;;  %v4268_v51 = vadd.f32 %v4152_v5, %v3913_v4  ;;  %v7010_v41 = vpop.f32.mrf.mxu0  ;;  %vm9914_vm0 = vmand %vm4889_vm10, %vm4848_vm14 }
 0x37e   : > { %v9888_v48 = vmul.u32.u64.low 3817748708, %v9852_v13  ;;  %v9889_v49 = vmul.u32.u64.high 3817748708, %v9852_v13, %v9888_v48  ;;  %v5473_v59 = vsel %vm5441_vm13, %v5416_v53, 0.0  ;;  %vm5255_vm3 = vcmp.le.s32.totalorder %v9815_v35, 16  ;;  %v6928_v37 = vpop.f32.mrf.mxu1 }
 0x37f   : > { %v9904_v10 = vsel %vm9875_vm9, %v4970_v6, %v9797_v54  ;;  %v4636_v57 = vsub.s32 %v9725_v21, %v4635_v56  ;;  %v3914_v44 = vadd.f32 %v3802_v22, %v8992_v62  ;;  %v5474_v16 = vadd.f32 %v5473_v59, %v5472_v11  ;;  %v4157_v60 = vpop.f32.mrf.mxu0  ;;  %vm5296_vm10 = vmand %vm5173_vm12, %vm5255_vm3 }
 0x380   : > { %v4309_v33 = vmax.f32 %v4268_v51, 0.0  ;;  %vm5174_vm8 = vcmp.ge.s32.totalorder %v9866_v42, 1  ;;  %v4971_v38 = vadd.s32 18, %v9840_v24  ;;  %v9919_v21 = vsub.s32 %v9732_v58, %v4646_v31  ;;  %v3810_v32 = vpop.f32.mrf.mxu1 }
 0x381   : > { %v4657_v62 = vmul.u32 18, %v4656_v39  ;;  %v9922_v54 = vmul.u32.u64.low 3817748708, %v9883_v28  ;;  %v9923_v14 = vmul.u32.u64.high 3817748708, %v9883_v28, %v9922_v54  ;;  %v4269_v25 = vadd.f32 %v4157_v60, %v3914_v44  ;;  %v7013_v15 = vpop.f32.mrf.mxu0 }
 0x382   : > { %v5417_v40 = vsel %vm9896_vm15, %v4309_v33, 0.0  ;;  %vm5256_vm4 = vcmp.le.s32.totalorder %v9866_v42, 16  ;;  %v4667_v3 = vshrl.u32 %v9846_v18, 4  ;;  %vm4849_vm5 = vcmp.ne.s32.totalorder %v4636_v57, 0  ;;  %v6931_v6 = vpop.f32.mrf.mxu1 }
 0x383   : > { %v5475_v9 = vsel %vm5441_vm13, %v5417_v40, 0.0  ;;  %vm4890_vm7 = vcmp.lt.s32.totalorder %v4636_v57, 0  ;;  %v9939_v22 = vadd.s32 232, %v9142_v0  ;;  %v3915_v52 = vadd.f32 %v3805_v36, %v9003_v34  ;;  %v4160_v56 = vpop.f32.mrf.mxu0 }
 0x384   : > { %v5476_v18 = vadd.f32 %v5475_v9, %v5474_v16  ;;  %v4310_v50 = vmax.f32 %v4269_v25, 0.0  ;;  %vm5175_vm6 = vcmp.ge.s32.totalorder %v9904_v10, 1  ;;  %vm5257_vm9 = vcmp.le.s32.totalorder %v9904_v10, 16  ;;  %vm9958_vm14 = vmand %vm4890_vm7, %vm4849_vm5  ;;  %v3813_v31 = vpop.f32.mrf.mxu1 }
 0x385   : > { %v9947_v12 = vsel %vm9914_vm0, %v4971_v38, %v9840_v24  ;;  %v4972_v4 = vadd.s32 18, %v4636_v57  ;;  %vm4850_vm1 = vcmp.ne.s32.totalorder %v9919_v21, 0  ;;  %vm4891_vm2 = vcmp.lt.s32.totalorder %v9919_v21, 0  ;;  %vm9999_vm5 = vmand %vm5174_vm8, %vm5256_vm4 }
 0x386   : > { %v9952_v34 = vsub.s32 %v9772_v29, %v4657_v62  ;;  %v5418_v11 = vsel %vm9934_vm11, %v4310_v50, 0.0  ;;  %v4270_v26 = vadd.f32 %v4160_v56, %v3915_v52  ;;  %v4668_v24 = vmul.u32 18, %v4667_v3  ;;  %v7014_v29 = vpop.f32.mrf.mxu0  ;;  %v6932_v36 = vpop.f32.mrf.mxu1  ;;  %vm9989_vm3 = vmand %vm4891_vm2, %vm4850_vm1 }
 0x387   : > { %v4678_v7 = vshrl.u32 %v9889_v49, 4  ;;  %v5477_v5 = vsel %vm5441_vm13, %v5418_v11, 0.0  ;;  %v9969_v39 = vmul.u32.u64.low 3817748708, %v9939_v22  ;;  %v9970_v53 = vmul.u32.u64.high 3817748708, %v9939_v22, %v9969_v39  ;;  %vm10036_vm1 = vmand %vm5175_vm6, %vm5257_vm9 }
 0x388   : > { %v9973_v51 = vadd.s32 240, %v9142_v0  ;;  %v3916_v48 = vadd.f32 %v3810_v32, %v9015_v8  ;;  %v5478_v59 = vadd.f32 %v5477_v5, %v5476_v18  ;;  %v4311_v49 = vmax.f32 %v4270_v26, 0.0  ;;  %v4165_v63 = vpop.f32.mrf.mxu0  ;;  %v3818_v37 = vpop.f32.mrf.mxu1 }
 0x389   : > { %vm5176_vm15 = vcmp.ge.s32.totalorder %v9947_v12, 1  ;;  %vm5258_vm0 = vcmp.le.s32.totalorder %v9947_v12, 16  ;;  %v9980_v35 = vsel %vm9958_vm14, %v4972_v4, %v4636_v57  ;;  %v4973_v41 = vadd.s32 18, %v9919_v21 }
 0x38a   : > { %vm4851_vm12 = vcmp.ne.s32.totalorder %v9952_v34, 0  ;;  %v4689_v44 = vshrl.u32 %v9923_v14, 4  ;;  %v5419_v16 = vsel %vm5296_vm10, %v4311_v49, 0.0  ;;  %v4271_v8 = vadd.f32 %v4165_v63, %v3916_v48  ;;  %v7017_v47 = vpop.f32.mrf.mxu0  ;;  %v6935_v32 = vpop.f32.mrf.mxu1 }
 0x38b   : > { %vm4892_vm11 = vcmp.lt.s32.totalorder %v9952_v34, 0  ;;  %v4679_v57 = vmul.u32 18, %v4678_v7  ;;  %v5479_v38 = vsel %vm5441_vm13, %v5419_v16, 0.0  ;;  %v4669_v62 = vsub.s32 %v9807_v23, %v4668_v24 }
 0x38c   : > { %v10005_v54 = vmul.u32.u64.low 3817748708, %v9973_v51  ;;  %v10006_v14 = vmul.u32.u64.high 3817748708, %v9973_v51, %v10005_v54  ;;  %v3917_v40 = vadd.f32 %v3813_v31, %v9027_v20  ;;  %v5480_v25 = vadd.f32 %v5479_v38, %v5478_v59  ;;  %v4168_v58 = vpop.f32.mrf.mxu0  ;;  %vm10020_vm4 = vmand %vm4892_vm11, %vm4851_vm12  ;;  %v3821_v6 = vpop.f32.mrf.mxu1 }
 0x38d   : > { %v4312_v3 = vmax.f32 %v4271_v8, 0.0  ;;  %v4974_v9 = vadd.s32 18, %v9952_v34  ;;  %vm5177_vm8 = vcmp.ge.s32.totalorder %v9980_v35, 1  ;;  %v10014_v42 = vsel %vm9989_vm3, %v4973_v41, %v9919_v21  ;;  %vm5299_vm3 = vmand %vm5176_vm15, %vm5258_vm0 }
 0x38e   : > { %v4690_v20 = vmul.u32 18, %v4689_v44  ;;  %v10025_v15 = vadd.s32 248, %v9142_v0  ;;  %v4272_v18 = vadd.f32 %v4168_v58, %v3917_v40  ;;  %vm5259_vm7 = vcmp.le.s32.totalorder %v9980_v35, 16  ;;  %v7018_v4 = vpop.f32.mrf.mxu0  ;;  %v6936_v24 = vpop.f32.mrf.mxu1 }
 0x38f   : > { %v5420_v52 = vsel %vm9999_vm5, %v4312_v3, 0.0  ;;  %v4680_v21 = vsub.s32 %v9852_v13, %v4679_v57  ;;  %vm4852_vm2 = vcmp.ne.s32.totalorder %v4669_v62, 0  ;;  %vm4893_vm14 = vcmp.lt.s32.totalorder %v4669_v62, 0 }
 0x390   : > { %v5481_v50 = vsel %vm5441_vm13, %v5420_v52, 0.0  ;;  %v4700_v11 = vshrl.u32 %v9970_v53, 4  ;;  %v3918_v26 = vadd.f32 %v3818_v37, %v9036_v45  ;;  %v4313_v13 = vmax.f32 %v4272_v18, 0.0  ;;  %v4173_v7 = vpop.f32.mrf.mxu0  ;;  %vm10060_vm6 = vmand %vm4893_vm14, %vm4852_vm2  ;;  %v3826_v59 = vpop.f32.mrf.mxu1 }
 0x391   : > { %v5482_v46 = vadd.f32 %v5481_v50, %v5480_v25  ;;  %vm5178_vm10 = vcmp.ge.s32.totalorder %v10014_v42, 1  ;;  %vm5260_vm12 = vcmp.le.s32.totalorder %v10014_v42, 16  ;;  %v10047_v10 = vsel %vm10020_vm4, %v4974_v9, %v9952_v34  ;;  %vm5300_vm4 = vmand %vm5177_vm8, %vm5259_vm7 }
 0x392   : > { %v4975_v5 = vadd.s32 18, %v4669_v62  ;;  %v10050_v31 = vsub.s32 %v9883_v28, %v4690_v20  ;;  %v10053_v29 = vmul.u32.u64.low 3817748708, %v10025_v15  ;;  %v10054_v45 = vmul.u32.u64.high 3817748708, %v10025_v15, %v10053_v29  ;;  %v7021_v49 = vpop.f32.mrf.mxu0  ;;  %v6939_v8 = vpop.f32.mrf.mxu1  ;;  %vm10126_vm14 = vmand %vm5178_vm10, %vm5260_vm12 }
 0x393   : > { %v5421_v39 = vsel %vm10036_vm1, %v4313_v13, 0.0  ;;  %v4273_v53 = vadd.f32 %v4173_v7, %v3918_v26  ;;  %vm4853_vm9 = vcmp.ne.s32.totalorder %v4680_v21, 0  ;;  %v10065_v34 = vadd.s32 256, %v9142_v0 }
 0x394   : > { %v5483_v28 = vsel %vm5441_vm13, %v5421_v39, 0.0  ;;  %vm4894_vm11 = vcmp.lt.s32.totalorder %v4680_v21, 0  ;;  %v4701_v36 = vmul.u32 18, %v4700_v11  ;;  %v4711_v63 = vshrl.u32 %v10006_v14, 4  ;;  %v4176_v33 = vpop.f32.mrf.mxu0  ;;  %v3829_v14 = vpop.f32.mrf.mxu1 }
 0x395   : > { %v3919_v41 = vadd.f32 %v3821_v6, %v9047_v61  ;;  %v5484_v44 = vadd.f32 %v5483_v28, %v5482_v46  ;;  %v4314_v16 = vmax.f32 %v4273_v53, 0.0  ;;  %vm5179_vm5 = vcmp.ge.s32.totalorder %v10047_v10, 1  ;;  %vm10085_vm0 = vmand %vm4894_vm11, %vm4853_vm9 }
 0x396   : > { %v10077_v57 = vsel %vm10060_vm6, %v4975_v5, %v4669_v62  ;;  %v4976_v38 = vadd.s32 18, %v4680_v21  ;;  %vm4854_vm15 = vcmp.ne.s32.totalorder %v10050_v31, 0  ;;  %v10081_v12 = vadd.s32 264, %v9142_v0  ;;  %v7022_v40 = vpop.f32.mrf.mxu0  ;;  %v6940_v23 = vpop.f32.mrf.mxu1 }
 0x397   : > { %v5422_v37 = vsel %vm5299_vm3, %v4314_v16, 0.0  ;;  %v4274_v60 = vadd.f32 %v4176_v33, %v3919_v41  ;;  %v10090_v47 = vmul.u32.u64.low 3817748708, %v10065_v34  ;;  %v10091_v54 = vmul.u32.u64.high 3817748708, %v10065_v34, %v10090_v47 }
 0x398   : > { %v5485_v62 = vsel %vm5441_vm13, %v5422_v37, 0.0  ;;  %vm4895_vm1 = vcmp.lt.s32.totalorder %v10050_v31, 0  ;;  %v4702_v25 = vsub.s32 %v9939_v22, %v4701_v36  ;;  %v4712_v3 = vmul.u32 18, %v4711_v63  ;;  %v4181_v20 = vpop.f32.mrf.mxu0  ;;  %v3834_v4 = vpop.f32.mrf.mxu1 }
 0x399   : > { %v3920_v9 = vadd.f32 %v3826_v59, %v9059_v27  ;;  %v5486_v32 = vadd.f32 %v5485_v62, %v5484_v44  ;;  %v4315_v58 = vmax.f32 %v4274_v60, 0.0  ;;  %vm5261_vm2 = vcmp.le.s32.totalorder %v10047_v10, 16  ;;  %vm10116_vm7 = vmand %vm4895_vm1, %vm4854_vm15 }
 0x39a   : > { %v10104_v52 = vsel %vm10085_vm0, %v4976_v38, %v4680_v21  ;;  %v4977_v35 = vadd.s32 18, %v10050_v31  ;;  %v10108_v18 = vmul.u32.u64.low 3817748708, %v10081_v12  ;;  %v10109_v50 = vmul.u32.u64.high 3817748708, %v10081_v12, %v10108_v18  ;;  %v7025_v26 = vpop.f32.mrf.mxu0  ;;  %v6943_v5 = vpop.f32.mrf.mxu1  ;;  %vm10149_vm12 = vmand %vm5179_vm5, %vm5261_vm2 }
 0x39b   : > { %v5423_v22 = vsel %vm5300_vm4, %v4315_v58, 0.0  ;;  %v4275_v6 = vadd.f32 %v4181_v20, %v3920_v9  ;;  %vm5180_vm8 = vcmp.ge.s32.totalorder %v10077_v57, 1  ;;  %v4722_v21 = vshrl.u32 %v10054_v45, 4 }
 0x39c   : > { %v5487_v56 = vsel %vm5441_vm13, %v5423_v22, 0.0  ;;  %vm5262_vm6 = vcmp.le.s32.totalorder %v10077_v57, 16  ;;  %vm4855_vm9 = vcmp.ne.s32.totalorder %v4702_v25, 0  ;;  %v4713_v46 = vsub.s32 %v9973_v51, %v4712_v3  ;;  %v4184_v29 = vpop.f32.mrf.mxu0  ;;  %v3837_v59 = vpop.f32.mrf.mxu1 }
 0x39d   : > { %v3921_v13 = vadd.f32 %v3829_v14, %v9071_v30  ;;  %v5488_v24 = vadd.f32 %v5487_v56, %v5486_v32  ;;  %v4316_v7 = vmax.f32 %v4275_v6, 0.0  ;;  %vm5181_vm3 = vcmp.ge.s32.totalorder %v10104_v52, 1  ;;  %vm5303_vm2 = vmand %vm5180_vm8, %vm5262_vm6 }
 0x39e   : > { %vm4896_vm11 = vcmp.lt.s32.totalorder %v4702_v25, 0  ;;  %vm5263_vm10 = vcmp.le.s32.totalorder %v10104_v52, 16  ;;  %v10138_v42 = vsel %vm10116_vm7, %v4977_v35, %v10050_v31  ;;  %v4978_v45 = vadd.s32 18, %v4702_v25  ;;  %v7026_v49 = vpop.f32.mrf.mxu0  ;;  %v6944_v44 = vpop.f32.mrf.mxu1 }
 0x39f   : > { %v10141_v39 = vadd.s32 272, %v9142_v0  ;;  %v5424_v30 = vsel %vm10126_vm14, %v4316_v7, 0.0  ;;  %v4276_v51 = vadd.f32 %v4184_v29, %v3921_v13  ;;  %v4723_v48 = vmul.u32 18, %v4722_v21  ;;  %vm4937_vm15 = vmand %vm4896_vm11, %vm4855_vm9 }
 0x3a0   : > { %v4733_v31 = vshrl.u32 %v10091_v54, 4  ;;  %v5489_v28 = vsel %vm5441_vm13, %v5424_v30, 0.0  ;;  %vm4856_vm0 = vcmp.ne.s32.totalorder %v4713_v46, 0  ;;  %vm4897_vm4 = vcmp.lt.s32.totalorder %v4713_v46, 0  ;;  %v4189_v16 = vpop.f32.mrf.mxu0  ;;  %v3842_v62 = vpop.f32.mrf.mxu1  ;;  %vm5304_vm6 = vmand %vm5181_vm3, %vm5263_vm10 }
 0x3a1   : > { %v10158_v36 = vadd.s32 280, %v9142_v0  ;;  %v3922_v10 = vadd.f32 %v3834_v4, %v9080_v55  ;;  %v5490_v63 = vadd.f32 %v5489_v28, %v5488_v24  ;;  %v4317_v41 = vmax.f32 %v4276_v51, 0.0  ;;  %vm4938_vm1 = vmand %vm4897_vm4, %vm4856_vm0 }
 0x3a2   : > { %vm5182_vm5 = vcmp.ge.s32.totalorder %v10138_v42, 1  ;;  %v4979_v8 = vadd.s32 18, %v4713_v46  ;;  %v4744_v33 = vshrl.u32 %v10109_v50, 4  ;;  %v10169_v47 = vsel %vm4937_vm15, %v4978_v45, %v4702_v25  ;;  %v7029_v14 = vpop.f32.mrf.mxu0  ;;  %v6947_v23 = vpop.f32.mrf.mxu1 }
 0x3a3   : > { %v10164_v38 = vmul.u32.u64.low 3817748708, %v10141_v39  ;;  %v10165_v37 = vmul.u32.u64.high 3817748708, %v10141_v39, %v10164_v38  ;;  %v5425_v60 = vsel %vm10149_vm12, %v4317_v41, 0.0  ;;  %v4277_v61 = vadd.f32 %v4189_v16, %v3922_v10 }
 0x3a4   : > { %v4734_v55 = vmul.u32 18, %v4733_v31  ;;  %v5491_v54 = vsel %vm5441_vm13, %v5425_v60, 0.0  ;;  %v10178_v40 = vsub.s32 %v10025_v15, %v4723_v48  ;;  %v3923_v25 = vadd.f32 %v3837_v59, %v9094_v19  ;;  %v4192_v20 = vpop.f32.mrf.mxu0  ;;  %v3845_v6 = vpop.f32.mrf.mxu1 }
 0x3a5   : > { %v10181_v3 = vmul.u32.u64.low 3817748708, %v10158_v36  ;;  %v10182_v9 = vmul.u32.u64.high 3817748708, %v10158_v36, %v10181_v3  ;;  %v5492_v32 = vadd.f32 %v5491_v54, %v5490_v63  ;;  %v4318_v58 = vmax.f32 %v4277_v61, 0.0 }
 0x3a6   : > { %vm5264_vm7 = vcmp.le.s32.totalorder %v10138_v42, 16  ;;  %vm5183_vm14 = vcmp.ge.s32.totalorder %v10169_v47, 1  ;;  %v10187_v57 = vsel %vm4938_vm1, %v4979_v8, %v4713_v46  ;;  %v4745_v35 = vmul.u32 18, %v4744_v33  ;;  %v7030_v27 = vpop.f32.mrf.mxu0 }
 0x3a7   : > { %v10190_v15 = vadd.s32 288, %v9142_v0  ;;  %v5426_v18 = vsel %vm5303_vm2, %v4318_v58, 0.0  ;;  %v4278_v50 = vadd.f32 %v4192_v20, %v3923_v25  ;;  %vm5265_vm8 = vcmp.le.s32.totalorder %v10169_v47, 16  ;;  %vm10220_vm10 = vmand %vm5182_vm5, %vm5264_vm7 }
 0x3a8   : > { %v4735_v19 = vsub.s32 %v10065_v34, %v4734_v55  ;;  %v5493_v22 = vsel %vm5441_vm13, %v5426_v18, 0.0  ;;  %vm4857_vm9 = vcmp.ne.s32.totalorder %v10178_v40, 0  ;;  %vm4898_vm11 = vcmp.lt.s32.totalorder %v10178_v40, 0  ;;  %v6948_v34 = vpop.f32.mrf.mxu1  ;;  %v4197_v26 = vpop.f32.mrf.mxu0  ;;  %vm5306_vm7 = vmand %vm5183_vm14, %vm5265_vm8 }
 0x3a9   : > { %v4980_v21 = vadd.s32 18, %v10178_v40  ;;  %v3924_v56 = vadd.f32 %v3842_v62, %v9101_v43  ;;  %v5494_v4 = vadd.f32 %v5493_v22, %v5492_v32  ;;  %v4319_v11 = vmax.f32 %v4278_v50, 0.0  ;;  %vm10234_vm4 = vmand %vm4898_vm11, %vm4857_vm9 }
 0x3aa   : > { %vm5184_vm12 = vcmp.ge.s32.totalorder %v10187_v57, 1  ;;  %v10205_v46 = vsub.s32 %v10081_v12, %v4745_v35  ;;  %v4755_v52 = vshrl.u32 %v10165_v37, 4  ;;  %vm4858_vm3 = vcmp.ne.s32.totalorder %v4735_v19, 0  ;;  %v3850_v45 = vpop.f32.mrf.mxu1  ;;  %v7033_v30 = vpop.f32.mrf.mxu0 }
 0x3ab   : > { %v10209_v13 = vmul.u32.u64.low 3817748708, %v10190_v15  ;;  %v10210_v24 = vmul.u32.u64.high 3817748708, %v10190_v15, %v10209_v13  ;;  %v5427_v7 = vsel %vm5304_vm6, %v4319_v11, 0.0  ;;  %v4279_v5 = vadd.f32 %v4197_v26, %v3924_v56 }
 0x3ac   : > { %v10213_v43 = vadd.s32 296, %v9142_v0  ;;  %v5495_v29 = vsel %vm5441_vm13, %v5427_v7, 0.0  ;;  %vm4899_vm15 = vcmp.lt.s32.totalorder %v4735_v19, 0  ;;  %v4766_v51 = vshrl.u32 %v10182_v9, 4  ;;  %v6951_v59 = vpop.f32.mrf.mxu1  ;;  %v4200_v49 = vpop.f32.mrf.mxu0 }
 0x3ad   : > { %v10226_v53 = vadd.s32 304, %v9142_v0  ;;  %v3925_v48 = vadd.f32 %v3845_v6, %v9110_v1  ;;  %v5496_v31 = vadd.f32 %v5495_v29, %v5494_v4  ;;  %v4320_v28 = vmax.f32 %v4279_v5, 0.0  ;;  %vm4940_vm2 = vmand %vm4899_vm15, %vm4858_vm3 }
 0x3ae   : > { %vm5266_vm0 = vcmp.le.s32.totalorder %v10187_v57, 16  ;;  %v4981_v10 = vadd.s32 18, %v4735_v19  ;;  %vm4859_vm5 = vcmp.ne.s32.totalorder %v10205_v46, 0  ;;  %vm4900_vm1 = vcmp.lt.s32.totalorder %v10205_v46, 0  ;;  %v3853_v8 = vpop.f32.mrf.mxu1  ;;  %v7034_v33 = vpop.f32.mrf.mxu0 }
 0x3af   : > { %v4756_v1 = vmul.u32 18, %v4755_v52  ;;  %v5428_v0 = vsel %vm10220_vm10, %v4320_v28, 0.0  ;;  %v4280_v63 = vadd.f32 %v4200_v49, %v3925_v48  ;;  %v4767_v38 = vmul.u32 18, %v4766_v51  ;;  %vm10268_vm14 = vmand %vm4900_vm1, %vm4859_vm5  ;;  %v10554_v52 = vld [vmem:[#allocation10_spill] sm:$0xff] }
 0x3b0   : > { %v10245_v41 = vmul.u32.u64.low 3817748708, %v10213_v43  ;;  %v10246_v44 = vmul.u32.u64.high 3817748708, %v10213_v43, %v10245_v41  ;;  %v5497_v16 = vsel %vm5441_vm13, %v5428_v0, 0.0  ;;  %v3926_v61 = vadd.f32 %v3850_v45, %v9116_v17  ;;  %v6952_v14 = vpop.f32.mrf.mxu1  ;;  %v4205_v3 = vpop.f32.mrf.mxu0  ;;  %vm10277_vm8 = vmand %vm5184_vm12, %vm5266_vm0 }
 0x3b1   : > { %v10254_v37 = vmul.u32.u64.low 3817748708, %v10226_v53  ;;  %v10255_v60 = vmul.u32.u64.high 3817748708, %v10226_v53, %v10254_v37  ;;  %v5498_v55 = vadd.f32 %v5497_v16, %v5496_v31  ;;  %v4321_v54 = vmax.f32 %v4280_v63, 0.0  ;;  %v10560_v14 = vld [vmem:[#allocation9_spill] sm:$0xff] }
 0x3b2   : > { %v5021_v62 = vsel %vm10234_vm4, %v4980_v21, %v10178_v40  ;;  %v5022_v9 = vsel %vm4940_vm2, %v4981_v10, %v4735_v19  ;;  %v4982_v47 = vadd.s32 18, %v10205_v46  ;;  %v4757_v25 = vsub.s32 %v10141_v39, %v4756_v1  ;;  %v3858_v20 = vpop.f32.mrf.mxu1  ;;  %v7037_v35 = vpop.f32.mrf.mxu0  ;;  %v10559_v10 = vld [vmem:[#allocation8_spill] sm:$0xff] }
 0x3b3   : > { %v4777_v32 = vshrl.u32 %v10210_v24, 4  ;;  %v5429_v58 = vsel %vm5306_vm7, %v4321_v54, 0.0  ;;  %v4281_v23 = vadd.f32 %v4205_v3, %v3926_v61  ;;  %vm5185_vm6 = vcmp.ge.s32.totalorder %v5021_v62, 1  ;;  %v10561_v35 = vld [vmem:[#allocation11_spill] sm:$0xff] }
 0x3b4   : > { %v5499_v40 = vsel %vm5441_vm13, %v5429_v58, 0.0  ;;  %vm5267_vm9 = vcmp.le.s32.totalorder %v5021_v62, 16  ;;  %v4768_v18 = vsub.s32 %v10158_v36, %v4767_v38  ;;  %v3927_v50 = vadd.f32 %v3853_v8, %v9128_v2  ;;  %v6955_v6 = vpop.f32.mrf.mxu1  ;;  %v4208_v27 = vpop.f32.mrf.mxu0 }
 0x3b5   : > { %v5500_v19 = vadd.f32 %v5499_v40, %v5498_v55  ;;  %v4322_v22 = vmax.f32 %v4281_v23, 0.0  ;;  %vm5186_vm11 = vcmp.ge.s32.totalorder %v5022_v9, 1  ;;  %vm5268_vm3 = vcmp.le.s32.totalorder %v5022_v9, 16  ;;  %vm5308_vm15 = vmand %vm5185_vm6, %vm5267_vm9 }
 0x3b6   : > { %v5023_v57 = vsel %vm10268_vm14, %v4982_v47, %v10205_v46  ;;  %vm4860_vm12 = vcmp.ne.s32.totalorder %v4757_v25, 0  ;;  %v4778_v21 = vmul.u32 18, %v4777_v32  ;;  %v4282_v4 = vadd.f32 %v4208_v27, %v3927_v50  ;;  %v3861_v11 = vpop.f32.mrf.mxu1  ;;  %v7038_v34 = vpop.f32.mrf.mxu0  ;;  %vm10303_vm1 = vmand %vm5186_vm11, %vm5268_vm3 }
 0x3b7   : > { %v5430_v56 = vsel %vm10277_vm8, %v4322_v22, 0.0  ;;  %vm4901_vm10 = vcmp.lt.s32.totalorder %v4757_v25, 0  ;;  %v4788_v36 = vshrl.u32 %v10246_v44, 4  ;;  %v4983_v26 = vadd.s32 18, %v4757_v25 }
 0x3b8   : > { %v5501_v2 = vsel %vm5441_vm13, %v5430_v56, 0.0  ;;  %vm4861_vm0 = vcmp.ne.s32.totalorder %v4768_v18, 0  ;;  %v4799_v46 = vshrl.u32 %v10255_v60, 4  ;;  %v3928_v13 = vadd.f32 %v3858_v20, %v10554_v52  ;;  %v6956_v5 = vpop.f32.mrf.mxu1  ;;  %v4213_v29 = vpop.f32.mrf.mxu0  ;;  %vm10296_vm5 = vmand %vm4901_vm10, %vm4860_vm12 }
 0x3b9   : > { %v5502_v24 = vadd.f32 %v5501_v2, %v5500_v19  ;;  %v4323_v7 = vmax.f32 %v4282_v4, 0.0  ;;  %vm4902_vm4 = vcmp.lt.s32.totalorder %v4768_v18, 0  ;;  %v4779_v12 = vsub.s32 %v10190_v15, %v4778_v21  ;;  %v10562_v2 = vld [vmem:[#allocation12_spill] sm:$0xff] }
 0x3ba   : > { %v4283_v51 = vadd.f32 %v4213_v29, %v3928_v13  ;;  %v4984_v31 = vadd.s32 18, %v4768_v18  ;;  %v4789_v28 = vmul.u32 18, %v4788_v36  ;;  %v3866_v49 = vpop.f32.mrf.mxu1  ;;  %v7041_v42 = vpop.f32.mrf.mxu0  ;;  %vm5187_vm2 = vcmp.ge.s32.totalorder %v5023_v57, 1  ;;  %vm4943_vm14 = vmand %vm4902_vm4, %vm4861_vm0 }
 0x3bb   : > { %v5431_v30 = vsel %vm5308_vm15, %v4323_v7, 0.0  ;;  %vm5269_vm7 = vcmp.le.s32.totalorder %v5023_v57, 16  ;;  %v4800_v15 = vmul.u32 18, %v4799_v46  ;;  %v3929_v1 = vadd.f32 %v3861_v11, %v10559_v10 }
 0x3bc   : > { %v5503_v59 = vsel %vm5441_vm13, %v5431_v30, 0.0  ;;  %v4324_v63 = vmax.f32 %v4283_v51, 0.0  ;;  %v5024_v41 = vsel %vm10296_vm5, %v4983_v26, %v4757_v25  ;;  %v6959_v44 = vpop.f32.mrf.mxu1  ;;  %v4216_v16 = vpop.f32.mrf.mxu0  ;;  %vm4862_vm8 = vcmp.ne.s32.totalorder %v4779_v12, 0  ;;  %vm5310_vm9 = vmand %vm5187_vm2, %vm5269_vm7  ;;  %v10563_v30 = vld [vmem:[#allocation13_spill] sm:$0xff] }
 0x3bd   : > { %v5504_v0 = vadd.f32 %v5503_v59, %v5502_v24  ;;  %vm4903_vm6 = vcmp.lt.s32.totalorder %v4779_v12, 0  ;;  %v4284_v33 = vadd.f32 %v4216_v16, %v3929_v1  ;;  %v5025_v38 = vsel %vm4943_vm14, %v4984_v31, %v4768_v18 }
 0x3be   : > { %v5432_v8 = vsel %vm10303_vm1, %v4324_v63, 0.0  ;;  %v4790_v37 = vsub.s32 %v10213_v43, %v4789_v28  ;;  %v3869_v61 = vpop.f32.mrf.mxu1  ;;  %v7042_v55 = vpop.f32.mrf.mxu0  ;;  %vm5188_vm11 = vcmp.ge.s32.totalorder %v5024_v41, 1  ;;  %v4985_v54 = vadd.s32 18, %v4779_v12  ;;  %vm4944_vm12 = vmand %vm4903_vm6, %vm4862_vm8 }
 0x3bf   : > { %v5505_v60 = vsel %vm5441_vm13, %v5432_v8, 0.0  ;;  %v4801_v62 = vsub.s32 %v10226_v53, %v4800_v15  ;;  %v3930_v3 = vadd.f32 %v3866_v49, %v10560_v14  ;;  %v4325_v47 = vmax.f32 %v4284_v33, 0.0 }
 0x3c0   : > { %v5506_v9 = vadd.f32 %v5505_v60, %v5504_v0  ;;  %vm5270_vm3 = vcmp.le.s32.totalorder %v5024_v41, 16  ;;  %v6960_v43 = vpop.f32.mrf.mxu1  ;;  %v4221_v25 = vpop.f32.mrf.mxu0  ;;  %vm5189_vm10 = vcmp.ge.s32.totalorder %v5025_v38, 1  ;;  %vm5271_vm15 = vcmp.le.s32.totalorder %v5025_v38, 16  ;;  %v10564_v0 = vld [vmem:[#allocation14_spill] sm:$0xff] }
 0x3c1   : > { %v5433_v32 = vsel %vm5310_vm9, %v4325_v47, 0.0  ;;  %v4285_v58 = vadd.f32 %v4221_v25, %v3930_v3  ;;  %vm4863_vm0 = vcmp.ne.s32.totalorder %v4790_v37, 0  ;;  %vm4904_vm4 = vcmp.lt.s32.totalorder %v4790_v37, 0  ;;  %vm5311_vm5 = vmand %vm5188_vm11, %vm5270_vm3 }
 0x3c2   : > { %v5507_v23 = vsel %vm5441_vm13, %v5433_v32, 0.0  ;;  %v3874_v17 = vpop.f32.mrf.mxu1  ;;  %v7045_v40 = vpop.f32.mrf.mxu0  ;;  %v5026_v20 = vsel %vm4944_vm12, %v4985_v54, %v4779_v12  ;;  %v4986_v39 = vadd.s32 18, %v4790_v37  ;;  %vm4864_vm1 = vcmp.ne.s32.totalorder %v4801_v62, 0  ;;  %vm4945_vm7 = vmand %vm4904_vm4, %vm4863_vm0 }
 0x3c3   : > { %v3931_v18 = vadd.f32 %v3869_v61, %v10561_v35  ;;  %v5508_v50 = vadd.f32 %v5507_v23, %v5506_v9  ;;  %v4326_v19 = vmax.f32 %v4285_v58, 0.0  ;;  %vm4905_vm2 = vcmp.lt.s32.totalorder %v4801_v62, 0  ;;  %vm5312_vm14 = vmand %vm5189_vm10, %vm5271_vm15 }
 0x3c4   : > { %v6963_v22 = vpop.f32.mrf.mxu1  ;;  %v4224_v6 = vpop.f32.mrf.mxu0  ;;  %v4987_v21 = vadd.s32 18, %v4801_v62  ;;  %vm5190_vm8 = vcmp.ge.s32.totalorder %v5026_v20, 1  ;;  %vm5272_vm6 = vcmp.le.s32.totalorder %v5026_v20, 16  ;;  %vm4946_vm9 = vmand %vm4905_vm2, %vm4864_vm1  ;;  %v3932_v11 = vadd.f32 %v3874_v17, %v10562_v2 }
 0x3c5   : > { %v5434_v27 = vsel %vm5311_vm5, %v4326_v19, 0.0  ;;  %v4286_v57 = vadd.f32 %v4224_v6, %v3931_v18  ;;  %v5027_v46 = vsel %vm4945_vm7, %v4986_v39, %v4790_v37  ;;  %vm5313_vm11 = vmand %vm5190_vm8, %vm5272_vm6  ;;  %vm5110_vm10 = vcmp.lt.s32.totalorder %v10226_v53, 306 }
 0x3c6   : > { %v5509_v56 = vsel %vm5441_vm13, %v5434_v27, 0.0  ;;  %v3877_v4 = vpop.f32.mrf.mxu1  ;;  %v7046_v36 = vpop.f32.mrf.mxu0  ;;  %v5028_v5 = vsel %vm4946_vm9, %v4987_v21, %v4801_v62  ;;  %vm5191_vm3 = vcmp.ge.s32.totalorder %v5027_v46, 1  ;;  %vm5273_vm12 = vcmp.le.s32.totalorder %v5027_v46, 16 }
 0x3c7   : > { %v5510_v34 = vadd.f32 %v5509_v56, %v5508_v50  ;;  %v4327_v26 = vmax.f32 %v4286_v57, 0.0  ;;  %v3933_v51 = vadd.f32 %v3877_v4, %v10563_v30  ;;  %vm5192_vm15 = vcmp.ge.s32.totalorder %v5028_v5, 1  ;;  %vm5314_vm0 = vmand %vm5191_vm3, %vm5273_vm12 }
 0x3c8   : > { %v6964_v52 = vpop.f32.mrf.mxu1  ;;  %v4229_v13 = vpop.f32.mrf.mxu0  ;;  %vm5233_vm4 = vmand %vm5110_vm10, %vm5192_vm15  ;;  %vm5274_vm5 = vcmp.le.s32.totalorder %v5028_v5, 16  ;;  %vm5531_vm2 = vcmask 778240  }
 0x3c9   : > { %v5435_v24 = vsel %vm5312_vm14, %v4327_v26, 0.0  ;;  %v4287_v7 = vadd.f32 %v4229_v13, %v3932_v11  ;;  %vm5315_vm1 = vmand %vm5233_vm4, %vm5274_vm5 }
 0x3ca   : > { %v5511_v29 = vsel %vm5441_vm13, %v5435_v24, 0.0  ;;  %v3882_v45 = vpop.f32.mrf.mxu1  ;;  %v7049_v12 = vpop.f32.mrf.mxu0 }
 0x3cb   : > { %v5512_v48 = vadd.f32 %v5511_v29, %v5510_v34  ;;  %v4328_v31 = vmax.f32 %v4287_v7, 0.0  ;;  %v3934_v63 = vadd.f32 %v3882_v45, %v10564_v0 }
 0x3cc   : > { %v6967_v28 = vpop.f32.mrf.mxu1  ;;  %v4232_v59 = vpop.f32.mrf.mxu0 }
 0x3cd   : > { %v5436_v49 = vsel %vm5313_vm11, %v4328_v31, 0.0  ;;  %v4288_v42 = vadd.f32 %v4232_v59, %v3933_v51 }
 0x3ce   : > { %v5513_v15 = vsel %vm5441_vm13, %v5436_v49, 0.0  ;;  %v3885_v10 = vpop.f32.mrf.mxu1  ;;  %v7050_v1 = vpop.f32.mrf.mxu0 }
 0x3cf   : > { %v5514_v41 = vadd.f32 %v5513_v15, %v5512_v48  ;;  %v4329_v44 = vmax.f32 %v4288_v42, 0.0 }
 0x3d0   : > { %v6968_v16 = vpop.f32.mrf.mxu1  ;;  %v4237_v8 = vpop.f32.mrf.mxu0 }
 0x3d1   : > { %v5437_v33 = vsel %vm5314_vm0, %v4329_v44, 0.0  ;;  %v4289_v38 = vadd.f32 %v4237_v8, %v3934_v63 }
 0x3d2   : > { %v5515_v53 = vsel %vm5441_vm13, %v5437_v33, 0.0  ;;  %v7053_v37 = vpop.f32.mrf.mxu0  ;;  %v3890_v60 = vpop.f32.mrf.mxu1 }
 0x3d3   : > { %v5516_v61 = vadd.f32 %v5515_v53, %v5514_v41  ;;  %v4330_v55 = vmax.f32 %v4289_v38, 0.0 }
 0x3d4   : > { %v4240_v54 = vpop.f32.mrf.mxu0  ;;  %v6971_v62 = vpop.f32.mrf.mxu1 }
 0x3d5   : > { %v5438_v14 = vsel %vm5315_vm1, %v4330_v55, 0.0 }
 0x3d6   : > { %v5517_v3 = vsel %vm5441_vm13, %v5438_v14, 0.0  ;;  %v7054_v9 = vpop.f32.mrf.mxu0  ;;  %v3893_v47 = vpop.f32.mrf.mxu1 }
 0x3d7   : > { %v5518_v43 = vadd.f32 %v5517_v3, %v5516_v61 }
 0x3d8   : > { %v4245_v25 = vpop.f32.mrf.mxu0  ;;  %v6972_v32 = vpop.f32.mrf.mxu1 }
 0x3d9   : > { %v5524_v58 = vrot.slane %v5518_v43, 4 }
 0x3da   : > { %v7057_v23 = vpop.f32.mrf.mxu0 }
 0x3db   : > { %v5525_v17 = vadd.f32 %v5524_v58, %v5518_v43 }
 0x3dc   : > { %v4248_v40 = vpop.f32.mrf.mxu0 }
 0x3dd   : > { %v5526_v20 = vrot.slane %v5525_v17, 2 }
 0x3de   : > { %v7058_v39 = vpop.f32.mrf.mxu0 }
 0x3df   : > { %v5527_v35 = vadd.f32 %v5526_v20, %v5525_v17 }
 0x3e1   : > { %v5528_v18 = vrot.slane %v5527_v35, 1 }
 0x3e3   : > { %v5529_v50 = vadd.f32 %v5528_v18, %v5527_v35 }
 0x3e5   : > { %v5530_v19 = vmul.f32 0.00390625, %v5529_v50 }
 0x3e7   : > { %7084 = vmatmul.mubr.msk.f32.vlgmr.msra.gmra.mxu1 %vm5441_vm13, %v5530_v19  ;;  %5532 = vst.msk [vmem:[%s237_s29] sm:$0x1] %vm5531_vm2, %v5530_v19 }
 0x3e8   : > { %7333 = shalt.err (!%p7330_p5)
}
 0x3e9   : > { %s7334_s21 = scalar_lea.hbm %s5636_s7, 16  ;;  %s7338_s26 = scalar_lea.hbm %s10419_s3, 32 }
 0x3ea   : > { %p7335_p6 = scmp.ne.s32.totalorder %s5636_s7, %s7334_s21  ;;  %p7339_p10 = scmp.lt.s32.totalorder %s5636_s7, %s10419_s3 }
 0x3eb   : > { %p7340_p11 = scmp.lt.s32.totalorder %s7338_s26, %s7334_s21 }
 0x3ec   : > { %p7336_p7 = pnand %p7335_p6, %p7497_p4 }
 0x3ed   : > { %p7341_p12 = por %p7340_p11, %p7339_p10 }
 0x3ee   : > { %p7337_p9 = pneg %p7336_p7 }
 0x3f0   : > { %p7342_p13 = pnand %p7341_p12, %p7337_p9 }
 0x3f2   : > { %7345 = shalt.err (!%p7342_p13)
}
 0x3f3   : > { %7163 = dma.vmem_to_hbm [thread:$0]  (%p7497_p4), %s5639_s8, 16, %s5636_s7, %s5621_s10   ;;  %vm5618_vm13 = vcmask 188416  }
 0x3f4   : > { %s243_s6 = scalar_lea.vmem [#allocation4], %s10340_s9  ;;  %s10369_s14 = scalar_lea.hbm %s10420_s4, %s6070_s30 }
 0x3f5   : > { %s5652_s11 = sshll.u32 %s243_s6, 4  ;;  %s5625_s21 = scalar_lea.sflag [#allocation5], %s10340_s9  ;;  %s10371_s11 = int_to_ptr.vmem [resolvable:$true] %s5652_s11 }
 0x3f6   : > { %s7346_s22 = scalar_lea.vmem %s10371_s11, 16  ;;  %s7431_s18 = smov [#allocation4]  }
 0x3f7   : > { %p7347_p0 = scmp.ne.s32.totalorder %s10371_s11, %s7346_s22  ;;  %s7350_s7 = sshll.u32 %s7431_s18, 4  ;;  %s7351_s7 = int_to_ptr.vmem [resolvable:$false] %s7350_s7 }
 0x3f8   : > { %s7352_s8 = scalar_lea.vmem %s7351_s7, 32  ;;  %p7353_p3 = scmp.lt.s32.totalorder %s10371_s11, %s7351_s7 }
 0x3f9   : > { %p7348_p1 = pnand %p7347_p0, %p7497_p4  ;;  %p7354_p5 = scmp.lt.s32.totalorder %s7352_s8, %s7346_s22 }
 0x3fb   : > { %p7349_p2 = pneg %p7348_p1  ;;  %p7355_p6 = por %p7354_p5, %p7353_p3 }
 0x3fd   : > { %p7356_p7 = pnand %p7355_p6, %p7349_p2 }
 0x4a7   : > { %v5614_v22 = vpop.f32.mrf.mxu1 }
 0x4a8   : > { %5619 = vst.msk [vmem:[%s243_s6] sm:$0x1] %vm5618_vm13, %v5614_v22 }
 0x4a9   : > { %v7085_v6 = vpop.f32.mrf.mxu1 }
 0x4aa   : > { %7359 = shalt.err (!%p7356_p7)
}
 0x4ab   : > { %s7360_s30 = scalar_lea.hbm %s10369_s14, 16  ;;  %s7364_s24 = scalar_lea.hbm %s10420_s4, 32 }
 0x4ac   : > { %p7361_p9 = scmp.ne.s32.totalorder %s10369_s14, %s7360_s30  ;;  %p7365_p12 = scmp.lt.s32.totalorder %s10369_s14, %s10420_s4 }
 0x4ad   : > { %p7366_p13 = scmp.lt.s32.totalorder %s7364_s24, %s7360_s30 }
 0x4ae   : > { %p7362_p10 = pnand %p7361_p9, %p7497_p4 }
 0x4af   : > { %p7367_p0 = por %p7366_p13, %p7365_p12 }
 0x4b0   : > { %p7363_p11 = pneg %p7362_p10 }
 0x4b2   : > { %p7368_p1 = pnand %p7367_p0, %p7363_p11 }
 0x4b4   : > { %7371 = shalt.err (!%p7368_p1)
}
 0x4b5   : > { %7164 = dma.vmem_to_hbm [thread:$0]  (%p7497_p4), %s10371_s11, 16, %s10369_s14, %s5625_s21  }
 0x4b6 PF: > { %p7174_p2 = scmp.ge.s32.totalorder %s7426_s20, 2  ;;  %s5664_s5 = sand.u32 1, %s7406_s15  }
 0x4b7   : > { %s5665_s6 = scalar_lea.sflag [#allocation3], %s5664_s5 }
 0x4b8   : > { %p7168_p3 = pnand %p7174_p2, %p7504_p8 }
 0x4ba   : > { %p7169_p5 = pneg %p7168_p3 }
 0x4bc   : > { %7397 = dma.done.wait (%p7169_p5), %s5665_s6, 16  }
 0x4bd   : > { %7399 = vsyncadd (%p7169_p5), %s5665_s6, 4294967280  ;;  %s5673_s12 = scalar_lea.sflag [#allocation5], %s5664_s5 }
 0x4be   : > { %7401 = dma.done.wait (%p7169_p5), %s5673_s12, 16  }
 0x4bf   : > { %7403 = vsyncadd (%p7169_p5), %s5673_s12, 4294967280  ;;  %s21_s20 = sadd.s32 1, %s7426_s20   ;;  %s10565_s15 = smov %s7410_s16 }
 0x4c0   : > { %p18_p6 = scmp.ge.s32.totalorder %s21_s20, 4   ;;  %s10566_s16 = smov %s7414_s17 }
 0x4c1   : > { %s10567_s17 = smov %s7510_s28  ;;  %s10568_s18 = smov %s7422_s19 }
 0x4c2   : > { %s10569_s19 = smov %s10571_s23  ;;  %20 = sbr.rel (!%p18_p6) target bundleno = 6 (0x6), region = 98 }
 0x4c7   :  { %5677 = vsyncpa [#allocation3], 1 }
 0x4c8   :  { %5679 = vsyncpa [#allocation3 + $0x1], 1 }
 0x4c9   :  { %5680 = vsyncpa [#allocation5], 1 }
 0x4ca   :  { %5682 = vsyncpa [#allocation5 + $0x1], 1 }

</bundles_post_ra>
